<compile_context>
chip_gen: v6e
topology: v6e:2x2x1
jax: 0.10.0
libtpu: 0.0.40
codegen_flags: <defaults>
</compile_context>

<pallas_src>
import functools

import jax
import jax.numpy as jnp
from jax.experimental import pallas as pl
from jax.experimental.pallas import tpu as pltpu

EPS = 1e-5
_VMEM_LIMIT = 48 * 1024 * 1024  # <= v7x's 64 MiB per-TC VMEM; plenty on v5e/v6e (128 MiB)


# ---------------------------- helpers ----------------------------

def _round_up(x, m):
    return (x + m - 1) // m * m


def _choose_tm(m):
    """MXU-friendly M tile: large fixed tiles, >=2 blocks when M >= 1024 (v7x megacore)."""
    if m >= 1024:
        return 512
    if m >= 512:
        return 256
    return max(16, _round_up(m, 16))   # tiny layers: single block, bf16-sublane aligned


def _pick_tile(dim, candidates):
    for c in candidates:
        if dim % c == 0:
            return c
    return dim


# ---------------------------- Pallas kernels ----------------------------

def _gemm_bn_kernel(a_ref, b_ref, bias_ref, o_ref, *, relu):
    """One M-tile of (A @ B) with BN scale pre-folded into B.  Epilogue: +bias (+ReLU).

    A tile (tm, K_pad) bf16, resident B (K_pad, N_pad) bf16, f32 MXU accumulation,
    bf16 store (lane-dense, halves HBM writeback)."""
    y = jnp.dot(a_ref[...], b_ref[...], preferred_element_type=jnp.float32)
    y = y + bias_ref[...]
    if relu:
        y = jnp.maximum(y, 0.0)
    o_ref[...] = y.astype(o_ref.dtype)


def _gemm_bn_res_relu_kernel(a_ref, b_ref, bias_ref, res_ref, o_ref):
    """Second conv of a Block: GEMM + bias + bf16 residual (added in f32) + ReLU."""
    y = jnp.dot(a_ref[...], b_ref[...], preferred_element_type=jnp.float32)
    y = y + bias_ref[...] + res_ref[...].astype(jnp.float32)
    o_ref[...] = jnp.maximum(y, 0.0).astype(o_ref.dtype)


def _avgpool_fc_kernel(x_ref, w_ref, b_ref, o_ref, acc_ref, *, inv_hw):
    """Global average pool (accumulated across the spatial grid axis, f32) + Linear."""
    s = pl.program_id(0)

    @pl.when(s == 0)
    def _init():
        acc_ref[...] = jnp.zeros_like(acc_ref)

    # Promote bf16 tile to f32 BEFORE reducing (accuracy of the pooled sum).
    acc_ref[...] += jnp.sum(x_ref[...].astype(jnp.float32), axis=1)

    @pl.when(s == pl.num_programs(0) - 1)
    def _done():
        pooled = acc_ref[...] * inv_hw
        out = jnp.dot(pooled, w_ref[...],
                      preferred_element_type=jnp.float32) + b_ref[...]
        o_ref[...] = out.astype(o_ref.dtype)


# ---------------------------- GEMM wrapper ----------------------------

def _gemm_bn(a, b, bias, residual=None, *, relu):
    """out(bf16) = epilogue(A @ B).

    a: (M, K_pad) bf16 (K already 128-aligned by conv_bn), b: (K_pad, N) bf16
    (BN scale folded), bias: (N,) f32, residual: (M, N) bf16 or None."""
    M, K_pad = a.shape
    N = b.shape[1]
    N_pad = _round_up(N, 128)          # lane-dense output / weight columns
    tm = _choose_tm(M)
    M_pad = _round_up(M, tm)
    grid_m = M_pad // tm

    a_p = a if M_pad == M else jnp.pad(a, ((0, M_pad - M), (0, 0)))
    b_p = b if N_pad == N else jnp.pad(b, ((0, 0), (0, N_pad - N)))
    bias_p = jnp.pad(bias.reshape(1, N).astype(jnp.float32),
                     ((0, 0), (0, N_pad - N)))

    in_specs = [
        pl.BlockSpec((tm, K_pad), lambda i: (i, 0)),      # A tile, streamed over M
        pl.BlockSpec((K_pad, N_pad), lambda i: (0, 0)),   # B: resident across the grid
        pl.BlockSpec((1, N_pad), lambda i: (0, 0)),       # bias: resident
    ]
    inputs = [a_p, b_p, bias_p]

    if residual is not None:
        r = residual.astype(jnp.bfloat16)
        if M_pad != M or N_pad != N:
            r = jnp.pad(r, ((0, M_pad - M), (0, N_pad - N)))
        in_specs.append(pl.BlockSpec((tm, N_pad), lambda i: (i, 0)))
        inputs.append(r)
        kernel = _gemm_bn_res_relu_kernel
    else:
        kernel = functools.partial(_gemm_bn_kernel, relu=relu)

    out = pl.pallas_call(
        kernel,
        out_shape=jax.ShapeDtypeStruct((M_pad, N_pad), jnp.bfloat16),
        grid_spec=pltpu.PrefetchScalarGridSpec(
            num_scalar_prefetch=0,
            grid=(grid_m,),
            in_specs=in_specs,
            out_specs=pl.BlockSpec((tm, N_pad), lambda i: (i, 0)),
        ),
        compiler_params=pltpu.CompilerParams(
            dimension_semantics=("parallel",),
            vmem_limit_bytes=_VMEM_LIMIT,
        ),
    )(*inputs)

    if M_pad != M or N_pad != N:
        out = out[:M, :N]
    return out


# ---------------------------- conv / pool wrappers ----------------------------

def _im2col_taps(x, k, stride, pad):
    """x: (N,H,W,C) bf16 -> list of k*k shifted taps (N,Ho,Wo,C), plus (Ho, Wo)."""
    n, h, w, c = x.shape
    xp = jnp.pad(x, ((0, 0), (pad, pad), (pad, pad), (0, 0)))
    ho = (h + 2 * pad - k) // stride + 1
    wo = (w + 2 * pad - k) // stride + 1
    taps = [xp[:, i:i + stride * ho:stride, j:j + stride * wo:stride, :]
            for i in range(k) for j in range(k)]
    return taps, ho, wo


def conv_bn(x, w, scale, bias, *, stride, pad, relu, residual=None):
    """Conv2d(bias=False) + BatchNorm (+ReLU / +residual+ReLU), one Pallas GEMM.

    x: (N,H,W,Cin) bf16 NHWC; w: (Cout,Cin,k,k) torch layout f32; scale/bias: (Cout,)."""
    x = x.astype(jnp.bfloat16)
    cout, cin, k, _ = w.shape
    n = x.shape[0]
    taps, ho, wo = _im2col_taps(x, k, stride, pad)

    K = k * k * cin
    K_pad = _round_up(K, 128)
    if K_pad != K:
        # Zero "tap" appended inside the concat -> K is 128-aligned with no extra
        # full-matrix pad pass over the inflated im2col activations.
        taps = taps + [jnp.zeros((n, ho, wo, K_pad - K), jnp.bfloat16)]
    cols = jnp.concatenate(taps, axis=-1)              # (N,Ho,Wo,K_pad) bf16
    a = cols.reshape(n * ho * wo, K_pad)

    # Fold the eval-mode BN scale into the static weights (tiny, done once per call).
    bmat = (jnp.transpose(w, (2, 3, 1, 0)).reshape(K, cout) * scale.reshape(1, cout))
    bmat = jnp.pad(bmat, ((0, K_pad - K), (0, 0))).astype(jnp.bfloat16)

    r = None if residual is None else residual.reshape(n * ho * wo, cout)
    out = _gemm_bn(a, bmat, bias, r, relu=relu)        # (M, Cout) bf16
    return out.reshape(n, ho, wo, cout)


def maxpool_3x3_s2_p1(x):
    """MaxPool2d(3, stride=2, padding=1) as fused XLA elementwise maxima (bf16)."""
    n, h, w, c = x.shape
    xp = jnp.pad(x, ((0, 0), (1, 1), (1, 1), (0, 0)), constant_values=-jnp.inf)
    ho = (h + 2 - 3) // 2 + 1
    wo = (w + 2 - 3) // 2 + 1
    out = None
    for i in range(3):
        for j in range(3):
            tap = xp[:, i:i + 2 * ho:2, j:j + 2 * wo:2, :]
            out = tap if out is None else jnp.maximum(out, tap)
    return out


def avgpool_fc(feats, fc_w, fc_b):
    """feats: (N, H*W, C) bf16 -> logits (N, num_class) f32. Gridded over spatial axis."""
    n, hw, c = feats.shape
    num_class = fc_w.shape[1]
    nc_pad = _round_up(num_class, 128)                 # lane-dense output store
    w_p = jnp.pad(fc_w.astype(jnp.float32), ((0, 0), (0, nc_pad - num_class)))
    b_p = jnp.pad(fc_b.reshape(1, num_class).astype(jnp.float32),
                  ((0, 0), (0, nc_pad - num_class)))

    t_hw = _pick_tile(hw, (512, 256, 128, 64, 32, 16, 8)) if hw % 8 == 0 else hw
    grid = (hw // t_hw,)
    kernel = functools.partial(_avgpool_fc_kernel, inv_hw=1.0 / float(hw))

    out = pl.pallas_call(
        kernel,
        out_shape=jax.ShapeDtypeStruct((n, nc_pad), jnp.float32),
        grid_spec=pltpu.PrefetchScalarGridSpec(
            num_scalar_prefetch=0,
            grid=grid,
            in_specs=[
                pl.BlockSpec((n, t_hw, c), lambda s: (0, s, 0)),
                pl.BlockSpec((c, nc_pad), lambda s: (0, 0)),
                pl.BlockSpec((1, nc_pad), lambda s: (0, 0)),
            ],
            out_specs=pl.BlockSpec((n, nc_pad), lambda s: (0, 0)),
            scratch_shapes=[pltpu.VMEM((n, c), jnp.float32)],
        ),
        compiler_params=pltpu.CompilerParams(
            dimension_semantics=("arbitrary",),
            vmem_limit_bytes=_VMEM_LIMIT,
        ),
    )(feats, w_p, b_p)
    return out[:, :num_class]


# ---------------------------- parameters (deterministic init) ----------------------------

def _conv_w(key, cout, cin, k):
    fan_in = cin * k * k
    return jax.random.normal(key, (cout, cin, k, k), jnp.float32) / jnp.sqrt(float(fan_in))


def _bn_params(key, c):
    k1, k2, k3, k4 = jax.random.split(key, 4)
    gamma = 1.0 + 0.1 * jax.random.normal(k1, (c,), jnp.float32)
    beta = 0.1 * jax.random.normal(k2, (c,), jnp.float32)
    mean = 0.1 * jax.random.normal(k3, (c,), jnp.float32)
    var = 1.0 + 0.1 * jnp.abs(jax.random.normal(k4, (c,), jnp.float32))
    scale = gamma / jnp.sqrt(var + EPS)
    bias = beta - mean * scale
    return scale, bias


def init_params(key, inp_channels, f_channels, num_residual_block, num_class):
    keys = iter(jax.random.split(key, 256))
    params = {
        "conv1_w": _conv_w(next(keys), f_channels, inp_channels, 7),
        "bn1": _bn_params(next(keys), f_channels),
    }
    blocks = []
    inp = out = f_channels
    is_down = False
    for nb in num_residual_block:          # mirrors Resnet.resnet_layer
        for _ in range(nb):
            blk = {}
            blk["conv1_w"] = _conv_w(next(keys), out, inp, 3)
            blk["bn1"] = _bn_params(next(keys), out)
            blk["conv2_w"] = _conv_w(next(keys), out, out, 3)
            blk["bn2"] = _bn_params(next(keys), out)
            if is_down:                    # downsample presence encodes is_down (jit-static)
                blk["down_w"] = _conv_w(next(keys), out, inp, 1)
                blk["down_bn"] = _bn_params(next(keys), out)
            blocks.append(blk)
            inp = out
            is_down = False
        is_down = True
        out = inp * 2
    params["blocks"] = blocks
    fc_in = out // 2
    params["fc_w"] = jax.random.normal(next(keys), (fc_in, num_class), jnp.float32) / jnp.sqrt(float(fc_in))
    params["fc_b"] = 0.01 * jax.random.normal(next(keys), (num_class,), jnp.float32)
    return params


# ---------------------------- forward ----------------------------

def block_forward(x, blk):
    x0 = x
    is_down = "down_w" in blk
    s1, b1 = blk["bn1"]
    y = conv_bn(x, blk["conv1_w"], s1, b1,
                stride=2 if is_down else 1, pad=1, relu=True)
    if is_down:
        sd, bd = blk["down_bn"]
        x0 = conv_bn(x0, blk["down_w"], sd, bd, stride=2, pad=0, relu=False)
    s2, b2 = blk["bn2"]
    # conv2 + bn2 + residual add + relu, fused in the Pallas GEMM epilogue (bf16 residual).
    y = conv_bn(y, blk["conv2_w"], s2, b2, stride=1, pad=1, relu=True, residual=x0)
    return y


def resnet_forward(params, x_nchw):
    # layout: input is NCHW (PyTorch convention); NHWC + bf16 internally.
    x = jnp.transpose(x_nchw, (0, 2, 3, 1)).astype(jnp.bfloat16)
    s1, b1 = params["bn1"]
    x = conv_bn(x, params["conv1_w"], s1, b1, stride=2, pad=3, relu=True)   # conv1+bn1+relu
    x = maxpool_3x3_s2_p1(x)                                                # maxpool (bf16)
    for blk in params["blocks"]:                                            # residual stages
        x = block_forward(x, blk)
    n, h, w, c = x.shape
    feats = x.reshape(n, h * w, c)
    # AdaptiveAvgPool2d((1,1)) + flatten + Linear fused in one gridded kernel (f32 out).
    logits = avgpool_fc(feats, params["fc_w"], params["fc_b"])
    return logits  # note: nn.Softmax is defined in __init__ but unused in forward()


# ---------------------------- main ----------------------------

if __name__ == "__main__":
    key = jax.random.PRNGKey(0)
    kp, kx = jax.random.split(key)

    # Small config consistent with the module structure (4 stages of 2 blocks,
    # channel doubling per stage, odd input-channel count like the 131 default).
    INP_C, F_C, NUM_CLASS = 5, 8, 2
    params = init_params(kp, INP_C, F_C, (2, 2, 2, 2), NUM_CLASS)

    x = jax.random.normal(kx, (2, INP_C, 32, 32), jnp.float32)   # NCHW like PyTorch
    fwd = jax.jit(resnet_forward)
    out = fwd(params, x)
    out = jax.block_until_ready(out)
    assert out.shape == (2, NUM_CLASS) and out.dtype == jnp.float32
    print("KERNEL_OK")
</pallas_src>

<mosaic_0001>
module attributes {stable_mosaic.version = 11 : i64} {
  func.func @_gemm_bn_kernel(%arg0: i32, %arg1: memref<256x256xbf16, #tpu.memory_space<vmem>>, %arg2: memref<256x128xbf16, #tpu.memory_space<vmem>>, %arg3: memref<1x128xf32, #tpu.memory_space<vmem>>, %arg4: memref<256x128xbf16, #tpu.memory_space<vmem>>) attributes {dimension_semantics = [#tpu.dimension_semantics<parallel>], iteration_bounds = array<i64: 2>, scalar_prefetch = 0 : i64, scratch_operands = 0 : i64, tpu.core_type = #tpu.core_type<tc>, window_params = [{transform_indices = @transform_0, window_bounds = array<i64: 256, 256>}, {pipeline_mode = #tpu.pipeline_mode<synchronous>, transform_indices = @transform_1, window_bounds = array<i64: 256, 128>}, {pipeline_mode = #tpu.pipeline_mode<synchronous>, transform_indices = @transform_2, window_bounds = array<i64: 1, 128>}, {transform_indices = @transform_3, window_bounds = array<i64: 256, 128>}]} {
    %c0 = arith.constant 0 : index
    %c0_0 = arith.constant 0 : index
    %0 = vector.load %arg1[%c0, %c0_0] : memref<256x256xbf16, #tpu.memory_space<vmem>>, vector<256x256xbf16>
    %c0_1 = arith.constant 0 : index
    %c0_2 = arith.constant 0 : index
    %1 = vector.load %arg2[%c0_1, %c0_2] : memref<256x128xbf16, #tpu.memory_space<vmem>>, vector<256x128xbf16>
    %cst = arith.constant dense<0.000000e+00> : vector<256x128xf32>
    %2 = tpu.matmul %0, %1, %cst {dimension_numbers = #tpu.dot_dimension_numbers<[1], [0], [0], [1], [0, 0, 1, 1], [], []>} : vector<256x256xbf16>, vector<256x128xbf16>, vector<256x128xf32> -> vector<256x128xf32>
    %c0_3 = arith.constant 0 : index
    %c0_4 = arith.constant 0 : index
    %3 = vector.load %arg3[%c0_3, %c0_4] : memref<1x128xf32, #tpu.memory_space<vmem>>, vector<1x128xf32>
    %4 = vector.broadcast %3 : vector<1x128xf32> to vector<256x128xf32>
    %5 = arith.addf %2, %4 : vector<256x128xf32>
    %cst_5 = arith.constant 0.000000e+00 : f32
    %6 = vector.broadcast %cst_5 : f32 to vector<256x128xf32>
    %7 = arith.maximumf %5, %6 : vector<256x128xf32>
    %8 = arith.truncf %7 : vector<256x128xf32> to vector<256x128xbf16>
    %c0_6 = arith.constant 0 : index
    %c0_7 = arith.constant 0 : index
    %9 = vector.load %arg4[%c0_6, %c0_7] : memref<256x128xbf16, #tpu.memory_space<vmem>>, vector<256x128xbf16>
    tpu.vector_store %arg4[%c0_6, %c0_7], %8 {strides = array<i32>} : memref<256x128xbf16, #tpu.memory_space<vmem>>, vector<256x128xbf16>,
    return
  }
  func.func @transform_0(%arg0: i32) -> (i32, i32) {
    %c0_i32 = arith.constant 0 : i32
    %c0_i32_0 = arith.constant 0 : i32
    return %arg0, %c0_i32 : i32, i32
  }
  func.func @transform_1(%arg0: i32) -> (i32, i32) {
    %c0_i32 = arith.constant 0 : i32
    %c0_i32_0 = arith.constant 0 : i32
    %c0_i32_1 = arith.constant 0 : i32
    return %c0_i32, %c0_i32_0 : i32, i32
  }
  func.func @transform_2(%arg0: i32) -> (i32, i32) {
    %c0_i32 = arith.constant 0 : i32
    %c0_i32_0 = arith.constant 0 : i32
    %c0_i32_1 = arith.constant 0 : i32
    return %c0_i32, %c0_i32_0 : i32, i32
  }
  func.func @transform_3(%arg0: i32) -> (i32, i32) {
    %c0_i32 = arith.constant 0 : i32
    %c0_i32_0 = arith.constant 0 : i32
    return %arg0, %c0_i32 : i32, i32
  }
}

module attributes {stable_mosaic.version = 11 : i64} {
  func.func @_gemm_bn_kernel(%arg0: i32, %arg1: memref<128x128xbf16, #tpu.memory_space<vmem>>, %arg2: memref<128x128xbf16, #tpu.memory_space<vmem>>, %arg3: memref<1x128xf32, #tpu.memory_space<vmem>>, %arg4: memref<128x128xbf16, #tpu.memory_space<vmem>>) attributes {dimension_semantics = [#tpu.dimension_semantics<parallel>], iteration_bounds = array<i64: 1>, scalar_prefetch = 0 : i64, scratch_operands = 0 : i64, tpu.core_type = #tpu.core_type<tc>, window_params = [{transform_indices = @transform_0, window_bounds = array<i64: 128, 128>}, {pipeline_mode = #tpu.pipeline_mode<synchronous>, transform_indices = @transform_1, window_bounds = array<i64: 128, 128>}, {pipeline_mode = #tpu.pipeline_mode<synchronous>, transform_indices = @transform_2, window_bounds = array<i64: 1, 128>}, {transform_indices = @transform_3, window_bounds = array<i64: 128, 128>}]} {
    %c0 = arith.constant 0 : index
    %c0_0 = arith.constant 0 : index
    %0 = vector.load %arg1[%c0, %c0_0] : memref<128x128xbf16, #tpu.memory_space<vmem>>, vector<128x128xbf16>
    %c0_1 = arith.constant 0 : index
    %c0_2 = arith.constant 0 : index
    %1 = vector.load %arg2[%c0_1, %c0_2] : memref<128x128xbf16, #tpu.memory_space<vmem>>, vector<128x128xbf16>
    %cst = arith.constant dense<0.000000e+00> : vector<128x128xf32>
    %2 = tpu.matmul %0, %1, %cst {dimension_numbers = #tpu.dot_dimension_numbers<[1], [0], [0], [1], [0, 0, 1, 1], [], []>} : vector<128x128xbf16>, vector<128x128xbf16>, vector<128x128xf32> -> vector<128x128xf32>
    %c0_3 = arith.constant 0 : index
    %c0_4 = arith.constant 0 : index
    %3 = vector.load %arg3[%c0_3, %c0_4] : memref<1x128xf32, #tpu.memory_space<vmem>>, vector<1x128xf32>
    %4 = vector.broadcast %3 : vector<1x128xf32> to vector<128x128xf32>
    %5 = arith.addf %2, %4 : vector<128x128xf32>
    %cst_5 = arith.constant 0.000000e+00 : f32
    %6 = vector.broadcast %cst_5 : f32 to vector<128x128xf32>
    %7 = arith.maximumf %5, %6 : vector<128x128xf32>
    %8 = arith.truncf %7 : vector<128x128xf32> to vector<128x128xbf16>
    %c0_6 = arith.constant 0 : index
    %c0_7 = arith.constant 0 : index
    %9 = vector.load %arg4[%c0_6, %c0_7] : memref<128x128xbf16, #tpu.memory_space<vmem>>, vector<128x128xbf16>
    tpu.vector_store %arg4[%c0_6, %c0_7], %8 {strides = array<i32>} : memref<128x128xbf16, #tpu.memory_space<vmem>>, vector<128x128xbf16>,
    return
  }
  func.func @transform_0(%arg0: i32) -> (i32, i32) {
    %c0_i32 = arith.constant 0 : i32
    %c0_i32_0 = arith.constant 0 : i32
    return %arg0, %c0_i32 : i32, i32
  }
  func.func @transform_1(%arg0: i32) -> (i32, i32) {
    %c0_i32 = arith.constant 0 : i32
    %c0_i32_0 = arith.constant 0 : i32
    %c0_i32_1 = arith.constant 0 : i32
    return %c0_i32, %c0_i32_0 : i32, i32
  }
  func.func @transform_2(%arg0: i32) -> (i32, i32) {
    %c0_i32 = arith.constant 0 : i32
    %c0_i32_0 = arith.constant 0 : i32
    %c0_i32_1 = arith.constant 0 : i32
    return %c0_i32, %c0_i32_0 : i32, i32
  }
  func.func @transform_3(%arg0: i32) -> (i32, i32) {
    %c0_i32 = arith.constant 0 : i32
    %c0_i32_0 = arith.constant 0 : i32
    return %arg0, %c0_i32 : i32, i32
  }
}

module attributes {stable_mosaic.version = 11 : i64} {
  func.func @_gemm_bn_res_relu_kernel(%arg0: i32, %arg1: memref<128x128xbf16, #tpu.memory_space<vmem>>, %arg2: memref<128x128xbf16, #tpu.memory_space<vmem>>, %arg3: memref<1x128xf32, #tpu.memory_space<vmem>>, %arg4: memref<128x128xbf16, #tpu.memory_space<vmem>>, %arg5: memref<128x128xbf16, #tpu.memory_space<vmem>>) attributes {dimension_semantics = [#tpu.dimension_semantics<parallel>], iteration_bounds = array<i64: 1>, scalar_prefetch = 0 : i64, scratch_operands = 0 : i64, tpu.core_type = #tpu.core_type<tc>, window_params = [{transform_indices = @transform_0, window_bounds = array<i64: 128, 128>}, {pipeline_mode = #tpu.pipeline_mode<synchronous>, transform_indices = @transform_1, window_bounds = array<i64: 128, 128>}, {pipeline_mode = #tpu.pipeline_mode<synchronous>, transform_indices = @transform_2, window_bounds = array<i64: 1, 128>}, {transform_indices = @transform_3, window_bounds = array<i64: 128, 128>}, {transform_indices = @transform_4, window_bounds = array<i64: 128, 128>}]} {
    %c0 = arith.constant 0 : index
    %c0_0 = arith.constant 0 : index
    %0 = vector.load %arg1[%c0, %c0_0] : memref<128x128xbf16, #tpu.memory_space<vmem>>, vector<128x128xbf16>
    %c0_1 = arith.constant 0 : index
    %c0_2 = arith.constant 0 : index
    %1 = vector.load %arg2[%c0_1, %c0_2] : memref<128x128xbf16, #tpu.memory_space<vmem>>, vector<128x128xbf16>
    %cst = arith.constant dense<0.000000e+00> : vector<128x128xf32>
    %2 = tpu.matmul %0, %1, %cst {dimension_numbers = #tpu.dot_dimension_numbers<[1], [0], [0], [1], [0, 0, 1, 1], [], []>} : vector<128x128xbf16>, vector<128x128xbf16>, vector<128x128xf32> -> vector<128x128xf32>
    %c0_3 = arith.constant 0 : index
    %c0_4 = arith.constant 0 : index
    %3 = vector.load %arg3[%c0_3, %c0_4] : memref<1x128xf32, #tpu.memory_space<vmem>>, vector<1x128xf32>
    %4 = vector.broadcast %3 : vector<1x128xf32> to vector<128x128xf32>
    %5 = arith.addf %2, %4 : vector<128x128xf32>
    %c0_5 = arith.constant 0 : index
    %c0_6 = arith.constant 0 : index
    %6 = vector.load %arg4[%c0_5, %c0_6] : memref<128x128xbf16, #tpu.memory_space<vmem>>, vector<128x128xbf16>
    %7 = arith.extf %6 : vector<128x128xbf16> to vector<128x128xf32>
    %8 = arith.addf %5, %7 : vector<128x128xf32>
    %cst_7 = arith.constant 0.000000e+00 : f32
    %9 = vector.broadcast %cst_7 : f32 to vector<128x128xf32>
    %10 = arith.maximumf %8, %9 : vector<128x128xf32>
    %11 = arith.truncf %10 : vector<128x128xf32> to vector<128x128xbf16>
    %c0_8 = arith.constant 0 : index
    %c0_9 = arith.constant 0 : index
    %12 = vector.load %arg5[%c0_8, %c0_9] : memref<128x128xbf16, #tpu.memory_space<vmem>>, vector<128x128xbf16>
    tpu.vector_store %arg5[%c0_8, %c0_9], %11 {strides = array<i32>} : memref<128x128xbf16, #tpu.memory_space<vmem>>, vector<128x128xbf16>,
    return
  }
  func.func @transform_0(%arg0: i32) -> (i32, i32) {
    %c0_i32 = arith.constant 0 : i32
    %c0_i32_0 = arith.constant 0 : i32
    return %arg0, %c0_i32 : i32, i32
  }
  func.func @transform_1(%arg0: i32) -> (i32, i32) {
    %c0_i32 = arith.constant 0 : i32
    %c0_i32_0 = arith.constant 0 : i32
    %c0_i32_1 = arith.constant 0 : i32
    return %c0_i32, %c0_i32_0 : i32, i32
  }
  func.func @transform_2(%arg0: i32) -> (i32, i32) {
    %c0_i32 = arith.constant 0 : i32
    %c0_i32_0 = arith.constant 0 : i32
    %c0_i32_1 = arith.constant 0 : i32
    return %c0_i32, %c0_i32_0 : i32, i32
  }
  func.func @transform_3(%arg0: i32) -> (i32, i32) {
    %c0_i32 = arith.constant 0 : i32
    %c0_i32_0 = arith.constant 0 : i32
    return %arg0, %c0_i32 : i32, i32
  }
  func.func @transform_4(%arg0: i32) -> (i32, i32) {
    %c0_i32 = arith.constant 0 : i32
    %c0_i32_0 = arith.constant 0 : i32
    return %arg0, %c0_i32 : i32, i32
  }
}

module attributes {stable_mosaic.version = 11 : i64} {
  func.func @_gemm_bn_kernel(%arg0: i32, %arg1: memref<32x128xbf16, #tpu.memory_space<vmem>>, %arg2: memref<128x128xbf16, #tpu.memory_space<vmem>>, %arg3: memref<1x128xf32, #tpu.memory_space<vmem>>, %arg4: memref<32x128xbf16, #tpu.memory_space<vmem>>) attributes {dimension_semantics = [#tpu.dimension_semantics<parallel>], iteration_bounds = array<i64: 1>, scalar_prefetch = 0 : i64, scratch_operands = 0 : i64, tpu.core_type = #tpu.core_type<tc>, window_params = [{transform_indices = @transform_0, window_bounds = array<i64: 32, 128>}, {pipeline_mode = #tpu.pipeline_mode<synchronous>, transform_indices = @transform_1, window_bounds = array<i64: 128, 128>}, {pipeline_mode = #tpu.pipeline_mode<synchronous>, transform_indices = @transform_2, window_bounds = array<i64: 1, 128>}, {transform_indices = @transform_3, window_bounds = array<i64: 32, 128>}]} {
    %c0 = arith.constant 0 : index
    %c0_0 = arith.constant 0 : index
    %0 = vector.load %arg1[%c0, %c0_0] : memref<32x128xbf16, #tpu.memory_space<vmem>>, vector<32x128xbf16>
    %c0_1 = arith.constant 0 : index
    %c0_2 = arith.constant 0 : index
    %1 = vector.load %arg2[%c0_1, %c0_2] : memref<128x128xbf16, #tpu.memory_space<vmem>>, vector<128x128xbf16>
    %cst = arith.constant dense<0.000000e+00> : vector<32x128xf32>
    %2 = tpu.matmul %0, %1, %cst {dimension_numbers = #tpu.dot_dimension_numbers<[1], [0], [0], [1], [0, 0, 1, 1], [], []>} : vector<32x128xbf16>, vector<128x128xbf16>, vector<32x128xf32> -> vector<32x128xf32>
    %c0_3 = arith.constant 0 : index
    %c0_4 = arith.constant 0 : index
    %3 = vector.load %arg3[%c0_3, %c0_4] : memref<1x128xf32, #tpu.memory_space<vmem>>, vector<1x128xf32>
    %4 = vector.broadcast %3 : vector<1x128xf32> to vector<32x128xf32>
    %5 = arith.addf %2, %4 : vector<32x128xf32>
    %cst_5 = arith.constant 0.000000e+00 : f32
    %6 = vector.broadcast %cst_5 : f32 to vector<32x128xf32>
    %7 = arith.maximumf %5, %6 : vector<32x128xf32>
    %8 = arith.truncf %7 : vector<32x128xf32> to vector<32x128xbf16>
    %c0_6 = arith.constant 0 : index
    %c0_7 = arith.constant 0 : index
    %9 = vector.load %arg4[%c0_6, %c0_7] : memref<32x128xbf16, #tpu.memory_space<vmem>>, vector<32x128xbf16>
    tpu.vector_store %arg4[%c0_6, %c0_7], %8 {strides = array<i32>} : memref<32x128xbf16, #tpu.memory_space<vmem>>, vector<32x128xbf16>,
    return
  }
  func.func @transform_0(%arg0: i32) -> (i32, i32) {
    %c0_i32 = arith.constant 0 : i32
    %c0_i32_0 = arith.constant 0 : i32
    return %arg0, %c0_i32 : i32, i32
  }
  func.func @transform_1(%arg0: i32) -> (i32, i32) {
    %c0_i32 = arith.constant 0 : i32
    %c0_i32_0 = arith.constant 0 : i32
    %c0_i32_1 = arith.constant 0 : i32
    return %c0_i32, %c0_i32_0 : i32, i32
  }
  func.func @transform_2(%arg0: i32) -> (i32, i32) {
    %c0_i32 = arith.constant 0 : i32
    %c0_i32_0 = arith.constant 0 : i32
    %c0_i32_1 = arith.constant 0 : i32
    return %c0_i32, %c0_i32_0 : i32, i32
  }
  func.func @transform_3(%arg0: i32) -> (i32, i32) {
    %c0_i32 = arith.constant 0 : i32
    %c0_i32_0 = arith.constant 0 : i32
    return %arg0, %c0_i32 : i32, i32
  }
}

module attributes {stable_mosaic.version = 11 : i64} {
  func.func @_gemm_bn_kernel(%arg0: i32, %arg1: memref<32x128xbf16, #tpu.memory_space<vmem>>, %arg2: memref<128x128xbf16, #tpu.memory_space<vmem>>, %arg3: memref<1x128xf32, #tpu.memory_space<vmem>>, %arg4: memref<32x128xbf16, #tpu.memory_space<vmem>>) attributes {dimension_semantics = [#tpu.dimension_semantics<parallel>], iteration_bounds = array<i64: 1>, scalar_prefetch = 0 : i64, scratch_operands = 0 : i64, tpu.core_type = #tpu.core_type<tc>, window_params = [{transform_indices = @transform_0, window_bounds = array<i64: 32, 128>}, {pipeline_mode = #tpu.pipeline_mode<synchronous>, transform_indices = @transform_1, window_bounds = array<i64: 128, 128>}, {pipeline_mode = #tpu.pipeline_mode<synchronous>, transform_indices = @transform_2, window_bounds = array<i64: 1, 128>}, {transform_indices = @transform_3, window_bounds = array<i64: 32, 128>}]} {
    %c0 = arith.constant 0 : index
    %c0_0 = arith.constant 0 : index
    %0 = vector.load %arg1[%c0, %c0_0] : memref<32x128xbf16, #tpu.memory_space<vmem>>, vector<32x128xbf16>
    %c0_1 = arith.constant 0 : index
    %c0_2 = arith.constant 0 : index
    %1 = vector.load %arg2[%c0_1, %c0_2] : memref<128x128xbf16, #tpu.memory_space<vmem>>, vector<128x128xbf16>
    %cst = arith.constant dense<0.000000e+00> : vector<32x128xf32>
    %2 = tpu.matmul %0, %1, %cst {dimension_numbers = #tpu.dot_dimension_numbers<[1], [0], [0], [1], [0, 0, 1, 1], [], []>} : vector<32x128xbf16>, vector<128x128xbf16>, vector<32x128xf32> -> vector<32x128xf32>
    %c0_3 = arith.constant 0 : index
    %c0_4 = arith.constant 0 : index
    %3 = vector.load %arg3[%c0_3, %c0_4] : memref<1x128xf32, #tpu.memory_space<vmem>>, vector<1x128xf32>
    %4 = vector.broadcast %3 : vector<1x128xf32> to vector<32x128xf32>
    %5 = arith.addf %2, %4 : vector<32x128xf32>
    %6 = arith.truncf %5 : vector<32x128xf32> to vector<32x128xbf16>
    %c0_5 = arith.constant 0 : index
    %c0_6 = arith.constant 0 : index
    %7 = vector.load %arg4[%c0_5, %c0_6] : memref<32x128xbf16, #tpu.memory_space<vmem>>, vector<32x128xbf16>
    tpu.vector_store %arg4[%c0_5, %c0_6], %6 {strides = array<i32>} : memref<32x128xbf16, #tpu.memory_space<vmem>>, vector<32x128xbf16>,
    return
  }
  func.func @transform_0(%arg0: i32) -> (i32, i32) {
    %c0_i32 = arith.constant 0 : i32
    %c0_i32_0 = arith.constant 0 : i32
    return %arg0, %c0_i32 : i32, i32
  }
  func.func @transform_1(%arg0: i32) -> (i32, i32) {
    %c0_i32 = arith.constant 0 : i32
    %c0_i32_0 = arith.constant 0 : i32
    %c0_i32_1 = arith.constant 0 : i32
    return %c0_i32, %c0_i32_0 : i32, i32
  }
  func.func @transform_2(%arg0: i32) -> (i32, i32) {
    %c0_i32 = arith.constant 0 : i32
    %c0_i32_0 = arith.constant 0 : i32
    %c0_i32_1 = arith.constant 0 : i32
    return %c0_i32, %c0_i32_0 : i32, i32
  }
  func.func @transform_3(%arg0: i32) -> (i32, i32) {
    %c0_i32 = arith.constant 0 : i32
    %c0_i32_0 = arith.constant 0 : i32
    return %arg0, %c0_i32 : i32, i32
  }
}

module attributes {stable_mosaic.version = 11 : i64} {
  func.func @_gemm_bn_kernel(%arg0: i32, %arg1: memref<32x256xbf16, #tpu.memory_space<vmem>>, %arg2: memref<256x128xbf16, #tpu.memory_space<vmem>>, %arg3: memref<1x128xf32, #tpu.memory_space<vmem>>, %arg4: memref<32x128xbf16, #tpu.memory_space<vmem>>) attributes {dimension_semantics = [#tpu.dimension_semantics<parallel>], iteration_bounds = array<i64: 1>, scalar_prefetch = 0 : i64, scratch_operands = 0 : i64, tpu.core_type = #tpu.core_type<tc>, window_params = [{transform_indices = @transform_0, window_bounds = array<i64: 32, 256>}, {pipeline_mode = #tpu.pipeline_mode<synchronous>, transform_indices = @transform_1, window_bounds = array<i64: 256, 128>}, {pipeline_mode = #tpu.pipeline_mode<synchronous>, transform_indices = @transform_2, window_bounds = array<i64: 1, 128>}, {transform_indices = @transform_3, window_bounds = array<i64: 32, 128>}]} {
    %c0 = arith.constant 0 : index
    %c0_0 = arith.constant 0 : index
    %0 = vector.load %arg1[%c0, %c0_0] : memref<32x256xbf16, #tpu.memory_space<vmem>>, vector<32x256xbf16>
    %c0_1 = arith.constant 0 : index
    %c0_2 = arith.constant 0 : index
    %1 = vector.load %arg2[%c0_1, %c0_2] : memref<256x128xbf16, #tpu.memory_space<vmem>>, vector<256x128xbf16>
    %cst = arith.constant dense<0.000000e+00> : vector<32x128xf32>
    %2 = tpu.matmul %0, %1, %cst {dimension_numbers = #tpu.dot_dimension_numbers<[1], [0], [0], [1], [0, 0, 1, 1], [], []>} : vector<32x256xbf16>, vector<256x128xbf16>, vector<32x128xf32> -> vector<32x128xf32>
    %c0_3 = arith.constant 0 : index
    %c0_4 = arith.constant 0 : index
    %3 = vector.load %arg3[%c0_3, %c0_4] : memref<1x128xf32, #tpu.memory_space<vmem>>, vector<1x128xf32>
    %4 = vector.broadcast %3 : vector<1x128xf32> to vector<32x128xf32>
    %5 = arith.addf %2, %4 : vector<32x128xf32>
    %cst_5 = arith.constant 0.000000e+00 : f32
    %6 = vector.broadcast %cst_5 : f32 to vector<32x128xf32>
    %7 = arith.maximumf %5, %6 : vector<32x128xf32>
    %8 = arith.truncf %7 : vector<32x128xf32> to vector<32x128xbf16>
    %c0_6 = arith.constant 0 : index
    %c0_7 = arith.constant 0 : index
    %9 = vector.load %arg4[%c0_6, %c0_7] : memref<32x128xbf16, #tpu.memory_space<vmem>>, vector<32x128xbf16>
    tpu.vector_store %arg4[%c0_6, %c0_7], %8 {strides = array<i32>} : memref<32x128xbf16, #tpu.memory_space<vmem>>, vector<32x128xbf16>,
    return
  }
  func.func @transform_0(%arg0: i32) -> (i32, i32) {
    %c0_i32 = arith.constant 0 : i32
    %c0_i32_0 = arith.constant 0 : i32
    return %arg0, %c0_i32 : i32, i32
  }
  func.func @transform_1(%arg0: i32) -> (i32, i32) {
    %c0_i32 = arith.constant 0 : i32
    %c0_i32_0 = arith.constant 0 : i32
    %c0_i32_1 = arith.constant 0 : i32
    return %c0_i32, %c0_i32_0 : i32, i32
  }
  func.func @transform_2(%arg0: i32) -> (i32, i32) {
    %c0_i32 = arith.constant 0 : i32
    %c0_i32_0 = arith.constant 0 : i32
    %c0_i32_1 = arith.constant 0 : i32
    return %c0_i32, %c0_i32_0 : i32, i32
  }
  func.func @transform_3(%arg0: i32) -> (i32, i32) {
    %c0_i32 = arith.constant 0 : i32
    %c0_i32_0 = arith.constant 0 : i32
    return %arg0, %c0_i32 : i32, i32
  }
}

module attributes {stable_mosaic.version = 11 : i64} {
  func.func @_gemm_bn_res_relu_kernel(%arg0: i32, %arg1: memref<32x256xbf16, #tpu.memory_space<vmem>>, %arg2: memref<256x128xbf16, #tpu.memory_space<vmem>>, %arg3: memref<1x128xf32, #tpu.memory_space<vmem>>, %arg4: memref<32x128xbf16, #tpu.memory_space<vmem>>, %arg5: memref<32x128xbf16, #tpu.memory_space<vmem>>) attributes {dimension_semantics = [#tpu.dimension_semantics<parallel>], iteration_bounds = array<i64: 1>, scalar_prefetch = 0 : i64, scratch_operands = 0 : i64, tpu.core_type = #tpu.core_type<tc>, window_params = [{transform_indices = @transform_0, window_bounds = array<i64: 32, 256>}, {pipeline_mode = #tpu.pipeline_mode<synchronous>, transform_indices = @transform_1, window_bounds = array<i64: 256, 128>}, {pipeline_mode = #tpu.pipeline_mode<synchronous>, transform_indices = @transform_2, window_bounds = array<i64: 1, 128>}, {transform_indices = @transform_3, window_bounds = array<i64: 32, 128>}, {transform_indices = @transform_4, window_bounds = array<i64: 32, 128>}]} {
    %c0 = arith.constant 0 : index
    %c0_0 = arith.constant 0 : index
    %0 = vector.load %arg1[%c0, %c0_0] : memref<32x256xbf16, #tpu.memory_space<vmem>>, vector<32x256xbf16>
    %c0_1 = arith.constant 0 : index
    %c0_2 = arith.constant 0 : index
    %1 = vector.load %arg2[%c0_1, %c0_2] : memref<256x128xbf16, #tpu.memory_space<vmem>>, vector<256x128xbf16>
    %cst = arith.constant dense<0.000000e+00> : vector<32x128xf32>
    %2 = tpu.matmul %0, %1, %cst {dimension_numbers = #tpu.dot_dimension_numbers<[1], [0], [0], [1], [0, 0, 1, 1], [], []>} : vector<32x256xbf16>, vector<256x128xbf16>, vector<32x128xf32> -> vector<32x128xf32>
    %c0_3 = arith.constant 0 : index
    %c0_4 = arith.constant 0 : index
    %3 = vector.load %arg3[%c0_3, %c0_4] : memref<1x128xf32, #tpu.memory_space<vmem>>, vector<1x128xf32>
    %4 = vector.broadcast %3 : vector<1x128xf32> to vector<32x128xf32>
    %5 = arith.addf %2, %4 : vector<32x128xf32>
    %c0_5 = arith.constant 0 : index
    %c0_6 = arith.constant 0 : index
    %6 = vector.load %arg4[%c0_5, %c0_6] : memref<32x128xbf16, #tpu.memory_space<vmem>>, vector<32x128xbf16>
    %7 = arith.extf %6 : vector<32x128xbf16> to vector<32x128xf32>
    %8 = arith.addf %5, %7 : vector<32x128xf32>
    %cst_7 = arith.constant 0.000000e+00 : f32
    %9 = vector.broadcast %cst_7 : f32 to vector<32x128xf32>
    %10 = arith.maximumf %8, %9 : vector<32x128xf32>
    %11 = arith.truncf %10 : vector<32x128xf32> to vector<32x128xbf16>
    %c0_8 = arith.constant 0 : index
    %c0_9 = arith.constant 0 : index
    %12 = vector.load %arg5[%c0_8, %c0_9] : memref<32x128xbf16, #tpu.memory_space<vmem>>, vector<32x128xbf16>
    tpu.vector_store %arg5[%c0_8, %c0_9], %11 {strides = array<i32>} : memref<32x128xbf16, #tpu.memory_space<vmem>>, vector<32x128xbf16>,
    return
  }
  func.func @transform_0(%arg0: i32) -> (i32, i32) {
    %c0_i32 = arith.constant 0 : i32
    %c0_i32_0 = arith.constant 0 : i32
    return %arg0, %c0_i32 : i32, i32
  }
  func.func @transform_1(%arg0: i32) -> (i32, i32) {
    %c0_i32 = arith.constant 0 : i32
    %c0_i32_0 = arith.constant 0 : i32
    %c0_i32_1 = arith.constant 0 : i32
    return %c0_i32, %c0_i32_0 : i32, i32
  }
  func.func @transform_2(%arg0: i32) -> (i32, i32) {
    %c0_i32 = arith.constant 0 : i32
    %c0_i32_0 = arith.constant 0 : i32
    %c0_i32_1 = arith.constant 0 : i32
    return %c0_i32, %c0_i32_0 : i32, i32
  }
  func.func @transform_3(%arg0: i32) -> (i32, i32) {
    %c0_i32 = arith.constant 0 : i32
    %c0_i32_0 = arith.constant 0 : i32
    return %arg0, %c0_i32 : i32, i32
  }
  func.func @transform_4(%arg0: i32) -> (i32, i32) {
    %c0_i32 = arith.constant 0 : i32
    %c0_i32_0 = arith.constant 0 : i32
    return %arg0, %c0_i32 : i32, i32
  }
}

module attributes {stable_mosaic.version = 11 : i64} {
  func.func @_gemm_bn_kernel(%arg0: i32, %arg1: memref<16x256xbf16, #tpu.memory_space<vmem>>, %arg2: memref<256x128xbf16, #tpu.memory_space<vmem>>, %arg3: memref<1x128xf32, #tpu.memory_space<vmem>>, %arg4: memref<16x128xbf16, #tpu.memory_space<vmem>>) attributes {dimension_semantics = [#tpu.dimension_semantics<parallel>], iteration_bounds = array<i64: 1>, scalar_prefetch = 0 : i64, scratch_operands = 0 : i64, tpu.core_type = #tpu.core_type<tc>, window_params = [{transform_indices = @transform_0, window_bounds = array<i64: 16, 256>}, {pipeline_mode = #tpu.pipeline_mode<synchronous>, transform_indices = @transform_1, window_bounds = array<i64: 256, 128>}, {pipeline_mode = #tpu.pipeline_mode<synchronous>, transform_indices = @transform_2, window_bounds = array<i64: 1, 128>}, {transform_indices = @transform_3, window_bounds = array<i64: 16, 128>}]} {
    %c0 = arith.constant 0 : index
    %c0_0 = arith.constant 0 : index
    %0 = vector.load %arg1[%c0, %c0_0] : memref<16x256xbf16, #tpu.memory_space<vmem>>, vector<16x256xbf16>
    %c0_1 = arith.constant 0 : index
    %c0_2 = arith.constant 0 : index
    %1 = vector.load %arg2[%c0_1, %c0_2] : memref<256x128xbf16, #tpu.memory_space<vmem>>, vector<256x128xbf16>
    %cst = arith.constant dense<0.000000e+00> : vector<16x128xf32>
    %2 = tpu.matmul %0, %1, %cst {dimension_numbers = #tpu.dot_dimension_numbers<[1], [0], [0], [1], [0, 0, 1, 1], [], []>} : vector<16x256xbf16>, vector<256x128xbf16>, vector<16x128xf32> -> vector<16x128xf32>
    %c0_3 = arith.constant 0 : index
    %c0_4 = arith.constant 0 : index
    %3 = vector.load %arg3[%c0_3, %c0_4] : memref<1x128xf32, #tpu.memory_space<vmem>>, vector<1x128xf32>
    %4 = vector.broadcast %3 : vector<1x128xf32> to vector<16x128xf32>
    %5 = arith.addf %2, %4 : vector<16x128xf32>
    %cst_5 = arith.constant 0.000000e+00 : f32
    %6 = vector.broadcast %cst_5 : f32 to vector<16x128xf32>
    %7 = arith.maximumf %5, %6 : vector<16x128xf32>
    %8 = arith.truncf %7 : vector<16x128xf32> to vector<16x128xbf16>
    %c0_6 = arith.constant 0 : index
    %c0_7 = arith.constant 0 : index
    %9 = vector.load %arg4[%c0_6, %c0_7] : memref<16x128xbf16, #tpu.memory_space<vmem>>, vector<16x128xbf16>
    tpu.vector_store %arg4[%c0_6, %c0_7], %8 {strides = array<i32>} : memref<16x128xbf16, #tpu.memory_space<vmem>>, vector<16x128xbf16>,
    return
  }
  func.func @transform_0(%arg0: i32) -> (i32, i32) {
    %c0_i32 = arith.constant 0 : i32
    %c0_i32_0 = arith.constant 0 : i32
    return %arg0, %c0_i32 : i32, i32
  }
  func.func @transform_1(%arg0: i32) -> (i32, i32) {
    %c0_i32 = arith.constant 0 : i32
    %c0_i32_0 = arith.constant 0 : i32
    %c0_i32_1 = arith.constant 0 : i32
    return %c0_i32, %c0_i32_0 : i32, i32
  }
  func.func @transform_2(%arg0: i32) -> (i32, i32) {
    %c0_i32 = arith.constant 0 : i32
    %c0_i32_0 = arith.constant 0 : i32
    %c0_i32_1 = arith.constant 0 : i32
    return %c0_i32, %c0_i32_0 : i32, i32
  }
  func.func @transform_3(%arg0: i32) -> (i32, i32) {
    %c0_i32 = arith.constant 0 : i32
    %c0_i32_0 = arith.constant 0 : i32
    return %arg0, %c0_i32 : i32, i32
  }
}

module attributes {stable_mosaic.version = 11 : i64} {
  func.func @_gemm_bn_kernel(%arg0: i32, %arg1: memref<16x128xbf16, #tpu.memory_space<vmem>>, %arg2: memref<128x128xbf16, #tpu.memory_space<vmem>>, %arg3: memref<1x128xf32, #tpu.memory_space<vmem>>, %arg4: memref<16x128xbf16, #tpu.memory_space<vmem>>) attributes {dimension_semantics = [#tpu.dimension_semantics<parallel>], iteration_bounds = array<i64: 1>, scalar_prefetch = 0 : i64, scratch_operands = 0 : i64, tpu.core_type = #tpu.core_type<tc>, window_params = [{transform_indices = @transform_0, window_bounds = array<i64: 16, 128>}, {pipeline_mode = #tpu.pipeline_mode<synchronous>, transform_indices = @transform_1, window_bounds = array<i64: 128, 128>}, {pipeline_mode = #tpu.pipeline_mode<synchronous>, transform_indices = @transform_2, window_bounds = array<i64: 1, 128>}, {transform_indices = @transform_3, window_bounds = array<i64: 16, 128>}]} {
    %c0 = arith.constant 0 : index
    %c0_0 = arith.constant 0 : index
    %0 = vector.load %arg1[%c0, %c0_0] : memref<16x128xbf16, #tpu.memory_space<vmem>>, vector<16x128xbf16>
    %c0_1 = arith.constant 0 : index
    %c0_2 = arith.constant 0 : index
    %1 = vector.load %arg2[%c0_1, %c0_2] : memref<128x128xbf16, #tpu.memory_space<vmem>>, vector<128x128xbf16>
    %cst = arith.constant dense<0.000000e+00> : vector<16x128xf32>
    %2 = tpu.matmul %0, %1, %cst {dimension_numbers = #tpu.dot_dimension_numbers<[1], [0], [0], [1], [0, 0, 1, 1], [], []>} : vector<16x128xbf16>, vector<128x128xbf16>, vector<16x128xf32> -> vector<16x128xf32>
    %c0_3 = arith.constant 0 : index
    %c0_4 = arith.constant 0 : index
    %3 = vector.load %arg3[%c0_3, %c0_4] : memref<1x128xf32, #tpu.memory_space<vmem>>, vector<1x128xf32>
    %4 = vector.broadcast %3 : vector<1x128xf32> to vector<16x128xf32>
    %5 = arith.addf %2, %4 : vector<16x128xf32>
    %6 = arith.truncf %5 : vector<16x128xf32> to vector<16x128xbf16>
    %c0_5 = arith.constant 0 : index
    %c0_6 = arith.constant 0 : index
    %7 = vector.load %arg4[%c0_5, %c0_6] : memref<16x128xbf16, #tpu.memory_space<vmem>>, vector<16x128xbf16>
    tpu.vector_store %arg4[%c0_5, %c0_6], %6 {strides = array<i32>} : memref<16x128xbf16, #tpu.memory_space<vmem>>, vector<16x128xbf16>,
    return
  }
  func.func @transform_0(%arg0: i32) -> (i32, i32) {
    %c0_i32 = arith.constant 0 : i32
    %c0_i32_0 = arith.constant 0 : i32
    return %arg0, %c0_i32 : i32, i32
  }
  func.func @transform_1(%arg0: i32) -> (i32, i32) {
    %c0_i32 = arith.constant 0 : i32
    %c0_i32_0 = arith.constant 0 : i32
    %c0_i32_1 = arith.constant 0 : i32
    return %c0_i32, %c0_i32_0 : i32, i32
  }
  func.func @transform_2(%arg0: i32) -> (i32, i32) {
    %c0_i32 = arith.constant 0 : i32
    %c0_i32_0 = arith.constant 0 : i32
    %c0_i32_1 = arith.constant 0 : i32
    return %c0_i32, %c0_i32_0 : i32, i32
  }
  func.func @transform_3(%arg0: i32) -> (i32, i32) {
    %c0_i32 = arith.constant 0 : i32
    %c0_i32_0 = arith.constant 0 : i32
    return %arg0, %c0_i32 : i32, i32
  }
}

module attributes {stable_mosaic.version = 11 : i64} {
  func.func @_gemm_bn_res_relu_kernel(%arg0: i32, %arg1: memref<16x384xbf16, #tpu.memory_space<vmem>>, %arg2: memref<384x128xbf16, #tpu.memory_space<vmem>>, %arg3: memref<1x128xf32, #tpu.memory_space<vmem>>, %arg4: memref<16x128xbf16, #tpu.memory_space<vmem>>, %arg5: memref<16x128xbf16, #tpu.memory_space<vmem>>) attributes {dimension_semantics = [#tpu.dimension_semantics<parallel>], iteration_bounds = array<i64: 1>, scalar_prefetch = 0 : i64, scratch_operands = 0 : i64, tpu.core_type = #tpu.core_type<tc>, window_params = [{transform_indices = @transform_0, window_bounds = array<i64: 16, 384>}, {pipeline_mode = #tpu.pipeline_mode<synchronous>, transform_indices = @transform_1, window_bounds = array<i64: 384, 128>}, {pipeline_mode = #tpu.pipeline_mode<synchronous>, transform_indices = @transform_2, window_bounds = array<i64: 1, 128>}, {transform_indices = @transform_3, window_bounds = array<i64: 16, 128>}, {transform_indices = @transform_4, window_bounds = array<i64: 16, 128>}]} {
    %c0 = arith.constant 0 : index
    %c0_0 = arith.constant 0 : index
    %0 = vector.load %arg1[%c0, %c0_0] : memref<16x384xbf16, #tpu.memory_space<vmem>>, vector<16x384xbf16>
    %c0_1 = arith.constant 0 : index
    %c0_2 = arith.constant 0 : index
    %1 = vector.load %arg2[%c0_1, %c0_2] : memref<384x128xbf16, #tpu.memory_space<vmem>>, vector<384x128xbf16>
    %cst = arith.constant dense<0.000000e+00> : vector<16x128xf32>
    %2 = tpu.matmul %0, %1, %cst {dimension_numbers = #tpu.dot_dimension_numbers<[1], [0], [0], [1], [0, 0, 1, 1], [], []>} : vector<16x384xbf16>, vector<384x128xbf16>, vector<16x128xf32> -> vector<16x128xf32>
    %c0_3 = arith.constant 0 : index
    %c0_4 = arith.constant 0 : index
    %3 = vector.load %arg3[%c0_3, %c0_4] : memref<1x128xf32, #tpu.memory_space<vmem>>, vector<1x128xf32>
    %4 = vector.broadcast %3 : vector<1x128xf32> to vector<16x128xf32>
    %5 = arith.addf %2, %4 : vector<16x128xf32>
    %c0_5 = arith.constant 0 : index
    %c0_6 = arith.constant 0 : index
    %6 = vector.load %arg4[%c0_5, %c0_6] : memref<16x128xbf16, #tpu.memory_space<vmem>>, vector<16x128xbf16>
    %7 = arith.extf %6 : vector<16x128xbf16> to vector<16x128xf32>
    %8 = arith.addf %5, %7 : vector<16x128xf32>
    %cst_7 = arith.constant 0.000000e+00 : f32
    %9 = vector.broadcast %cst_7 : f32 to vector<16x128xf32>
    %10 = arith.maximumf %8, %9 : vector<16x128xf32>
    %11 = arith.truncf %10 : vector<16x128xf32> to vector<16x128xbf16>
    %c0_8 = arith.constant 0 : index
    %c0_9 = arith.constant 0 : index
    %12 = vector.load %arg5[%c0_8, %c0_9] : memref<16x128xbf16, #tpu.memory_space<vmem>>, vector<16x128xbf16>
    tpu.vector_store %arg5[%c0_8, %c0_9], %11 {strides = array<i32>} : memref<16x128xbf16, #tpu.memory_space<vmem>>, vector<16x128xbf16>,
    return
  }
  func.func @transform_0(%arg0: i32) -> (i32, i32) {
    %c0_i32 = arith.constant 0 : i32
    %c0_i32_0 = arith.constant 0 : i32
    return %arg0, %c0_i32 : i32, i32
  }
  func.func @transform_1(%arg0: i32) -> (i32, i32) {
    %c0_i32 = arith.constant 0 : i32
    %c0_i32_0 = arith.constant 0 : i32
    %c0_i32_1 = arith.constant 0 : i32
    return %c0_i32, %c0_i32_0 : i32, i32
  }
  func.func @transform_2(%arg0: i32) -> (i32, i32) {
    %c0_i32 = arith.constant 0 : i32
    %c0_i32_0 = arith.constant 0 : i32
    %c0_i32_1 = arith.constant 0 : i32
    return %c0_i32, %c0_i32_0 : i32, i32
  }
  func.func @transform_3(%arg0: i32) -> (i32, i32) {
    %c0_i32 = arith.constant 0 : i32
    %c0_i32_0 = arith.constant 0 : i32
    return %arg0, %c0_i32 : i32, i32
  }
  func.func @transform_4(%arg0: i32) -> (i32, i32) {
    %c0_i32 = arith.constant 0 : i32
    %c0_i32_0 = arith.constant 0 : i32
    return %arg0, %c0_i32 : i32, i32
  }
}

module attributes {stable_mosaic.version = 11 : i64} {
  func.func @_gemm_bn_kernel(%arg0: i32, %arg1: memref<16x384xbf16, #tpu.memory_space<vmem>>, %arg2: memref<384x128xbf16, #tpu.memory_space<vmem>>, %arg3: memref<1x128xf32, #tpu.memory_space<vmem>>, %arg4: memref<16x128xbf16, #tpu.memory_space<vmem>>) attributes {dimension_semantics = [#tpu.dimension_semantics<parallel>], iteration_bounds = array<i64: 1>, scalar_prefetch = 0 : i64, scratch_operands = 0 : i64, tpu.core_type = #tpu.core_type<tc>, window_params = [{transform_indices = @transform_0, window_bounds = array<i64: 16, 384>}, {pipeline_mode = #tpu.pipeline_mode<synchronous>, transform_indices = @transform_1, window_bounds = array<i64: 384, 128>}, {pipeline_mode = #tpu.pipeline_mode<synchronous>, transform_indices = @transform_2, window_bounds = array<i64: 1, 128>}, {transform_indices = @transform_3, window_bounds = array<i64: 16, 128>}]} {
    %c0 = arith.constant 0 : index
    %c0_0 = arith.constant 0 : index
    %0 = vector.load %arg1[%c0, %c0_0] : memref<16x384xbf16, #tpu.memory_space<vmem>>, vector<16x384xbf16>
    %c0_1 = arith.constant 0 : index
    %c0_2 = arith.constant 0 : index
    %1 = vector.load %arg2[%c0_1, %c0_2] : memref<384x128xbf16, #tpu.memory_space<vmem>>, vector<384x128xbf16>
    %cst = arith.constant dense<0.000000e+00> : vector<16x128xf32>
    %2 = tpu.matmul %0, %1, %cst {dimension_numbers = #tpu.dot_dimension_numbers<[1], [0], [0], [1], [0, 0, 1, 1], [], []>} : vector<16x384xbf16>, vector<384x128xbf16>, vector<16x128xf32> -> vector<16x128xf32>
    %c0_3 = arith.constant 0 : index
    %c0_4 = arith.constant 0 : index
    %3 = vector.load %arg3[%c0_3, %c0_4] : memref<1x128xf32, #tpu.memory_space<vmem>>, vector<1x128xf32>
    %4 = vector.broadcast %3 : vector<1x128xf32> to vector<16x128xf32>
    %5 = arith.addf %2, %4 : vector<16x128xf32>
    %cst_5 = arith.constant 0.000000e+00 : f32
    %6 = vector.broadcast %cst_5 : f32 to vector<16x128xf32>
    %7 = arith.maximumf %5, %6 : vector<16x128xf32>
    %8 = arith.truncf %7 : vector<16x128xf32> to vector<16x128xbf16>
    %c0_6 = arith.constant 0 : index
    %c0_7 = arith.constant 0 : index
    %9 = vector.load %arg4[%c0_6, %c0_7] : memref<16x128xbf16, #tpu.memory_space<vmem>>, vector<16x128xbf16>
    tpu.vector_store %arg4[%c0_6, %c0_7], %8 {strides = array<i32>} : memref<16x128xbf16, #tpu.memory_space<vmem>>, vector<16x128xbf16>,
    return
  }
  func.func @transform_0(%arg0: i32) -> (i32, i32) {
    %c0_i32 = arith.constant 0 : i32
    %c0_i32_0 = arith.constant 0 : i32
    return %arg0, %c0_i32 : i32, i32
  }
  func.func @transform_1(%arg0: i32) -> (i32, i32) {
    %c0_i32 = arith.constant 0 : i32
    %c0_i32_0 = arith.constant 0 : i32
    %c0_i32_1 = arith.constant 0 : i32
    return %c0_i32, %c0_i32_0 : i32, i32
  }
  func.func @transform_2(%arg0: i32) -> (i32, i32) {
    %c0_i32 = arith.constant 0 : i32
    %c0_i32_0 = arith.constant 0 : i32
    %c0_i32_1 = arith.constant 0 : i32
    return %c0_i32, %c0_i32_0 : i32, i32
  }
  func.func @transform_3(%arg0: i32) -> (i32, i32) {
    %c0_i32 = arith.constant 0 : i32
    %c0_i32_0 = arith.constant 0 : i32
    return %arg0, %c0_i32 : i32, i32
  }
}

module attributes {stable_mosaic.version = 11 : i64} {
  func.func @_gemm_bn_res_relu_kernel(%arg0: i32, %arg1: memref<16x640xbf16, #tpu.memory_space<vmem>>, %arg2: memref<640x128xbf16, #tpu.memory_space<vmem>>, %arg3: memref<1x128xf32, #tpu.memory_space<vmem>>, %arg4: memref<16x128xbf16, #tpu.memory_space<vmem>>, %arg5: memref<16x128xbf16, #tpu.memory_space<vmem>>) attributes {dimension_semantics = [#tpu.dimension_semantics<parallel>], iteration_bounds = array<i64: 1>, scalar_prefetch = 0 : i64, scratch_operands = 0 : i64, tpu.core_type = #tpu.core_type<tc>, window_params = [{transform_indices = @transform_0, window_bounds = array<i64: 16, 640>}, {pipeline_mode = #tpu.pipeline_mode<synchronous>, transform_indices = @transform_1, window_bounds = array<i64: 640, 128>}, {pipeline_mode = #tpu.pipeline_mode<synchronous>, transform_indices = @transform_2, window_bounds = array<i64: 1, 128>}, {transform_indices = @transform_3, window_bounds = array<i64: 16, 128>}, {transform_indices = @transform_4, window_bounds = array<i64: 16, 128>}]} {
    %c0 = arith.constant 0 : index
    %c0_0 = arith.constant 0 : index
    %0 = vector.load %arg1[%c0, %c0_0] : memref<16x640xbf16, #tpu.memory_space<vmem>>, vector<16x640xbf16>
    %c0_1 = arith.constant 0 : index
    %c0_2 = arith.constant 0 : index
    %1 = vector.load %arg2[%c0_1, %c0_2] : memref<640x128xbf16, #tpu.memory_space<vmem>>, vector<640x128xbf16>
    %cst = arith.constant dense<0.000000e+00> : vector<16x128xf32>
    %2 = tpu.matmul %0, %1, %cst {dimension_numbers = #tpu.dot_dimension_numbers<[1], [0], [0], [1], [0, 0, 1, 1], [], []>} : vector<16x640xbf16>, vector<640x128xbf16>, vector<16x128xf32> -> vector<16x128xf32>
    %c0_3 = arith.constant 0 : index
    %c0_4 = arith.constant 0 : index
    %3 = vector.load %arg3[%c0_3, %c0_4] : memref<1x128xf32, #tpu.memory_space<vmem>>, vector<1x128xf32>
    %4 = vector.broadcast %3 : vector<1x128xf32> to vector<16x128xf32>
    %5 = arith.addf %2, %4 : vector<16x128xf32>
    %c0_5 = arith.constant 0 : index
    %c0_6 = arith.constant 0 : index
    %6 = vector.load %arg4[%c0_5, %c0_6] : memref<16x128xbf16, #tpu.memory_space<vmem>>, vector<16x128xbf16>
    %7 = arith.extf %6 : vector<16x128xbf16> to vector<16x128xf32>
    %8 = arith.addf %5, %7 : vector<16x128xf32>
    %cst_7 = arith.constant 0.000000e+00 : f32
    %9 = vector.broadcast %cst_7 : f32 to vector<16x128xf32>
    %10 = arith.maximumf %8, %9 : vector<16x128xf32>
    %11 = arith.truncf %10 : vector<16x128xf32> to vector<16x128xbf16>
    %c0_8 = arith.constant 0 : index
    %c0_9 = arith.constant 0 : index
    %12 = vector.load %arg5[%c0_8, %c0_9] : memref<16x128xbf16, #tpu.memory_space<vmem>>, vector<16x128xbf16>
    tpu.vector_store %arg5[%c0_8, %c0_9], %11 {strides = array<i32>} : memref<16x128xbf16, #tpu.memory_space<vmem>>, vector<16x128xbf16>,
    return
  }
  func.func @transform_0(%arg0: i32) -> (i32, i32) {
    %c0_i32 = arith.constant 0 : i32
    %c0_i32_0 = arith.constant 0 : i32
    return %arg0, %c0_i32 : i32, i32
  }
  func.func @transform_1(%arg0: i32) -> (i32, i32) {
    %c0_i32 = arith.constant 0 : i32
    %c0_i32_0 = arith.constant 0 : i32
    %c0_i32_1 = arith.constant 0 : i32
    return %c0_i32, %c0_i32_0 : i32, i32
  }
  func.func @transform_2(%arg0: i32) -> (i32, i32) {
    %c0_i32 = arith.constant 0 : i32
    %c0_i32_0 = arith.constant 0 : i32
    %c0_i32_1 = arith.constant 0 : i32
    return %c0_i32, %c0_i32_0 : i32, i32
  }
  func.func @transform_3(%arg0: i32) -> (i32, i32) {
    %c0_i32 = arith.constant 0 : i32
    %c0_i32_0 = arith.constant 0 : i32
    return %arg0, %c0_i32 : i32, i32
  }
  func.func @transform_4(%arg0: i32) -> (i32, i32) {
    %c0_i32 = arith.constant 0 : i32
    %c0_i32_0 = arith.constant 0 : i32
    return %arg0, %c0_i32 : i32, i32
  }
}

module attributes {stable_mosaic.version = 11 : i64} {
  func.func @_gemm_bn_kernel(%arg0: i32, %arg1: memref<16x640xbf16, #tpu.memory_space<vmem>>, %arg2: memref<640x128xbf16, #tpu.memory_space<vmem>>, %arg3: memref<1x128xf32, #tpu.memory_space<vmem>>, %arg4: memref<16x128xbf16, #tpu.memory_space<vmem>>) attributes {dimension_semantics = [#tpu.dimension_semantics<parallel>], iteration_bounds = array<i64: 1>, scalar_prefetch = 0 : i64, scratch_operands = 0 : i64, tpu.core_type = #tpu.core_type<tc>, window_params = [{transform_indices = @transform_0, window_bounds = array<i64: 16, 640>}, {pipeline_mode = #tpu.pipeline_mode<synchronous>, transform_indices = @transform_1, window_bounds = array<i64: 640, 128>}, {pipeline_mode = #tpu.pipeline_mode<synchronous>, transform_indices = @transform_2, window_bounds = array<i64: 1, 128>}, {transform_indices = @transform_3, window_bounds = array<i64: 16, 128>}]} {
    %c0 = arith.constant 0 : index
    %c0_0 = arith.constant 0 : index
    %0 = vector.load %arg1[%c0, %c0_0] : memref<16x640xbf16, #tpu.memory_space<vmem>>, vector<16x640xbf16>
    %c0_1 = arith.constant 0 : index
    %c0_2 = arith.constant 0 : index
    %1 = vector.load %arg2[%c0_1, %c0_2] : memref<640x128xbf16, #tpu.memory_space<vmem>>, vector<640x128xbf16>
    %cst = arith.constant dense<0.000000e+00> : vector<16x128xf32>
    %2 = tpu.matmul %0, %1, %cst {dimension_numbers = #tpu.dot_dimension_numbers<[1], [0], [0], [1], [0, 0, 1, 1], [], []>} : vector<16x640xbf16>, vector<640x128xbf16>, vector<16x128xf32> -> vector<16x128xf32>
    %c0_3 = arith.constant 0 : index
    %c0_4 = arith.constant 0 : index
    %3 = vector.load %arg3[%c0_3, %c0_4] : memref<1x128xf32, #tpu.memory_space<vmem>>, vector<1x128xf32>
    %4 = vector.broadcast %3 : vector<1x128xf32> to vector<16x128xf32>
    %5 = arith.addf %2, %4 : vector<16x128xf32>
    %cst_5 = arith.constant 0.000000e+00 : f32
    %6 = vector.broadcast %cst_5 : f32 to vector<16x128xf32>
    %7 = arith.maximumf %5, %6 : vector<16x128xf32>
    %8 = arith.truncf %7 : vector<16x128xf32> to vector<16x128xbf16>
    %c0_6 = arith.constant 0 : index
    %c0_7 = arith.constant 0 : index
    %9 = vector.load %arg4[%c0_6, %c0_7] : memref<16x128xbf16, #tpu.memory_space<vmem>>, vector<16x128xbf16>
    tpu.vector_store %arg4[%c0_6, %c0_7], %8 {strides = array<i32>} : memref<16x128xbf16, #tpu.memory_space<vmem>>, vector<16x128xbf16>,
    return
  }
  func.func @transform_0(%arg0: i32) -> (i32, i32) {
    %c0_i32 = arith.constant 0 : i32
    %c0_i32_0 = arith.constant 0 : i32
    return %arg0, %c0_i32 : i32, i32
  }
  func.func @transform_1(%arg0: i32) -> (i32, i32) {
    %c0_i32 = arith.constant 0 : i32
    %c0_i32_0 = arith.constant 0 : i32
    %c0_i32_1 = arith.constant 0 : i32
    return %c0_i32, %c0_i32_0 : i32, i32
  }
  func.func @transform_2(%arg0: i32) -> (i32, i32) {
    %c0_i32 = arith.constant 0 : i32
    %c0_i32_0 = arith.constant 0 : i32
    %c0_i32_1 = arith.constant 0 : i32
    return %c0_i32, %c0_i32_0 : i32, i32
  }
  func.func @transform_3(%arg0: i32) -> (i32, i32) {
    %c0_i32 = arith.constant 0 : i32
    %c0_i32_0 = arith.constant 0 : i32
    return %arg0, %c0_i32 : i32, i32
  }
}

module attributes {stable_mosaic.version = 11 : i64} {
  func.func @_avgpool_fc_kernel(%arg0: i32, %arg1: memref<2x1x64xbf16, #tpu.memory_space<vmem>>, %arg2: memref<64x128xf32, #tpu.memory_space<vmem>>, %arg3: memref<1x128xf32, #tpu.memory_space<vmem>>, %arg4: memref<2x128xf32, #tpu.memory_space<vmem>>, %arg5: memref<2x64xf32, #tpu.memory_space<vmem>>) attributes {dimension_semantics = [#tpu.dimension_semantics<arbitrary>], iteration_bounds = array<i64: 1>, scalar_prefetch = 0 : i64, scratch_operands = 1 : i64, tpu.core_type = #tpu.core_type<tc>, window_params = [{transform_indices = @transform_0, window_bounds = array<i64: 2, 1, 64>}, {pipeline_mode = #tpu.pipeline_mode<synchronous>, transform_indices = @transform_1, window_bounds = array<i64: 64, 128>}, {pipeline_mode = #tpu.pipeline_mode<synchronous>, transform_indices = @transform_2, window_bounds = array<i64: 1, 128>}, {pipeline_mode = #tpu.pipeline_mode<synchronous>, transform_indices = @transform_3, window_bounds = array<i64: 2, 128>}]} {
    %c0_i32 = arith.constant 0 : i32
    %0 = arith.cmpi eq, %arg0, %c0_i32 : i32
    %1 = arith.extui %0 : i1 to i32
    %c0_i32_0 = arith.constant 0 : i32
    %2 = arith.cmpi ne, %1, %c0_i32_0 : i32
    scf.if %2 {
      %cst_9 = arith.constant 0.000000e+00 : f32
      %12 = vector.broadcast %cst_9 : f32 to vector<2x64xf32>
      %c0_10 = arith.constant 0 : index
      %c0_11 = arith.constant 0 : index
      %13 = vector.load %arg5[%c0_10, %c0_11] : memref<2x64xf32, #tpu.memory_space<vmem>>, vector<2x64xf32>
      tpu.vector_store %arg5[%c0_10, %c0_11], %12 {strides = array<i32>} : memref<2x64xf32, #tpu.memory_space<vmem>>, vector<2x64xf32>,
    } else {
    }
    %c0 = arith.constant 0 : index
    %c0_1 = arith.constant 0 : index
    %3 = vector.load %arg5[%c0, %c0_1] : memref<2x64xf32, #tpu.memory_space<vmem>>, vector<2x64xf32>
    %c0_2 = arith.constant 0 : index
    %c0_3 = arith.constant 0 : index
    %c0_4 = arith.constant 0 : index
    %4 = vector.load %arg1[%c0_2, %c0_3, %c0_4] : memref<2x1x64xbf16, #tpu.memory_space<vmem>>, vector<2x1x64xbf16>
    %5 = arith.extf %4 : vector<2x1x64xbf16> to vector<2x1x64xf32>
    %cst = arith.constant dense<0.000000e+00> : vector<2x64xf32>
    %6 = vector.multi_reduction <add>, %5, %cst [1] : vector<2x1x64xf32> to vector<2x64xf32>
    %7 = arith.addf %3, %6 : vector<2x64xf32>
    %c0_5 = arith.constant 0 : index
    %c0_6 = arith.constant 0 : index
    %8 = vector.load %arg5[%c0_5, %c0_6] : memref<2x64xf32, #tpu.memory_space<vmem>>, vector<2x64xf32>
    tpu.vector_store %arg5[%c0_5, %c0_6], %7 {strides = array<i32>} : memref<2x64xf32, #tpu.memory_space<vmem>>, vector<2x64xf32>,
    %c0_i32_7 = arith.constant 0 : i32
    %9 = arith.cmpi eq, %arg0, %c0_i32_7 : i32
    %10 = arith.extui %9 : i1 to i32
    %c0_i32_8 = arith.constant 0 : i32
    %11 = arith.cmpi ne, %10, %c0_i32_8 : i32
    scf.if %11 {
      %c0_9 = arith.constant 0 : index
      %c0_10 = arith.constant 0 : index
      %12 = vector.load %arg5[%c0_9, %c0_10] : memref<2x64xf32, #tpu.memory_space<vmem>>, vector<2x64xf32>
      %cst_11 = arith.constant 1.000000e+00 : f32
      %13 = vector.broadcast %cst_11 : f32 to vector<2x64xf32>
      %14 = arith.mulf %12, %13 : vector<2x64xf32>
      %c0_12 = arith.constant 0 : index
      %c0_13 = arith.constant 0 : index
      %15 = vector.load %arg2[%c0_12, %c0_13] : memref<64x128xf32, #tpu.memory_space<vmem>>, vector<64x128xf32>
      %cst_14 = arith.constant dense<0.000000e+00> : vector<2x128xf32>
      %16 = tpu.matmul %14, %15, %cst_14 {dimension_numbers = #tpu.dot_dimension_numbers<[1], [0], [0], [1], [0, 0, 1, 1], [], []>} : vector<2x64xf32>, vector<64x128xf32>, vector<2x128xf32> -> vector<2x128xf32>
      %c0_15 = arith.constant 0 : index
      %c0_16 = arith.constant 0 : index
      %17 = vector.load %arg3[%c0_15, %c0_16] : memref<1x128xf32, #tpu.memory_space<vmem>>, vector<1x128xf32>
      %18 = vector.broadcast %17 : vector<1x128xf32> to vector<2x128xf32>
      %19 = arith.addf %16, %18 : vector<2x128xf32>
      %c0_17 = arith.constant 0 : index
      %c0_18 = arith.constant 0 : index
      %20 = vector.load %arg4[%c0_17, %c0_18] : memref<2x128xf32, #tpu.memory_space<vmem>>, vector<2x128xf32>
      tpu.vector_store %arg4[%c0_17, %c0_18], %19 {strides = array<i32>} : memref<2x128xf32, #tpu.memory_space<vmem>>, vector<2x128xf32>,
    } else {
    }
    return
  }
  func.func @transform_0(%arg0: i32) -> (i32, i32, i32) {
    %c0_i32 = arith.constant 0 : i32
    %c0_i32_0 = arith.constant 0 : i32
    %c0_i32_1 = arith.constant 0 : i32
    return %c0_i32, %arg0, %c0_i32_0 : i32, i32, i32
  }
  func.func @transform_1(%arg0: i32) -> (i32, i32) {
    %c0_i32 = arith.constant 0 : i32
    %c0_i32_0 = arith.constant 0 : i32
    %c0_i32_1 = arith.constant 0 : i32
    return %c0_i32, %c0_i32_0 : i32, i32
  }
  func.func @transform_2(%arg0: i32) -> (i32, i32) {
    %c0_i32 = arith.constant 0 : i32
    %c0_i32_0 = arith.constant 0 : i32
    %c0_i32_1 = arith.constant 0 : i32
    return %c0_i32, %c0_i32_0 : i32, i32
  }
  func.func @transform_3(%arg0: i32) -> (i32, i32) {
    %c0_i32 = arith.constant 0 : i32
    %c0_i32_0 = arith.constant 0 : i32
    %c0_i32_1 = arith.constant 0 : i32
    return %c0_i32, %c0_i32_0 : i32, i32
  }
}

</mosaic_0001>

<bundles_post_ra>
// kernel: resnet_forward.21
= control target key start
LH: loop header
LB: loop body
LE: loop exit
PB: predicated region body
PF: predicated region fallthrough
CT: control target
= control target key end

     0   :  { %s1363_s12 = smov 0   ;;  %s1521_s0 = inlined_call_operand.vmem [shape: bf16[512,256], index: 0, kind: input, shape index: {}]   ;;  %s1522_s1 = inlined_call_operand.vmem [shape: bf16[256,128], index: 1, kind: input, shape index: {}]   ;;  %s1523_s2 = inlined_call_operand.vmem [shape: f32[1,128], index: 2, kind: input, shape index: {}]   ;;  %s1524_s3 = inlined_call_operand.vmem [shape: bf16[512,128], index: 3, kind: output, shape index: {}]  }
   0x1 LB: > { %s914_s13 = sadd.s32 4294967295, %s1341_s12   ;;  %p918_p0 = scmp.ge.s32.totalorder %s1341_s12, 1  ;;  %s1341_s12 = sphi %s1363_s12, %s13_s12  }
   0x2   : > { %p139_p1 = scmp.lt.s32.totalorder %s1341_s12, 3 }
   0x4   : > { %p140_p2 = pnand %p918_p0, %p139_p1 }
   0x5   : > { %s919_s16 = sshll.u32 (!%p140_p2), %s914_s13, 5 }
   0x6   : > { %143 = sbr.rel (%p140_p2) target bundleno = 308 (0x134), region = 32  ;;  %p165_p3 = scmp.lt.s32.totalorder (!%p140_p2), %s919_s16, 63 }
   0xb   : > { %v1271_v0 = vld [vmem:[%s1522_s1 + $0x78] sm:$0xff]   ;;  %v1273_v2 = vld [vmem:[%s1522_s1 + $0x70] sm:$0xff]   ;;  %v1275_v4 = vld [vmem:[%s1522_s1 + $0x68] sm:$0xff]   ;;  %s1526_s16 = smov (!%p165_p3, %s919_s16), 63 }
   0xc   : > { %v1272_v1 = vld [vmem:[%s1522_s1 + $0x38] sm:$0xff]   ;;  %1135 = vmatprep.subr.bf16.mxu0 %v1271_v0  ;;  %1247 = vmatprep.subr.bf16.mxu1 %v1271_v0  ;;  %v1274_v3 = vld [vmem:[%s1522_s1 + $0x30] sm:$0xff]   ;;  %v1276_v5 = vld [vmem:[%s1522_s1 + $0x28] sm:$0xff]   ;;  %s1007_s4 = sshll.u32 %s1526_s16, 3  ;;  %s923_s28 = sshll.u32 %s1526_s16, 2 }
   0xd   : > { %1136 = vmatpush3.bf16.msra.mxu0 %v1272_v1  ;;  %1255 = vmatpush3.bf16.msra.mxu1 %v1272_v1  ;;  %v1277_v6 = vld [vmem:[%s1522_s1 + $0x60] sm:$0xff]   ;;  %v1279_v8 = vld [vmem:[%s1522_s1 + $0x58] sm:$0xff]   ;;  %s1404_s9 = scalar_lea.vmem %s1521_s0, %s1007_s4  ;;  %v1281_v10 = vld [vmem:[%s1522_s1 + $0x50] sm:$0xff]   ;;  %s1472_s4 = scalar_lea.vmem %s1524_s3, %s923_s28 }
   0xe   : > { %1137 = vmatprep.subr.bf16.mxu0 %v1273_v2  ;;  %1248 = vmatprep.subr.bf16.mxu1 %v1273_v2  ;;  %v1278_v7 = vld [vmem:[%s1522_s1 + $0x20] sm:$0xff]   ;;  %v1280_v9 = vld [vmem:[%s1522_s1 + $0x18] sm:$0xff]   ;;  %v1282_v13 = vld [vmem:[%s1522_s1 + $0x10] sm:$0xff]  }
   0xf   : > { %v1289_v11 = vld [vmem:[%s1404_s9 + $0x4] ss:$8 sps:$4 sm:$0xff]   ;;  %v1287_v18 = vld [vmem:[%s1404_s9] ss:$8 sps:$4 sm:$0xff]   ;;  %v1293_v20 = vld [vmem:[%s1404_s9 + $0x14] ss:$8 sps:$4 sm:$0xff]  }
  0x10   : > { %v1292_v12 = vld [vmem:[%s1404_s9 + $0x84] ss:$8 sps:$4 sm:$0xff]   ;;  %537 = vmatprep.mubr.bf16.mxu0 %v1289_v11  ;;  %v1290_v19 = vld [vmem:[%s1404_s9 + $0x80] ss:$8 sps:$4 sm:$0xff]   ;;  %v1295_v21 = vld [vmem:[%s1404_s9 + $0x94] ss:$8 sps:$4 sm:$0xff]  }
  0x11   : > { %1138 = vmatpush3.bf16.msra.mxu0 %v1274_v3  ;;  %1256 = vmatpush3.bf16.msra.mxu1 %v1274_v3  ;;  %v1283_v14 = vld [vmem:[%s1522_s1 + $0x48] sm:$0xff]   ;;  %v1285_v16 = vld [vmem:[%s1522_s1 + $0x40] sm:$0xff]   ;;  %v1297_v22 = vld [vmem:[%s1404_s9 + $0x10] ss:$8 sps:$4 sm:$0xff]  }
  0x12   : > { %1139 = vmatprep.subr.bf16.mxu0 %v1275_v4  ;;  %1249 = vmatprep.subr.bf16.mxu1 %v1275_v4  ;;  %v1284_v15 = vld [vmem:[%s1522_s1 + $0x8] sm:$0xff]   ;;  %v1286_v17 = vld [vmem:[%s1522_s1] sm:$0xff]   ;;  %v1298_v23 = vld [vmem:[%s1404_s9 + $0x90] ss:$8 sps:$4 sm:$0xff]  }
  0x13   : > { %601 = vmatprep.mubr.bf16.mxu1 %v1292_v12  ;;  %v1299_v24 = vld [vmem:[%s1404_s9 + $0x24] ss:$8 sps:$4 sm:$0xff]   ;;  %v1303_v26 = vld [vmem:[%s1404_s9 + $0x20] ss:$8 sps:$4 sm:$0xff]   ;;  %v1305_v28 = vld [vmem:[%s1404_s9 + $0x34] ss:$8 sps:$4 sm:$0xff]  }
  0x14   : > { %v1301_v25 = vld [vmem:[%s1404_s9 + $0xa4] ss:$8 sps:$4 sm:$0xff]   ;;  %v1304_v27 = vld [vmem:[%s1404_s9 + $0xa0] ss:$8 sps:$4 sm:$0xff]   ;;  %v1307_v29 = vld [vmem:[%s1404_s9 + $0xb4] ss:$8 sps:$4 sm:$0xff]  }
  0x15   : > { %1140 = vmatpush3.bf16.msra.mxu0 %v1276_v5  ;;  %1257 = vmatpush3.bf16.msra.mxu1 %v1276_v5  ;;  %v1309_v30 = vld [vmem:[%s1404_s9 + $0x30] ss:$8 sps:$4 sm:$0xff]   ;;  %v1311_v32 = vld [vmem:[%s1404_s9 + $0x44] ss:$8 sps:$4 sm:$0xff]   ;;  %v1315_v34 = vld [vmem:[%s1404_s9 + $0x40] ss:$8 sps:$4 sm:$0xff]  }
  0x16   : > { %1141 = vmatprep.subr.bf16.mxu0 %v1277_v6  ;;  %1250 = vmatprep.subr.bf16.mxu1 %v1277_v6  ;;  %v1310_v31 = vld [vmem:[%s1404_s9 + $0xb0] ss:$8 sps:$4 sm:$0xff]   ;;  %v1313_v33 = vld [vmem:[%s1404_s9 + $0xc4] ss:$8 sps:$4 sm:$0xff]   ;;  %v1316_v35 = vld [vmem:[%s1404_s9 + $0xc0] ss:$8 sps:$4 sm:$0xff]  }
  0x17   : > { %v1317_v36 = vld [vmem:[%s1404_s9 + $0x54] ss:$8 sps:$4 sm:$0xff]   ;;  %v1321_v38 = vld [vmem:[%s1404_s9 + $0x50] ss:$8 sps:$4 sm:$0xff]   ;;  %v1323_v40 = vld [vmem:[%s1404_s9 + $0x64] ss:$8 sps:$4 sm:$0xff]  }
  0x18   : > { %v1319_v37 = vld [vmem:[%s1404_s9 + $0xd4] ss:$8 sps:$4 sm:$0xff]   ;;  %v1322_v39 = vld [vmem:[%s1404_s9 + $0xd0] ss:$8 sps:$4 sm:$0xff]   ;;  %v1325_v41 = vld [vmem:[%s1404_s9 + $0xe4] ss:$8 sps:$4 sm:$0xff]  }
  0x19   : > { %1142 = vmatpush3.bf16.msra.mxu0 %v1278_v7  ;;  %1258 = vmatpush3.bf16.msra.mxu1 %v1278_v7  ;;  %v1327_v42 = vld [vmem:[%s1404_s9 + $0x60] ss:$8 sps:$4 sm:$0xff]   ;;  %v1329_v44 = vld [vmem:[%s1404_s9 + $0x74] ss:$8 sps:$4 sm:$0xff]   ;;  %v1333_v46 = vld [vmem:[%s1404_s9 + $0x70] ss:$8 sps:$4 sm:$0xff]  }
  0x1a   : > { %1143 = vmatprep.subr.bf16.mxu0 %v1279_v8  ;;  %1251 = vmatprep.subr.bf16.mxu1 %v1279_v8  ;;  %v1328_v43 = vld [vmem:[%s1404_s9 + $0xe0] ss:$8 sps:$4 sm:$0xff]   ;;  %v1331_v45 = vld [vmem:[%s1404_s9 + $0xf4] ss:$8 sps:$4 sm:$0xff]   ;;  %v1334_v47 = vld [vmem:[%s1404_s9 + $0xf0] ss:$8 sps:$4 sm:$0xff]  }
  0x1b   : > { %v1462_v52 = vld [vmem:[%s1523_s2] ss:$0 sm:$0xff] }
  0x1d   : > { %1144 = vmatpush3.bf16.msra.mxu0 %v1280_v9  ;;  %1259 = vmatpush3.bf16.msra.mxu1 %v1280_v9 }
  0x1e   : > { %1145 = vmatprep.subr.bf16.mxu0 %v1281_v10  ;;  %1252 = vmatprep.subr.bf16.mxu1 %v1281_v10 }
  0x21   : > { %1146 = vmatpush3.bf16.msra.mxu0 %v1282_v13  ;;  %1260 = vmatpush3.bf16.msra.mxu1 %v1282_v13 }
  0x22   : > { %1147 = vmatprep.subr.bf16.mxu0 %v1283_v14  ;;  %1253 = vmatprep.subr.bf16.mxu1 %v1283_v14 }
  0x25   : > { %1148 = vmatpush3.bf16.msra.mxu0 %v1284_v15  ;;  %1261 = vmatpush3.bf16.msra.mxu1 %v1284_v15 }
  0x26   : > { %1149 = vmatprep.subr.bf16.mxu0 %v1285_v16  ;;  %1254 = vmatprep.subr.bf16.mxu1 %v1285_v16 }
  0x29   : > { %1150 = vmatpush3.bf16.msra.mxu0 %v1286_v17  ;;  %1262 = vmatpush3.bf16.msra.mxu1 %v1286_v17 }
  0x2c   : > { %538 = vmatmul.mubr.bf16.vlgmr.msra.gmra.mxu0 %v1287_v18  ;;  %602 = vmatmul.mubr.bf16.vlgmr.msra.gmra.mxu1 %v1290_v19 }
  0x2d   : > { %545 = vmatprep.mubr.bf16.mxu0 %v1293_v20  ;;  %609 = vmatprep.mubr.bf16.mxu1 %v1295_v21 }
  0x34   : > { %546 = vmatmul.mubr.bf16.gmra.mxu0 %v1297_v22  ;;  %610 = vmatmul.mubr.bf16.gmra.mxu1 %v1298_v23 }
  0x35   : > { %553 = vmatprep.mubr.bf16.mxu0 %v1299_v24  ;;  %617 = vmatprep.mubr.bf16.mxu1 %v1301_v25 }
  0x3c   : > { %554 = vmatmul.mubr.bf16.gmra.mxu0 %v1303_v26  ;;  %618 = vmatmul.mubr.bf16.gmra.mxu1 %v1304_v27 }
  0x3d   : > { %561 = vmatprep.mubr.bf16.mxu0 %v1305_v28  ;;  %625 = vmatprep.mubr.bf16.mxu1 %v1307_v29 }
  0x44   : > { %562 = vmatmul.mubr.bf16.gmra.mxu0 %v1309_v30  ;;  %626 = vmatmul.mubr.bf16.gmra.mxu1 %v1310_v31 }
  0x45   : > { %569 = vmatprep.mubr.bf16.mxu0 %v1311_v32  ;;  %633 = vmatprep.mubr.bf16.mxu1 %v1313_v33 }
  0x4c   : > { %570 = vmatmul.mubr.bf16.gmra.mxu0 %v1315_v34  ;;  %634 = vmatmul.mubr.bf16.gmra.mxu1 %v1316_v35 }
  0x4d   : > { %577 = vmatprep.mubr.bf16.mxu0 %v1317_v36  ;;  %641 = vmatprep.mubr.bf16.mxu1 %v1319_v37 }
  0x54   : > { %578 = vmatmul.mubr.bf16.gmra.mxu0 %v1321_v38  ;;  %642 = vmatmul.mubr.bf16.gmra.mxu1 %v1322_v39 }
  0x55   : > { %585 = vmatprep.mubr.bf16.mxu0 %v1323_v40  ;;  %649 = vmatprep.mubr.bf16.mxu1 %v1325_v41 }
  0x5c   : > { %586 = vmatmul.mubr.bf16.gmra.mxu0 %v1327_v42  ;;  %650 = vmatmul.mubr.bf16.gmra.mxu1 %v1328_v43 }
  0x5d   : > { %593 = vmatprep.mubr.bf16.mxu0 %v1329_v44  ;;  %657 = vmatprep.mubr.bf16.mxu1 %v1331_v45 }
  0x64   : > { %594 = vmatmul.mubr.bf16.gmra.mxu0 %v1333_v46  ;;  %658 = vmatmul.mubr.bf16.gmra.mxu1 %v1334_v47 }
  0xec   : > { %v1151_v48 = vpop.f32.mrf.mxu0  ;;  %v1199_v49 = vpop.f32.mrf.mxu1 }
  0xee   : > { %v1152_v50 = vpop.f32.mrf.mxu0  ;;  %v1200_v51 = vpop.f32.mrf.mxu1 }
  0xef   : > { %v1153_v53 = vadd.f32 %v1152_v50, %v1151_v48  ;;  %v1201_v54 = vadd.f32 %v1200_v51, %v1199_v49 }
  0xf0   : > { %v1154_v55 = vpop.f32.mrf.mxu0  ;;  %v1202_v56 = vpop.f32.mrf.mxu1 }
  0xf1   : > { %v540_v57 = vadd.f32 %v1153_v53, %v1462_v52  ;;  %v604_v58 = vadd.f32 %v1201_v54, %v1462_v52 }
  0xf2   : > { %v1155_v59 = vpop.f32.mrf.mxu0  ;;  %v1203_v60 = vpop.f32.mrf.mxu1 }
  0xf3   : > { %v1156_v61 = vadd.f32 %v1155_v59, %v1154_v55  ;;  %v1204_v62 = vadd.f32 %v1203_v60, %v1202_v56  ;;  %v666_v3 = vmax.f32 %v540_v57, 0.0  ;;  %v682_v4 = vmax.f32 %v604_v58, 0.0 }
  0xf4   : > { %v1157_v63 = vpop.f32.mrf.mxu0  ;;  %v1205_v0 = vpop.f32.mrf.mxu1 }
  0xf5   : > { %v543_v1 = vadd.f32 %v1156_v61, %v1462_v52  ;;  %v607_v2 = vadd.f32 %v1204_v62, %v1462_v52 }
  0xf6   : > { %v1158_v5 = vpop.f32.mrf.mxu0  ;;  %v1206_v6 = vpop.f32.mrf.mxu1 }
  0xf7   : > { %v667_v7 = vmax.f32 %v543_v1, 0.0  ;;  %v683_v8 = vmax.f32 %v607_v2, 0.0  ;;  %v1159_v9 = vadd.f32 %v1158_v5, %v1157_v63  ;;  %v1207_v10 = vadd.f32 %v1206_v6, %v1205_v0 }
  0xf8   : > { %v1160_v11 = vpop.f32.mrf.mxu0  ;;  %v1208_v12 = vpop.f32.mrf.mxu1 }
  0xf9   : > { %v1043_v13 = vpack.c.bf16 %v667_v7, %v666_v3  ;;  %v1083_v14 = vpack.c.bf16 %v683_v8, %v682_v4  ;;  %v548_v15 = vadd.f32 %v1159_v9, %v1462_v52  ;;  %v612_v16 = vadd.f32 %v1207_v10, %v1462_v52 }
  0xfa   : > { %v1161_v17 = vpop.f32.mrf.mxu0  ;;  %v1209_v18 = vpop.f32.mrf.mxu1 }
  0xfb   : > { %1044 = vst [vmem:[%s1472_s4] sm:$0xff] %v1043_v13   ;;  %1127 = vst [vmem:[%s1472_s4 + $0x40] sm:$0xff] %v1083_v14   ;;  %v1162_v19 = vadd.f32 %v1161_v17, %v1160_v11  ;;  %v1210_v20 = vadd.f32 %v1209_v18, %v1208_v12  ;;  %v668_v25 = vmax.f32 %v548_v15, 0.0  ;;  %v684_v26 = vmax.f32 %v612_v16, 0.0 }
  0xfc   : > { %v1163_v21 = vpop.f32.mrf.mxu0  ;;  %v1211_v22 = vpop.f32.mrf.mxu1 }
  0xfd   : > { %v551_v23 = vadd.f32 %v1162_v19, %v1462_v52  ;;  %v615_v24 = vadd.f32 %v1210_v20, %v1462_v52 }
  0xfe   : > { %v1164_v27 = vpop.f32.mrf.mxu0  ;;  %v1212_v28 = vpop.f32.mrf.mxu1 }
  0xff   : > { %v669_v29 = vmax.f32 %v551_v23, 0.0  ;;  %v685_v30 = vmax.f32 %v615_v24, 0.0  ;;  %v1165_v31 = vadd.f32 %v1164_v27, %v1163_v21  ;;  %v1213_v32 = vadd.f32 %v1212_v28, %v1211_v22 }
 0x100   : > { %v1166_v33 = vpop.f32.mrf.mxu0  ;;  %v1214_v34 = vpop.f32.mrf.mxu1 }
 0x101   : > { %v1048_v35 = vpack.c.bf16 %v669_v29, %v668_v25  ;;  %v1088_v36 = vpack.c.bf16 %v685_v30, %v684_v26  ;;  %v556_v37 = vadd.f32 %v1165_v31, %v1462_v52  ;;  %v620_v38 = vadd.f32 %v1213_v32, %v1462_v52 }
 0x102   : > { %v1167_v39 = vpop.f32.mrf.mxu0  ;;  %v1215_v40 = vpop.f32.mrf.mxu1 }
 0x103   : > { %1120 = vst [vmem:[%s1472_s4 + $0x8] sm:$0xff] %v1048_v35   ;;  %1128 = vst [vmem:[%s1472_s4 + $0x48] sm:$0xff] %v1088_v36   ;;  %v1168_v41 = vadd.f32 %v1167_v39, %v1166_v33  ;;  %v1216_v42 = vadd.f32 %v1215_v40, %v1214_v34  ;;  %v670_v47 = vmax.f32 %v556_v37, 0.0  ;;  %v686_v48 = vmax.f32 %v620_v38, 0.0 }
 0x104   : > { %v1169_v43 = vpop.f32.mrf.mxu0  ;;  %v1217_v44 = vpop.f32.mrf.mxu1 }
 0x105   : > { %v559_v45 = vadd.f32 %v1168_v41, %v1462_v52  ;;  %v623_v46 = vadd.f32 %v1216_v42, %v1462_v52 }
 0x106   : > { %v1170_v49 = vpop.f32.mrf.mxu0  ;;  %v1218_v50 = vpop.f32.mrf.mxu1 }
 0x107   : > { %v671_v51 = vmax.f32 %v559_v45, 0.0  ;;  %v687_v53 = vmax.f32 %v623_v46, 0.0  ;;  %v1171_v54 = vadd.f32 %v1170_v49, %v1169_v43  ;;  %v1219_v55 = vadd.f32 %v1218_v50, %v1217_v44 }
 0x108   : > { %v1172_v56 = vpop.f32.mrf.mxu0  ;;  %v1220_v57 = vpop.f32.mrf.mxu1 }
 0x109   : > { %v1053_v58 = vpack.c.bf16 %v671_v51, %v670_v47  ;;  %v1093_v59 = vpack.c.bf16 %v687_v53, %v686_v48  ;;  %v564_v60 = vadd.f32 %v1171_v54, %v1462_v52  ;;  %v628_v61 = vadd.f32 %v1219_v55, %v1462_v52 }
 0x10a   : > { %v1173_v62 = vpop.f32.mrf.mxu0  ;;  %v1221_v63 = vpop.f32.mrf.mxu1 }
 0x10b   : > { %1121 = vst [vmem:[%s1472_s4 + $0x10] sm:$0xff] %v1053_v58   ;;  %1129 = vst [vmem:[%s1472_s4 + $0x50] sm:$0xff] %v1093_v59   ;;  %v1174_v0 = vadd.f32 %v1173_v62, %v1172_v56  ;;  %v1222_v1 = vadd.f32 %v1221_v63, %v1220_v57  ;;  %v672_v6 = vmax.f32 %v564_v60, 0.0  ;;  %v688_v7 = vmax.f32 %v628_v61, 0.0 }
 0x10c   : > { %v1175_v2 = vpop.f32.mrf.mxu0  ;;  %v1223_v3 = vpop.f32.mrf.mxu1 }
 0x10d   : > { %v567_v4 = vadd.f32 %v1174_v0, %v1462_v52  ;;  %v631_v5 = vadd.f32 %v1222_v1, %v1462_v52 }
 0x10e   : > { %v1176_v8 = vpop.f32.mrf.mxu0  ;;  %v1224_v9 = vpop.f32.mrf.mxu1 }
 0x10f   : > { %v673_v10 = vmax.f32 %v567_v4, 0.0  ;;  %v689_v11 = vmax.f32 %v631_v5, 0.0  ;;  %v1177_v12 = vadd.f32 %v1176_v8, %v1175_v2  ;;  %v1225_v13 = vadd.f32 %v1224_v9, %v1223_v3 }
 0x110   : > { %v1178_v14 = vpop.f32.mrf.mxu0  ;;  %v1226_v15 = vpop.f32.mrf.mxu1 }
 0x111   : > { %v1058_v16 = vpack.c.bf16 %v673_v10, %v672_v6  ;;  %v1098_v17 = vpack.c.bf16 %v689_v11, %v688_v7  ;;  %v572_v18 = vadd.f32 %v1177_v12, %v1462_v52  ;;  %v636_v19 = vadd.f32 %v1225_v13, %v1462_v52 }
 0x112   : > { %v1179_v20 = vpop.f32.mrf.mxu0  ;;  %v1227_v21 = vpop.f32.mrf.mxu1 }
 0x113   : > { %1122 = vst [vmem:[%s1472_s4 + $0x18] sm:$0xff] %v1058_v16   ;;  %1130 = vst [vmem:[%s1472_s4 + $0x58] sm:$0xff] %v1098_v17   ;;  %v1180_v22 = vadd.f32 %v1179_v20, %v1178_v14  ;;  %v1228_v23 = vadd.f32 %v1227_v21, %v1226_v15  ;;  %v674_v28 = vmax.f32 %v572_v18, 0.0  ;;  %v690_v29 = vmax.f32 %v636_v19, 0.0 }
 0x114   : > { %v1181_v24 = vpop.f32.mrf.mxu0  ;;  %v1229_v25 = vpop.f32.mrf.mxu1 }
 0x115   : > { %v575_v26 = vadd.f32 %v1180_v22, %v1462_v52  ;;  %v639_v27 = vadd.f32 %v1228_v23, %v1462_v52 }
 0x116   : > { %v1182_v30 = vpop.f32.mrf.mxu0  ;;  %v1230_v31 = vpop.f32.mrf.mxu1 }
 0x117   : > { %v675_v32 = vmax.f32 %v575_v26, 0.0  ;;  %v691_v33 = vmax.f32 %v639_v27, 0.0  ;;  %v1183_v34 = vadd.f32 %v1182_v30, %v1181_v24  ;;  %v1231_v35 = vadd.f32 %v1230_v31, %v1229_v25 }
 0x118   : > { %v1184_v36 = vpop.f32.mrf.mxu0  ;;  %v1232_v37 = vpop.f32.mrf.mxu1 }
 0x119   : > { %v1063_v38 = vpack.c.bf16 %v675_v32, %v674_v28  ;;  %v1103_v39 = vpack.c.bf16 %v691_v33, %v690_v29  ;;  %v580_v40 = vadd.f32 %v1183_v34, %v1462_v52  ;;  %v644_v41 = vadd.f32 %v1231_v35, %v1462_v52 }
 0x11a   : > { %v1185_v42 = vpop.f32.mrf.mxu0  ;;  %v1233_v43 = vpop.f32.mrf.mxu1 }
 0x11b   : > { %1123 = vst [vmem:[%s1472_s4 + $0x20] sm:$0xff] %v1063_v38   ;;  %1131 = vst [vmem:[%s1472_s4 + $0x60] sm:$0xff] %v1103_v39   ;;  %v1186_v44 = vadd.f32 %v1185_v42, %v1184_v36  ;;  %v1234_v45 = vadd.f32 %v1233_v43, %v1232_v37  ;;  %v676_v50 = vmax.f32 %v580_v40, 0.0  ;;  %v692_v51 = vmax.f32 %v644_v41, 0.0 }
 0x11c   : > { %v1187_v46 = vpop.f32.mrf.mxu0  ;;  %v1235_v47 = vpop.f32.mrf.mxu1 }
 0x11d   : > { %v583_v48 = vadd.f32 %v1186_v44, %v1462_v52  ;;  %v647_v49 = vadd.f32 %v1234_v45, %v1462_v52 }
 0x11e   : > { %v1188_v53 = vpop.f32.mrf.mxu0  ;;  %v1236_v54 = vpop.f32.mrf.mxu1 }
 0x11f   : > { %v677_v55 = vmax.f32 %v583_v48, 0.0  ;;  %v693_v56 = vmax.f32 %v647_v49, 0.0  ;;  %v1189_v57 = vadd.f32 %v1188_v53, %v1187_v46  ;;  %v1237_v58 = vadd.f32 %v1236_v54, %v1235_v47 }
 0x120   : > { %v1190_v59 = vpop.f32.mrf.mxu0  ;;  %v1238_v60 = vpop.f32.mrf.mxu1 }
 0x121   : > { %v1068_v61 = vpack.c.bf16 %v677_v55, %v676_v50  ;;  %v1108_v62 = vpack.c.bf16 %v693_v56, %v692_v51  ;;  %v588_v63 = vadd.f32 %v1189_v57, %v1462_v52  ;;  %v652_v0 = vadd.f32 %v1237_v58, %v1462_v52 }
 0x122   : > { %v1191_v1 = vpop.f32.mrf.mxu0  ;;  %v1239_v2 = vpop.f32.mrf.mxu1 }
 0x123   : > { %1124 = vst [vmem:[%s1472_s4 + $0x28] sm:$0xff] %v1068_v61   ;;  %1132 = vst [vmem:[%s1472_s4 + $0x68] sm:$0xff] %v1108_v62   ;;  %v1192_v3 = vadd.f32 %v1191_v1, %v1190_v59  ;;  %v1240_v4 = vadd.f32 %v1239_v2, %v1238_v60  ;;  %v678_v9 = vmax.f32 %v588_v63, 0.0  ;;  %v694_v10 = vmax.f32 %v652_v0, 0.0 }
 0x124   : > { %v1193_v5 = vpop.f32.mrf.mxu0  ;;  %v1241_v6 = vpop.f32.mrf.mxu1 }
 0x125   : > { %v591_v7 = vadd.f32 %v1192_v3, %v1462_v52  ;;  %v655_v8 = vadd.f32 %v1240_v4, %v1462_v52 }
 0x126   : > { %v1194_v11 = vpop.f32.mrf.mxu0  ;;  %v1242_v12 = vpop.f32.mrf.mxu1 }
 0x127   : > { %v679_v13 = vmax.f32 %v591_v7, 0.0  ;;  %v695_v14 = vmax.f32 %v655_v8, 0.0  ;;  %v1195_v15 = vadd.f32 %v1194_v11, %v1193_v5  ;;  %v1243_v16 = vadd.f32 %v1242_v12, %v1241_v6 }
 0x128   : > { %v1196_v17 = vpop.f32.mrf.mxu0  ;;  %v1244_v18 = vpop.f32.mrf.mxu1 }
 0x129   : > { %v1073_v19 = vpack.c.bf16 %v679_v13, %v678_v9  ;;  %v1113_v20 = vpack.c.bf16 %v695_v14, %v694_v10  ;;  %v596_v23 = vadd.f32 %v1195_v15, %v1462_v52  ;;  %v660_v24 = vadd.f32 %v1243_v16, %v1462_v52 }
 0x12a   : > { %v1197_v21 = vpop.f32.mrf.mxu0  ;;  %v1245_v22 = vpop.f32.mrf.mxu1 }
 0x12b   : > { %1125 = vst [vmem:[%s1472_s4 + $0x30] sm:$0xff] %v1073_v19   ;;  %1133 = vst [vmem:[%s1472_s4 + $0x70] sm:$0xff] %v1113_v20   ;;  %v1198_v25 = vadd.f32 %v1197_v21, %v1196_v17  ;;  %v1246_v26 = vadd.f32 %v1245_v22, %v1244_v18  ;;  %v680_v29 = vmax.f32 %v596_v23, 0.0  ;;  %v696_v30 = vmax.f32 %v660_v24, 0.0 }
 0x12d   : > { %v599_v27 = vadd.f32 %v1198_v25, %v1462_v52  ;;  %v663_v28 = vadd.f32 %v1246_v26, %v1462_v52 }
 0x12f   : > { %v681_v31 = vmax.f32 %v599_v27, 0.0  ;;  %v697_v32 = vmax.f32 %v663_v28, 0.0 }
 0x131   : > { %v1078_v33 = vpack.c.bf16 %v681_v31, %v680_v29  ;;  %v1118_v34 = vpack.c.bf16 %v697_v32, %v696_v30 }
 0x133   : > { %1126 = vst [vmem:[%s1472_s4 + $0x38] sm:$0xff] %v1078_v33   ;;  %1134 = vst [vmem:[%s1472_s4 + $0x78] sm:$0xff] %v1118_v34  }
 0x134 PF: > { %s13_s12 = sadd.s32 1, %s1341_s12  }
 0x135   : > { %p10_p4 = scmp.ge.s32.totalorder %s13_s12, 4  }
 0x137   :  { %12 = sbr.rel (!%p10_p4) target bundleno = 1 (0x1), region = 62 }

// kernel: resnet_forward.22
= control target key start
LH: loop header
LB: loop body
LE: loop exit
PB: predicated region body
PF: predicated region fallthrough
CT: control target
= control target key end

     0   :  { %s618_s1 = inlined_call_operand.vmem [shape: bf16[128,128], index: 1, kind: input, shape index: {}]   ;;  %s619_s0 = inlined_call_operand.vmem [shape: bf16[128,128], index: 0, kind: input, shape index: {}]   ;;  %s620_s2 = inlined_call_operand.vmem [shape: f32[1,128], index: 2, kind: input, shape index: {}]   ;;  %s621_s3 = inlined_call_operand.vmem [shape: bf16[128,128], index: 3, kind: output, shape index: {}]  }
   0x1   :  { %v507_v0 = vld [vmem:[%s618_s1 + $0x38] sm:$0xff]   ;;  %v508_v1 = vld [vmem:[%s618_s1 + $0x30] sm:$0xff]   ;;  %v509_v2 = vld [vmem:[%s618_s1 + $0x28] sm:$0xff]  }
   0x2   :  { %459 = vmatprep.subr.bf16.mxu0 %v507_v0  ;;  %491 = vmatprep.subr.bf16.mxu1 %v507_v0  ;;  %v510_v3 = vld [vmem:[%s618_s1 + $0x20] sm:$0xff]   ;;  %v511_v6 = vld [vmem:[%s618_s1 + $0x18] sm:$0xff]   ;;  %v512_v7 = vld [vmem:[%s618_s1 + $0x10] sm:$0xff]  }
   0x3   :  { %460 = vmatpush3.bf16.msra.mxu0 %v507_v0  ;;  %499 = vmatpush3.bf16.msra.mxu1 %v507_v0  ;;  %v515_v4 = vld [vmem:[%s619_s0] sm:$0xff]   ;;  %v513_v8 = vld [vmem:[%s618_s1 + $0x8] sm:$0xff]   ;;  %v519_v12 = vld [vmem:[%s619_s0 + $0x10] sm:$0xff]  }
   0x4   :  { %461 = vmatprep.subr.bf16.mxu0 %v508_v1  ;;  %492 = vmatprep.subr.bf16.mxu1 %v508_v1  ;;  %v516_v5 = vld [vmem:[%s619_s0 + $0x20] sm:$0xff]   ;;  %v517_v10 = vld [vmem:[%s619_s0 + $0x8] sm:$0xff]   ;;  %v520_v13 = vld [vmem:[%s619_s0 + $0x30] sm:$0xff]  }
   0x5   :  { %475 = vmatprep.mubr.bf16.mxu0 %v515_v4  ;;  %483 = vmatprep.mubr.bf16.mxu1 %v516_v5  ;;  %v514_v9 = vld [vmem:[%s618_s1] sm:$0xff]   ;;  %v518_v11 = vld [vmem:[%s619_s0 + $0x28] sm:$0xff]   ;;  %v521_v14 = vld [vmem:[%s619_s0 + $0x18] sm:$0xff]  }
   0x6   :  { %v522_v15 = vld [vmem:[%s619_s0 + $0x38] sm:$0xff]   ;;  %v347_v16 = vld [vmem:[%s620_s2] ss:$0 sm:$0xff] }
   0x7   :  { %462 = vmatpush3.bf16.msra.mxu0 %v508_v1  ;;  %500 = vmatpush3.bf16.msra.mxu1 %v508_v1 }
   0x8   :  { %463 = vmatprep.subr.bf16.mxu0 %v509_v2  ;;  %493 = vmatprep.subr.bf16.mxu1 %v509_v2 }
   0xb   :  { %464 = vmatpush3.bf16.msra.mxu0 %v509_v2  ;;  %501 = vmatpush3.bf16.msra.mxu1 %v509_v2 }
   0xc   :  { %465 = vmatprep.subr.bf16.mxu0 %v510_v3  ;;  %494 = vmatprep.subr.bf16.mxu1 %v510_v3 }
   0xf   :  { %466 = vmatpush3.bf16.msra.mxu0 %v510_v3  ;;  %502 = vmatpush3.bf16.msra.mxu1 %v510_v3 }
  0x10   :  { %467 = vmatprep.subr.bf16.mxu0 %v511_v6  ;;  %495 = vmatprep.subr.bf16.mxu1 %v511_v6 }
  0x13   :  { %468 = vmatpush3.bf16.msra.mxu0 %v511_v6  ;;  %503 = vmatpush3.bf16.msra.mxu1 %v511_v6 }
  0x14   :  { %469 = vmatprep.subr.bf16.mxu0 %v512_v7  ;;  %496 = vmatprep.subr.bf16.mxu1 %v512_v7 }
  0x17   :  { %470 = vmatpush3.bf16.msra.mxu0 %v512_v7  ;;  %504 = vmatpush3.bf16.msra.mxu1 %v512_v7 }
  0x18   :  { %471 = vmatprep.subr.bf16.mxu0 %v513_v8  ;;  %497 = vmatprep.subr.bf16.mxu1 %v513_v8 }
  0x1b   :  { %472 = vmatpush3.bf16.msra.mxu0 %v513_v8  ;;  %505 = vmatpush3.bf16.msra.mxu1 %v513_v8 }
  0x1c   :  { %473 = vmatprep.subr.bf16.mxu0 %v514_v9  ;;  %498 = vmatprep.subr.bf16.mxu1 %v514_v9 }
  0x1f   :  { %474 = vmatpush3.bf16.msra.mxu0 %v514_v9  ;;  %506 = vmatpush3.bf16.msra.mxu1 %v514_v9 }
  0x22   :  { %476 = vmatmul.mubr.bf16.vlgmr.msra.gmra.mxu0 %v517_v10  ;;  %484 = vmatmul.mubr.bf16.vlgmr.msra.gmra.mxu1 %v518_v11 }
  0x23   :  { %479 = vmatprep.mubr.bf16.mxu0 %v519_v12  ;;  %487 = vmatprep.mubr.bf16.mxu1 %v520_v13 }
  0x2a   :  { %480 = vmatmul.mubr.bf16.gmra.mxu0 %v521_v14  ;;  %488 = vmatmul.mubr.bf16.gmra.mxu1 %v522_v15 }
  0xe2   :  { %v477_v17 = vpop.f32.mrf.mxu0  ;;  %v485_v18 = vpop.f32.mrf.mxu1 }
  0xe3   :  { %v193_v19 = vadd.f32 %v477_v17, %v347_v16  ;;  %v225_v20 = vadd.f32 %v485_v18, %v347_v16 }
  0xe4   :  { %v184_v21 = vpop.f32.mrf.mxu0  ;;  %v216_v22 = vpop.f32.mrf.mxu1 }
  0xe5   :  { %v185_v23 = vadd.f32 %v347_v16, %v184_v21  ;;  %v217_v24 = vadd.f32 %v347_v16, %v216_v22  ;;  %v249_v29 = vmax.f32 %v193_v19, 0.0  ;;  %v257_v30 = vmax.f32 %v225_v20, 0.0 }
  0xe6   :  { %v478_v25 = vpop.f32.mrf.mxu0  ;;  %v486_v26 = vpop.f32.mrf.mxu1 }
  0xe7   :  { %v196_v27 = vadd.f32 %v478_v25, %v347_v16  ;;  %v228_v28 = vadd.f32 %v486_v26, %v347_v16  ;;  %v247_v37 = vmax.f32 %v185_v23, 0.0  ;;  %v255_v38 = vmax.f32 %v217_v24, 0.0 }
  0xe8   :  { %v187_v31 = vpop.f32.mrf.mxu0  ;;  %v219_v32 = vpop.f32.mrf.mxu1 }
  0xe9   :  { %v250_v33 = vmax.f32 %v196_v27, 0.0  ;;  %v258_v34 = vmax.f32 %v228_v28, 0.0  ;;  %v188_v35 = vadd.f32 %v347_v16, %v187_v31  ;;  %v220_v36 = vadd.f32 %v347_v16, %v219_v32 }
  0xea   :  { %v481_v39 = vpop.f32.mrf.mxu0  ;;  %v489_v40 = vpop.f32.mrf.mxu1 }
  0xeb   :  { %v404_v41 = vpack.c.bf16 %v250_v33, %v249_v29  ;;  %v424_v42 = vpack.c.bf16 %v258_v34, %v257_v30  ;;  %v248_v43 = vmax.f32 %v188_v35, 0.0  ;;  %v256_v44 = vmax.f32 %v220_v36, 0.0 }
  0xec   :  { %v209_v45 = vadd.f32 %v481_v39, %v347_v16  ;;  %v241_v46 = vadd.f32 %v489_v40, %v347_v16  ;;  %v200_v47 = vpop.f32.mrf.mxu0  ;;  %v232_v48 = vpop.f32.mrf.mxu1 }
  0xed   :  { %436 = vst [vmem:[%s621_s3 + $0x8] sm:$0xff] %v404_v41   ;;  %440 = vst [vmem:[%s621_s3 + $0x28] sm:$0xff] %v424_v42   ;;  %v399_v49 = vpack.c.bf16 %v248_v43, %v247_v37  ;;  %v419_v50 = vpack.c.bf16 %v256_v44, %v255_v38  ;;  %v201_v51 = vadd.f32 %v347_v16, %v200_v47 }
  0xee   :  { %v233_v52 = vadd.f32 %v347_v16, %v232_v48  ;;  %v482_v53 = vpop.f32.mrf.mxu0  ;;  %v490_v54 = vpop.f32.mrf.mxu1  ;;  %v253_v57 = vmax.f32 %v209_v45, 0.0  ;;  %v261_v58 = vmax.f32 %v241_v46, 0.0 }
  0xef   :  { %400 = vst [vmem:[%s621_s3] sm:$0xff] %v399_v49   ;;  %439 = vst [vmem:[%s621_s3 + $0x20] sm:$0xff] %v419_v50   ;;  %v212_v55 = vadd.f32 %v482_v53, %v347_v16  ;;  %v244_v56 = vadd.f32 %v490_v54, %v347_v16  ;;  %v251_v1 = vmax.f32 %v201_v51, 0.0 }
  0xf0   :  { %v203_v59 = vpop.f32.mrf.mxu0  ;;  %v235_v60 = vpop.f32.mrf.mxu1  ;;  %v259_v2 = vmax.f32 %v233_v52, 0.0 }
  0xf1   :  { %v254_v61 = vmax.f32 %v212_v55, 0.0  ;;  %v262_v62 = vmax.f32 %v244_v56, 0.0  ;;  %v204_v63 = vadd.f32 %v347_v16, %v203_v59  ;;  %v236_v0 = vadd.f32 %v347_v16, %v235_v60 }
  0xf3   :  { %v414_v3 = vpack.c.bf16 %v254_v61, %v253_v57  ;;  %v434_v4 = vpack.c.bf16 %v262_v62, %v261_v58  ;;  %v252_v5 = vmax.f32 %v204_v63, 0.0  ;;  %v260_v6 = vmax.f32 %v236_v0, 0.0 }
  0xf5   :  { %438 = vst [vmem:[%s621_s3 + $0x18] sm:$0xff] %v414_v3   ;;  %442 = vst [vmem:[%s621_s3 + $0x38] sm:$0xff] %v434_v4   ;;  %v409_v7 = vpack.c.bf16 %v252_v5, %v251_v1  ;;  %v429_v8 = vpack.c.bf16 %v260_v6, %v259_v2 }
  0xf7   :  { %437 = vst [vmem:[%s621_s3 + $0x10] sm:$0xff] %v409_v7   ;;  %441 = vst [vmem:[%s621_s3 + $0x30] sm:$0xff] %v429_v8  }

// kernel: resnet_forward.23
= control target key start
LH: loop header
LB: loop body
LE: loop exit
PB: predicated region body
PF: predicated region fallthrough
CT: control target
= control target key end

     0   :  { %s771_s1 = inlined_call_operand.vmem [shape: bf16[128,128], index: 1, kind: input, shape index: {}]   ;;  %s772_s0 = inlined_call_operand.vmem [shape: bf16[128,128], index: 0, kind: input, shape index: {}]   ;;  %s773_s2 = inlined_call_operand.vmem [shape: f32[1,128], index: 2, kind: input, shape index: {}]   ;;  %s774_s3 = inlined_call_operand.vmem [shape: bf16[128,128], index: 3, kind: input, shape index: {}]   ;;  %s775_s4 = inlined_call_operand.vmem [shape: bf16[128,128], index: 4, kind: output, shape index: {}]  }
   0x1   :  { %v597_v0 = vld [vmem:[%s771_s1 + $0x38] sm:$0xff]   ;;  %v598_v1 = vld [vmem:[%s771_s1 + $0x30] sm:$0xff]   ;;  %v599_v2 = vld [vmem:[%s771_s1 + $0x28] sm:$0xff]  }
   0x2   :  { %549 = vmatprep.subr.bf16.mxu0 %v597_v0  ;;  %581 = vmatprep.subr.bf16.mxu1 %v597_v0  ;;  %v600_v3 = vld [vmem:[%s771_s1 + $0x20] sm:$0xff]   ;;  %v601_v6 = vld [vmem:[%s771_s1 + $0x18] sm:$0xff]   ;;  %v602_v7 = vld [vmem:[%s771_s1 + $0x10] sm:$0xff]  }
   0x3   :  { %550 = vmatpush3.bf16.msra.mxu0 %v597_v0  ;;  %589 = vmatpush3.bf16.msra.mxu1 %v597_v0  ;;  %v605_v4 = vld [vmem:[%s772_s0] sm:$0xff]   ;;  %v603_v8 = vld [vmem:[%s771_s1 + $0x8] sm:$0xff]   ;;  %v609_v12 = vld [vmem:[%s772_s0 + $0x10] sm:$0xff]  }
   0x4   :  { %551 = vmatprep.subr.bf16.mxu0 %v598_v1  ;;  %582 = vmatprep.subr.bf16.mxu1 %v598_v1  ;;  %v606_v5 = vld [vmem:[%s772_s0 + $0x20] sm:$0xff]   ;;  %v607_v10 = vld [vmem:[%s772_s0 + $0x8] sm:$0xff]   ;;  %v610_v13 = vld [vmem:[%s772_s0 + $0x30] sm:$0xff]  }
   0x5   :  { %565 = vmatprep.mubr.bf16.mxu0 %v605_v4  ;;  %573 = vmatprep.mubr.bf16.mxu1 %v606_v5  ;;  %v604_v9 = vld [vmem:[%s771_s1] sm:$0xff]   ;;  %v608_v11 = vld [vmem:[%s772_s0 + $0x28] sm:$0xff]   ;;  %v611_v14 = vld [vmem:[%s772_s0 + $0x18] sm:$0xff]  }
   0x6   :  { %v612_v15 = vld [vmem:[%s772_s0 + $0x38] sm:$0xff]   ;;  %v689_v16 = vld [vmem:[%s773_s2] ss:$0 sm:$0xff]  ;;  %v519_v17 = vld [vmem:[%s774_s3 + $0x8] sm:$0xff]  }
   0x7   :  { %552 = vmatpush3.bf16.msra.mxu0 %v598_v1  ;;  %590 = vmatpush3.bf16.msra.mxu1 %v598_v1  ;;  %v523_v18 = vld [vmem:[%s774_s3 + $0x28] sm:$0xff]   ;;  %v448_v21 = vld [vmem:[%s774_s3] sm:$0xff]   ;;  %v453_v24 = vunpack.c.l.bf16 %v519_v17  ;;  %v708_v29 = vld [vmem:[%s774_s3 + $0x18] sm:$0xff]   ;;  %v454_v38 = vunpack.c.h.bf16 %v519_v17 }
   0x8   :  { %553 = vmatprep.subr.bf16.mxu0 %v599_v2  ;;  %583 = vmatprep.subr.bf16.mxu1 %v599_v2  ;;  %v522_v22 = vld [vmem:[%s774_s3 + $0x20] sm:$0xff]   ;;  %v469_v26 = vunpack.c.l.bf16 %v523_v18  ;;  %v713_v30 = vld [vmem:[%s774_s3 + $0x38] sm:$0xff]   ;;  %v449_v32 = vunpack.c.l.bf16 %v448_v21  ;;  %v720_v35 = vld [vmem:[%s774_s3 + $0x10] sm:$0xff]   ;;  %v470_v40 = vunpack.c.h.bf16 %v523_v18  ;;  %v450_v41 = vunpack.c.h.bf16 %v448_v21 }
   0x9   :  { %v465_v34 = vunpack.c.l.bf16 %v522_v22  ;;  %v725_v36 = vld [vmem:[%s774_s3 + $0x30] sm:$0xff]   ;;  %v466_v42 = vunpack.c.h.bf16 %v522_v22  ;;  %v461_v45 = vunpack.c.l.bf16 %v708_v29  ;;  %v477_v46 = vunpack.c.l.bf16 %v713_v30 }
   0xa   :  { %v457_v51 = vunpack.c.l.bf16 %v720_v35  ;;  %v473_v52 = vunpack.c.l.bf16 %v725_v36  ;;  %v462_v61 = vunpack.c.h.bf16 %v708_v29  ;;  %v478_v62 = vunpack.c.h.bf16 %v713_v30 }
   0xb   :  { %554 = vmatpush3.bf16.msra.mxu0 %v599_v2  ;;  %591 = vmatpush3.bf16.msra.mxu1 %v599_v2  ;;  %v458_v22 = vunpack.c.h.bf16 %v720_v35 }
   0xc   :  { %555 = vmatprep.subr.bf16.mxu0 %v600_v3  ;;  %584 = vmatprep.subr.bf16.mxu1 %v600_v3 }
   0xf   :  { %556 = vmatpush3.bf16.msra.mxu0 %v600_v3  ;;  %592 = vmatpush3.bf16.msra.mxu1 %v600_v3 }
  0x10   :  { %557 = vmatprep.subr.bf16.mxu0 %v601_v6  ;;  %585 = vmatprep.subr.bf16.mxu1 %v601_v6 }
  0x13   :  { %558 = vmatpush3.bf16.msra.mxu0 %v601_v6  ;;  %593 = vmatpush3.bf16.msra.mxu1 %v601_v6 }
  0x14   :  { %559 = vmatprep.subr.bf16.mxu0 %v602_v7  ;;  %586 = vmatprep.subr.bf16.mxu1 %v602_v7 }
  0x17   :  { %560 = vmatpush3.bf16.msra.mxu0 %v602_v7  ;;  %594 = vmatpush3.bf16.msra.mxu1 %v602_v7 }
  0x18   :  { %561 = vmatprep.subr.bf16.mxu0 %v603_v8  ;;  %587 = vmatprep.subr.bf16.mxu1 %v603_v8 }
  0x1b   :  { %562 = vmatpush3.bf16.msra.mxu0 %v603_v8  ;;  %595 = vmatpush3.bf16.msra.mxu1 %v603_v8 }
  0x1c   :  { %563 = vmatprep.subr.bf16.mxu0 %v604_v9  ;;  %588 = vmatprep.subr.bf16.mxu1 %v604_v9 }
  0x1f   :  { %564 = vmatpush3.bf16.msra.mxu0 %v604_v9  ;;  %596 = vmatpush3.bf16.msra.mxu1 %v604_v9 }
  0x22   :  { %566 = vmatmul.mubr.bf16.vlgmr.msra.gmra.mxu0 %v607_v10  ;;  %574 = vmatmul.mubr.bf16.vlgmr.msra.gmra.mxu1 %v608_v11 }
  0x23   :  { %569 = vmatprep.mubr.bf16.mxu0 %v609_v12  ;;  %577 = vmatprep.mubr.bf16.mxu1 %v610_v13 }
  0x2a   :  { %570 = vmatmul.mubr.bf16.gmra.mxu0 %v611_v14  ;;  %578 = vmatmul.mubr.bf16.gmra.mxu1 %v612_v15 }
  0xe2   :  { %v567_v19 = vpop.f32.mrf.mxu0  ;;  %v575_v20 = vpop.f32.mrf.mxu1 }
  0xe3   :  { %v196_v23 = vadd.f32 %v567_v19, %v689_v16  ;;  %v228_v25 = vadd.f32 %v575_v20, %v689_v16 }
  0xe4   :  { %v187_v27 = vpop.f32.mrf.mxu0  ;;  %v219_v28 = vpop.f32.mrf.mxu1 }
  0xe5   :  { %v188_v31 = vadd.f32 %v689_v16, %v187_v27  ;;  %v220_v33 = vadd.f32 %v689_v16, %v219_v28  ;;  %v284_v43 = vadd.f32 %v453_v24, %v196_v23  ;;  %v292_v44 = vadd.f32 %v469_v26, %v228_v25 }
  0xe6   :  { %v568_v37 = vpop.f32.mrf.mxu0  ;;  %v576_v39 = vpop.f32.mrf.mxu1  ;;  %v474_v23 = vunpack.c.h.bf16 %v725_v36 }
  0xe7   :  { %v199_v47 = vadd.f32 %v568_v37, %v689_v16  ;;  %v231_v48 = vadd.f32 %v576_v39, %v689_v16  ;;  %v282_v53 = vadd.f32 %v449_v32, %v188_v31  ;;  %v290_v54 = vadd.f32 %v465_v34, %v220_v33 }
  0xe8   :  { %v190_v49 = vpop.f32.mrf.mxu0  ;;  %v222_v50 = vpop.f32.mrf.mxu1  ;;  %v300_v63 = vmax.f32 %v284_v43, 0.0  ;;  %v308_v0 = vmax.f32 %v292_v44, 0.0 }
  0xe9   :  { %v191_v55 = vadd.f32 %v689_v16, %v190_v49  ;;  %v223_v56 = vadd.f32 %v689_v16, %v222_v50  ;;  %v285_v57 = vadd.f32 %v454_v38, %v199_v47  ;;  %v293_v58 = vadd.f32 %v470_v40, %v231_v48 }
  0xea   :  { %v571_v59 = vpop.f32.mrf.mxu0  ;;  %v579_v60 = vpop.f32.mrf.mxu1  ;;  %v298_v9 = vmax.f32 %v282_v53, 0.0  ;;  %v306_v10 = vmax.f32 %v290_v54, 0.0 }
  0xeb   :  { %v283_v1 = vadd.f32 %v450_v41, %v191_v55  ;;  %v291_v2 = vadd.f32 %v466_v42, %v223_v56  ;;  %v301_v3 = vmax.f32 %v285_v57, 0.0  ;;  %v309_v4 = vmax.f32 %v293_v58, 0.0 }
  0xec   :  { %v212_v5 = vadd.f32 %v571_v59, %v689_v16  ;;  %v244_v6 = vadd.f32 %v579_v60, %v689_v16  ;;  %v203_v7 = vpop.f32.mrf.mxu0  ;;  %v235_v8 = vpop.f32.mrf.mxu1 }
  0xed   :  { %v299_v11 = vmax.f32 %v283_v1, 0.0  ;;  %v307_v12 = vmax.f32 %v291_v2, 0.0  ;;  %v487_v13 = vpack.c.bf16 %v301_v3, %v300_v63  ;;  %v507_v14 = vpack.c.bf16 %v309_v4, %v308_v0 }
  0xee   :  { %v204_v15 = vadd.f32 %v689_v16, %v203_v7  ;;  %v236_v17 = vadd.f32 %v689_v16, %v235_v8  ;;  %v572_v18 = vpop.f32.mrf.mxu0  ;;  %v580_v19 = vpop.f32.mrf.mxu1  ;;  %v288_v24 = vadd.f32 %v461_v45, %v212_v5  ;;  %v296_v25 = vadd.f32 %v477_v46, %v244_v6 }
  0xef   :  { %v482_v20 = vpack.c.bf16 %v299_v11, %v298_v9  ;;  %v502_v21 = vpack.c.bf16 %v307_v12, %v306_v10  ;;  %526 = vst [vmem:[%s775_s4 + $0x8] sm:$0xff] %v487_v13   ;;  %530 = vst [vmem:[%s775_s4 + $0x28] sm:$0xff] %v507_v14   ;;  %v215_v26 = vadd.f32 %v572_v18, %v689_v16 }
  0xf0   :  { %v247_v27 = vadd.f32 %v580_v19, %v689_v16  ;;  %v206_v28 = vpop.f32.mrf.mxu0  ;;  %v238_v29 = vpop.f32.mrf.mxu1  ;;  %v286_v30 = vadd.f32 %v457_v51, %v204_v15  ;;  %v294_v31 = vadd.f32 %v473_v52, %v236_v17  ;;  %v304_v38 = vmax.f32 %v288_v24, 0.0 }
  0xf1   :  { %483 = vst [vmem:[%s775_s4] sm:$0xff] %v482_v20   ;;  %529 = vst [vmem:[%s775_s4 + $0x20] sm:$0xff] %v502_v21   ;;  %v207_v32 = vadd.f32 %v689_v16, %v206_v28  ;;  %v239_v33 = vadd.f32 %v689_v16, %v238_v29  ;;  %v289_v34 = vadd.f32 %v462_v61, %v215_v26  ;;  %v312_v39 = vmax.f32 %v296_v25, 0.0 }
  0xf2   :  { %v297_v35 = vadd.f32 %v478_v62, %v247_v27  ;;  %v302_v42 = vmax.f32 %v286_v30, 0.0  ;;  %v310_v43 = vmax.f32 %v294_v31, 0.0 }
  0xf3   :  { %v287_v36 = vadd.f32 %v458_v22, %v207_v32  ;;  %v295_v37 = vadd.f32 %v474_v23, %v239_v33  ;;  %v305_v40 = vmax.f32 %v289_v34, 0.0 }
  0xf4   :  { %v313_v41 = vmax.f32 %v297_v35, 0.0 }
  0xf5   :  { %v303_v44 = vmax.f32 %v287_v36, 0.0  ;;  %v311_v45 = vmax.f32 %v295_v37, 0.0  ;;  %v497_v46 = vpack.c.bf16 %v305_v40, %v304_v38 }
  0xf6   :  { %v517_v47 = vpack.c.bf16 %v313_v41, %v312_v39 }
  0xf7   :  { %v492_v48 = vpack.c.bf16 %v303_v44, %v302_v42  ;;  %v512_v49 = vpack.c.bf16 %v311_v45, %v310_v43  ;;  %528 = vst [vmem:[%s775_s4 + $0x18] sm:$0xff] %v497_v46  }
  0xf8   :  { %532 = vst [vmem:[%s775_s4 + $0x38] sm:$0xff] %v517_v47  }
  0xf9   :  { %527 = vst [vmem:[%s775_s4 + $0x10] sm:$0xff] %v492_v48   ;;  %531 = vst [vmem:[%s775_s4 + $0x30] sm:$0xff] %v512_v49  }

// kernel: resnet_forward.26
= control target key start
LH: loop header
LB: loop body
LE: loop exit
PB: predicated region body
PF: predicated region fallthrough
CT: control target
= control target key end

     0   :  { %s308_s1 = inlined_call_operand.vmem [shape: bf16[128,128], index: 1, kind: input, shape index: {}]   ;;  %s309_s0 = inlined_call_operand.vmem [shape: bf16[32,128], index: 0, kind: input, shape index: {}]   ;;  %s310_s2 = inlined_call_operand.vmem [shape: f32[1,128], index: 2, kind: input, shape index: {}]   ;;  %s311_s3 = inlined_call_operand.vmem [shape: bf16[32,128], index: 3, kind: output, shape index: {}]  }
   0x1   :  { %v239_v0 = vld [vmem:[%s308_s1 + $0x38] sm:$0xff]   ;;  %v240_v1 = vld [vmem:[%s308_s1 + $0x30] sm:$0xff]   ;;  %v241_v2 = vld [vmem:[%s308_s1 + $0x28] sm:$0xff]  }
   0x2   :  { %219 = vmatprep.subr.bf16.mxu0 %v239_v0  ;;  %v242_v3 = vld [vmem:[%s308_s1 + $0x20] sm:$0xff]   ;;  %v243_v5 = vld [vmem:[%s308_s1 + $0x18] sm:$0xff]   ;;  %v244_v6 = vld [vmem:[%s308_s1 + $0x10] sm:$0xff]  }
   0x3   :  { %220 = vmatpush3.bf16.msra.mxu0 %v239_v0  ;;  %v247_v4 = vld [vmem:[%s309_s0] sm:$0xff]   ;;  %v245_v7 = vld [vmem:[%s308_s1 + $0x8] sm:$0xff]  }
   0x4   :  { %221 = vmatprep.subr.bf16.mxu0 %v240_v1  ;;  %235 = vmatprep.mubr.bf16.mxu0 %v247_v4  ;;  %v246_v8 = vld [vmem:[%s308_s1] sm:$0xff]   ;;  %v248_v9 = vld [vmem:[%s309_s0 + $0x8] sm:$0xff]  }
   0x5   :  { %v179_v11 = vld [vmem:[%s310_s2] ss:$0 sm:$0xff] }
   0x7   :  { %222 = vmatpush3.bf16.msra.mxu0 %v240_v1 }
   0x8   :  { %223 = vmatprep.subr.bf16.mxu0 %v241_v2 }
   0xb   :  { %224 = vmatpush3.bf16.msra.mxu0 %v241_v2 }
   0xc   :  { %225 = vmatprep.subr.bf16.mxu0 %v242_v3 }
   0xf   :  { %226 = vmatpush3.bf16.msra.mxu0 %v242_v3 }
  0x10   :  { %227 = vmatprep.subr.bf16.mxu0 %v243_v5 }
  0x13   :  { %228 = vmatpush3.bf16.msra.mxu0 %v243_v5 }
  0x14   :  { %229 = vmatprep.subr.bf16.mxu0 %v244_v6 }
  0x17   :  { %230 = vmatpush3.bf16.msra.mxu0 %v244_v6 }
  0x18   :  { %231 = vmatprep.subr.bf16.mxu0 %v245_v7 }
  0x1b   :  { %232 = vmatpush3.bf16.msra.mxu0 %v245_v7 }
  0x1c   :  { %233 = vmatprep.subr.bf16.mxu0 %v246_v8 }
  0x1f   :  { %234 = vmatpush3.bf16.msra.mxu0 %v246_v8 }
  0x22   :  { %236 = vmatmul.mubr.bf16.vlgmr.msra.gmra.mxu0 %v248_v9 }
  0xe2   :  { %v237_v10 = vpop.f32.mrf.mxu0 }
  0xe3   :  { %v145_v13 = vadd.f32 %v237_v10, %v179_v11 }
  0xe4   :  { %v136_v12 = vpop.f32.mrf.mxu0 }
  0xe5   :  { %v137_v15 = vadd.f32 %v179_v11, %v136_v12  ;;  %v153_v18 = vmax.f32 %v145_v13, 0.0 }
  0xe6   :  { %v238_v14 = vpop.f32.mrf.mxu0 }
  0xe7   :  { %v148_v16 = vadd.f32 %v238_v14, %v179_v11  ;;  %v151_v21 = vmax.f32 %v137_v15, 0.0 }
  0xe8   :  { %v139_v17 = vpop.f32.mrf.mxu0 }
  0xe9   :  { %v154_v19 = vmax.f32 %v148_v16, 0.0  ;;  %v140_v20 = vadd.f32 %v179_v11, %v139_v17 }
  0xeb   :  { %v206_v22 = vpack.c.bf16 %v154_v19, %v153_v18  ;;  %v152_v23 = vmax.f32 %v140_v20, 0.0 }
  0xed   :  { %208 = vst [vmem:[%s311_s3 + $0x8] sm:$0xff] %v206_v22   ;;  %v201_v24 = vpack.c.bf16 %v152_v23, %v151_v21 }
  0xef   :  { %202 = vst [vmem:[%s311_s3] sm:$0xff] %v201_v24  }

// kernel: resnet_forward.27
= control target key start
LH: loop header
LB: loop body
LE: loop exit
PB: predicated region body
PF: predicated region fallthrough
CT: control target
= control target key end

     0   :  { %s304_s1 = inlined_call_operand.vmem [shape: bf16[128,128], index: 1, kind: input, shape index: {}]   ;;  %s305_s0 = inlined_call_operand.vmem [shape: bf16[32,128], index: 0, kind: input, shape index: {}]   ;;  %s306_s2 = inlined_call_operand.vmem [shape: f32[1,128], index: 2, kind: input, shape index: {}]   ;;  %s307_s3 = inlined_call_operand.vmem [shape: bf16[32,128], index: 3, kind: output, shape index: {}]  }
   0x1   :  { %v235_v0 = vld [vmem:[%s304_s1 + $0x38] sm:$0xff]   ;;  %v236_v1 = vld [vmem:[%s304_s1 + $0x30] sm:$0xff]   ;;  %v237_v2 = vld [vmem:[%s304_s1 + $0x28] sm:$0xff]  }
   0x2   :  { %215 = vmatprep.subr.bf16.mxu0 %v235_v0  ;;  %v238_v3 = vld [vmem:[%s304_s1 + $0x20] sm:$0xff]   ;;  %v239_v5 = vld [vmem:[%s304_s1 + $0x18] sm:$0xff]   ;;  %v240_v6 = vld [vmem:[%s304_s1 + $0x10] sm:$0xff]  }
   0x3   :  { %216 = vmatpush3.bf16.msra.mxu0 %v235_v0  ;;  %v243_v4 = vld [vmem:[%s305_s0] sm:$0xff]   ;;  %v241_v7 = vld [vmem:[%s304_s1 + $0x8] sm:$0xff]  }
   0x4   :  { %217 = vmatprep.subr.bf16.mxu0 %v236_v1  ;;  %231 = vmatprep.mubr.bf16.mxu0 %v243_v4  ;;  %v242_v8 = vld [vmem:[%s304_s1] sm:$0xff]   ;;  %v244_v9 = vld [vmem:[%s305_s0 + $0x8] sm:$0xff]  }
   0x5   :  { %v175_v11 = vld [vmem:[%s306_s2] ss:$0 sm:$0xff] }
   0x7   :  { %218 = vmatpush3.bf16.msra.mxu0 %v236_v1 }
   0x8   :  { %219 = vmatprep.subr.bf16.mxu0 %v237_v2 }
   0xb   :  { %220 = vmatpush3.bf16.msra.mxu0 %v237_v2 }
   0xc   :  { %221 = vmatprep.subr.bf16.mxu0 %v238_v3 }
   0xf   :  { %222 = vmatpush3.bf16.msra.mxu0 %v238_v3 }
  0x10   :  { %223 = vmatprep.subr.bf16.mxu0 %v239_v5 }
  0x13   :  { %224 = vmatpush3.bf16.msra.mxu0 %v239_v5 }
  0x14   :  { %225 = vmatprep.subr.bf16.mxu0 %v240_v6 }
  0x17   :  { %226 = vmatpush3.bf16.msra.mxu0 %v240_v6 }
  0x18   :  { %227 = vmatprep.subr.bf16.mxu0 %v241_v7 }
  0x1b   :  { %228 = vmatpush3.bf16.msra.mxu0 %v241_v7 }
  0x1c   :  { %229 = vmatprep.subr.bf16.mxu0 %v242_v8 }
  0x1f   :  { %230 = vmatpush3.bf16.msra.mxu0 %v242_v8 }
  0x22   :  { %232 = vmatmul.mubr.bf16.vlgmr.msra.gmra.mxu0 %v244_v9 }
  0xe2   :  { %v233_v10 = vpop.f32.mrf.mxu0 }
  0xe3   :  { %v145_v14 = vadd.f32 %v233_v10, %v175_v11 }
  0xe4   :  { %v136_v12 = vpop.f32.mrf.mxu0 }
  0xe5   :  { %v137_v17 = vadd.f32 %v175_v11, %v136_v12 }
  0xe6   :  { %v234_v13 = vpop.f32.mrf.mxu0 }
  0xe7   :  { %v148_v15 = vadd.f32 %v234_v13, %v175_v11 }
  0xe8   :  { %v139_v16 = vpop.f32.mrf.mxu0 }
  0xe9   :  { %v202_v18 = vpack.c.bf16 %v148_v15, %v145_v14  ;;  %v140_v19 = vadd.f32 %v175_v11, %v139_v16 }
  0xeb   :  { %204 = vst [vmem:[%s307_s3 + $0x8] sm:$0xff] %v202_v18   ;;  %v197_v20 = vpack.c.bf16 %v140_v19, %v137_v17 }
  0xed   :  { %198 = vst [vmem:[%s307_s3] sm:$0xff] %v197_v20  }

// kernel: resnet_forward.29
= control target key start
LH: loop header
LB: loop body
LE: loop exit
PB: predicated region body
PF: predicated region fallthrough
CT: control target
= control target key end

     0   :  { %s446_s1 = inlined_call_operand.vmem [shape: bf16[256,128], index: 1, kind: input, shape index: {}]   ;;  %s447_s0 = inlined_call_operand.vmem [shape: bf16[32,256], index: 0, kind: input, shape index: {}]   ;;  %s448_s2 = inlined_call_operand.vmem [shape: f32[1,128], index: 2, kind: input, shape index: {}]   ;;  %s449_s3 = inlined_call_operand.vmem [shape: bf16[32,128], index: 3, kind: output, shape index: {}]  }
   0x1   :  { %v335_v0 = vld [vmem:[%s446_s1 + $0x78] sm:$0xff]   ;;  %v337_v2 = vld [vmem:[%s446_s1 + $0x70] sm:$0xff]   ;;  %v339_v4 = vld [vmem:[%s446_s1 + $0x68] sm:$0xff]  }
   0x2   :  { %v336_v1 = vld [vmem:[%s446_s1 + $0x38] sm:$0xff]   ;;  %291 = vmatprep.subr.bf16.mxu0 %v335_v0  ;;  %319 = vmatprep.subr.bf16.mxu1 %v335_v0  ;;  %v338_v3 = vld [vmem:[%s446_s1 + $0x30] sm:$0xff]   ;;  %v340_v5 = vld [vmem:[%s446_s1 + $0x28] sm:$0xff]  }
   0x3   :  { %292 = vmatpush3.bf16.msra.mxu0 %v336_v1  ;;  %327 = vmatpush3.bf16.msra.mxu1 %v336_v1  ;;  %v341_v6 = vld [vmem:[%s446_s1 + $0x60] sm:$0xff]   ;;  %v343_v8 = vld [vmem:[%s446_s1 + $0x58] sm:$0xff]   ;;  %v345_v10 = vld [vmem:[%s446_s1 + $0x50] sm:$0xff]  }
   0x4   :  { %293 = vmatprep.subr.bf16.mxu0 %v337_v2  ;;  %320 = vmatprep.subr.bf16.mxu1 %v337_v2  ;;  %v342_v7 = vld [vmem:[%s446_s1 + $0x20] sm:$0xff]   ;;  %v344_v9 = vld [vmem:[%s446_s1 + $0x18] sm:$0xff]   ;;  %v346_v13 = vld [vmem:[%s446_s1 + $0x10] sm:$0xff]  }
   0x5   :  { %v353_v11 = vld [vmem:[%s447_s0 + $0x4] ss:$8 sps:$4 sm:$0xff]   ;;  %v356_v12 = vld [vmem:[%s447_s0 + $0x14] ss:$8 sps:$4 sm:$0xff]   ;;  %v351_v18 = vld [vmem:[%s447_s0] ss:$8 sps:$4 sm:$0xff]  }
   0x6   :  { %v347_v14 = vld [vmem:[%s446_s1 + $0x48] sm:$0xff]   ;;  %206 = vmatprep.mubr.bf16.mxu0 %v353_v11  ;;  %214 = vmatprep.mubr.bf16.mxu1 %v356_v12  ;;  %v349_v16 = vld [vmem:[%s446_s1 + $0x40] sm:$0xff]   ;;  %v354_v19 = vld [vmem:[%s447_s0 + $0x10] ss:$8 sps:$4 sm:$0xff]  }
   0x7   :  { %294 = vmatpush3.bf16.msra.mxu0 %v338_v3  ;;  %328 = vmatpush3.bf16.msra.mxu1 %v338_v3  ;;  %v348_v15 = vld [vmem:[%s446_s1 + $0x8] sm:$0xff]   ;;  %v350_v17 = vld [vmem:[%s446_s1] sm:$0xff]  }
   0x8   :  { %295 = vmatprep.subr.bf16.mxu0 %v339_v4  ;;  %321 = vmatprep.subr.bf16.mxu1 %v339_v4  ;;  %v251_v26 = vld [vmem:[%s448_s2] ss:$0 sm:$0xff] }
   0xb   :  { %296 = vmatpush3.bf16.msra.mxu0 %v340_v5  ;;  %329 = vmatpush3.bf16.msra.mxu1 %v340_v5 }
   0xc   :  { %297 = vmatprep.subr.bf16.mxu0 %v341_v6  ;;  %322 = vmatprep.subr.bf16.mxu1 %v341_v6 }
   0xf   :  { %298 = vmatpush3.bf16.msra.mxu0 %v342_v7  ;;  %330 = vmatpush3.bf16.msra.mxu1 %v342_v7 }
  0x10   :  { %299 = vmatprep.subr.bf16.mxu0 %v343_v8  ;;  %323 = vmatprep.subr.bf16.mxu1 %v343_v8 }
  0x13   :  { %300 = vmatpush3.bf16.msra.mxu0 %v344_v9  ;;  %331 = vmatpush3.bf16.msra.mxu1 %v344_v9 }
  0x14   :  { %301 = vmatprep.subr.bf16.mxu0 %v345_v10  ;;  %324 = vmatprep.subr.bf16.mxu1 %v345_v10 }
  0x17   :  { %302 = vmatpush3.bf16.msra.mxu0 %v346_v13  ;;  %332 = vmatpush3.bf16.msra.mxu1 %v346_v13 }
  0x18   :  { %303 = vmatprep.subr.bf16.mxu0 %v347_v14  ;;  %325 = vmatprep.subr.bf16.mxu1 %v347_v14 }
  0x1b   :  { %304 = vmatpush3.bf16.msra.mxu0 %v348_v15  ;;  %333 = vmatpush3.bf16.msra.mxu1 %v348_v15 }
  0x1c   :  { %305 = vmatprep.subr.bf16.mxu0 %v349_v16  ;;  %326 = vmatprep.subr.bf16.mxu1 %v349_v16 }
  0x1f   :  { %306 = vmatpush3.bf16.msra.mxu0 %v350_v17  ;;  %334 = vmatpush3.bf16.msra.mxu1 %v350_v17 }
  0x22   :  { %207 = vmatmul.mubr.bf16.vlgmr.msra.gmra.mxu0 %v351_v18  ;;  %215 = vmatmul.mubr.bf16.vlgmr.msra.gmra.mxu1 %v354_v19 }
  0xe2   :  { %v307_v20 = vpop.f32.mrf.mxu0  ;;  %v313_v21 = vpop.f32.mrf.mxu1 }
  0xe4   :  { %v308_v22 = vpop.f32.mrf.mxu0  ;;  %v314_v23 = vpop.f32.mrf.mxu1 }
  0xe5   :  { %v309_v24 = vadd.f32 %v308_v22, %v307_v20  ;;  %v315_v25 = vadd.f32 %v314_v23, %v313_v21 }
  0xe6   :  { %v310_v27 = vpop.f32.mrf.mxu0  ;;  %v316_v28 = vpop.f32.mrf.mxu1 }
  0xe7   :  { %v209_v31 = vadd.f32 %v309_v24, %v251_v26  ;;  %v217_v32 = vadd.f32 %v315_v25, %v251_v26 }
  0xe8   :  { %v311_v29 = vpop.f32.mrf.mxu0  ;;  %v317_v30 = vpop.f32.mrf.mxu1 }
  0xe9   :  { %v312_v33 = vadd.f32 %v311_v29, %v310_v27  ;;  %v318_v34 = vadd.f32 %v317_v30, %v316_v28  ;;  %v223_v37 = vmax.f32 %v209_v31, 0.0  ;;  %v225_v38 = vmax.f32 %v217_v32, 0.0 }
  0xeb   :  { %v212_v35 = vadd.f32 %v312_v33, %v251_v26  ;;  %v220_v36 = vadd.f32 %v318_v34, %v251_v26 }
  0xed   :  { %v224_v39 = vmax.f32 %v212_v35, 0.0  ;;  %v226_v40 = vmax.f32 %v220_v36, 0.0 }
  0xef   :  { %v283_v41 = vpack.c.bf16 %v224_v39, %v223_v37  ;;  %v288_v42 = vpack.c.bf16 %v226_v40, %v225_v38 }
  0xf1   :  { %284 = vst [vmem:[%s449_s3] sm:$0xff] %v283_v41   ;;  %290 = vst [vmem:[%s449_s3 + $0x8] sm:$0xff] %v288_v42  }

// kernel: resnet_forward.28
= control target key start
LH: loop header
LB: loop body
LE: loop exit
PB: predicated region body
PF: predicated region fallthrough
CT: control target
= control target key end

     0   :  { %s481_s1 = inlined_call_operand.vmem [shape: bf16[256,128], index: 1, kind: input, shape index: {}]   ;;  %s482_s0 = inlined_call_operand.vmem [shape: bf16[32,256], index: 0, kind: input, shape index: {}]   ;;  %s483_s2 = inlined_call_operand.vmem [shape: f32[1,128], index: 2, kind: input, shape index: {}]   ;;  %s484_s3 = inlined_call_operand.vmem [shape: bf16[32,128], index: 3, kind: input, shape index: {}]   ;;  %s485_s4 = inlined_call_operand.vmem [shape: bf16[32,128], index: 4, kind: output, shape index: {}]  }
   0x1   :  { %v359_v0 = vld [vmem:[%s481_s1 + $0x78] sm:$0xff]   ;;  %v361_v2 = vld [vmem:[%s481_s1 + $0x70] sm:$0xff]   ;;  %v363_v4 = vld [vmem:[%s481_s1 + $0x68] sm:$0xff]  }
   0x2   :  { %v360_v1 = vld [vmem:[%s481_s1 + $0x38] sm:$0xff]   ;;  %315 = vmatprep.subr.bf16.mxu0 %v359_v0  ;;  %343 = vmatprep.subr.bf16.mxu1 %v359_v0  ;;  %v362_v3 = vld [vmem:[%s481_s1 + $0x30] sm:$0xff]   ;;  %v364_v5 = vld [vmem:[%s481_s1 + $0x28] sm:$0xff]  }
   0x3   :  { %316 = vmatpush3.bf16.msra.mxu0 %v360_v1  ;;  %351 = vmatpush3.bf16.msra.mxu1 %v360_v1  ;;  %v365_v6 = vld [vmem:[%s481_s1 + $0x60] sm:$0xff]   ;;  %v367_v8 = vld [vmem:[%s481_s1 + $0x58] sm:$0xff]   ;;  %v369_v10 = vld [vmem:[%s481_s1 + $0x50] sm:$0xff]  }
   0x4   :  { %317 = vmatprep.subr.bf16.mxu0 %v361_v2  ;;  %344 = vmatprep.subr.bf16.mxu1 %v361_v2  ;;  %v366_v7 = vld [vmem:[%s481_s1 + $0x20] sm:$0xff]   ;;  %v368_v9 = vld [vmem:[%s481_s1 + $0x18] sm:$0xff]   ;;  %v370_v13 = vld [vmem:[%s481_s1 + $0x10] sm:$0xff]  }
   0x5   :  { %v377_v11 = vld [vmem:[%s482_s0 + $0x4] ss:$8 sps:$4 sm:$0xff]   ;;  %v380_v12 = vld [vmem:[%s482_s0 + $0x14] ss:$8 sps:$4 sm:$0xff]   ;;  %v375_v18 = vld [vmem:[%s482_s0] ss:$8 sps:$4 sm:$0xff]  }
   0x6   :  { %v371_v14 = vld [vmem:[%s481_s1 + $0x48] sm:$0xff]   ;;  %209 = vmatprep.mubr.bf16.mxu0 %v377_v11  ;;  %217 = vmatprep.mubr.bf16.mxu1 %v380_v12  ;;  %v373_v16 = vld [vmem:[%s481_s1 + $0x40] sm:$0xff]   ;;  %v378_v19 = vld [vmem:[%s482_s0 + $0x10] ss:$8 sps:$4 sm:$0xff]  }
   0x7   :  { %318 = vmatpush3.bf16.msra.mxu0 %v362_v3  ;;  %352 = vmatpush3.bf16.msra.mxu1 %v362_v3  ;;  %v372_v15 = vld [vmem:[%s481_s1 + $0x8] sm:$0xff]   ;;  %v374_v17 = vld [vmem:[%s481_s1] sm:$0xff]  }
   0x8   :  { %319 = vmatprep.subr.bf16.mxu0 %v363_v4  ;;  %345 = vmatprep.subr.bf16.mxu1 %v363_v4  ;;  %v266_v22 = vld [vmem:[%s483_s2] ss:$0 sm:$0xff]  ;;  %v313_v26 = vld [vmem:[%s484_s3 + $0x8] sm:$0xff]  }
   0x9   :  { %v296_v24 = vld [vmem:[%s484_s3] sm:$0xff]   ;;  %v301_v34 = vunpack.c.l.bf16 %v313_v26  ;;  %v302_v40 = vunpack.c.h.bf16 %v313_v26 }
   0xa   :  { %v297_v32 = vunpack.c.l.bf16 %v296_v24  ;;  %v298_v38 = vunpack.c.h.bf16 %v296_v24 }
   0xb   :  { %320 = vmatpush3.bf16.msra.mxu0 %v364_v5  ;;  %353 = vmatpush3.bf16.msra.mxu1 %v364_v5 }
   0xc   :  { %321 = vmatprep.subr.bf16.mxu0 %v365_v6  ;;  %346 = vmatprep.subr.bf16.mxu1 %v365_v6 }
   0xf   :  { %322 = vmatpush3.bf16.msra.mxu0 %v366_v7  ;;  %354 = vmatpush3.bf16.msra.mxu1 %v366_v7 }
  0x10   :  { %323 = vmatprep.subr.bf16.mxu0 %v367_v8  ;;  %347 = vmatprep.subr.bf16.mxu1 %v367_v8 }
  0x13   :  { %324 = vmatpush3.bf16.msra.mxu0 %v368_v9  ;;  %355 = vmatpush3.bf16.msra.mxu1 %v368_v9 }
  0x14   :  { %325 = vmatprep.subr.bf16.mxu0 %v369_v10  ;;  %348 = vmatprep.subr.bf16.mxu1 %v369_v10 }
  0x17   :  { %326 = vmatpush3.bf16.msra.mxu0 %v370_v13  ;;  %356 = vmatpush3.bf16.msra.mxu1 %v370_v13 }
  0x18   :  { %327 = vmatprep.subr.bf16.mxu0 %v371_v14  ;;  %349 = vmatprep.subr.bf16.mxu1 %v371_v14 }
  0x1b   :  { %328 = vmatpush3.bf16.msra.mxu0 %v372_v15  ;;  %357 = vmatpush3.bf16.msra.mxu1 %v372_v15 }
  0x1c   :  { %329 = vmatprep.subr.bf16.mxu0 %v373_v16  ;;  %350 = vmatprep.subr.bf16.mxu1 %v373_v16 }
  0x1f   :  { %330 = vmatpush3.bf16.msra.mxu0 %v374_v17  ;;  %358 = vmatpush3.bf16.msra.mxu1 %v374_v17 }
  0x22   :  { %210 = vmatmul.mubr.bf16.vlgmr.msra.gmra.mxu0 %v375_v18  ;;  %218 = vmatmul.mubr.bf16.vlgmr.msra.gmra.mxu1 %v378_v19 }
  0xe2   :  { %v331_v20 = vpop.f32.mrf.mxu0  ;;  %v337_v21 = vpop.f32.mrf.mxu1 }
  0xe4   :  { %v332_v23 = vpop.f32.mrf.mxu0  ;;  %v338_v25 = vpop.f32.mrf.mxu1 }
  0xe5   :  { %v333_v27 = vadd.f32 %v332_v23, %v331_v20  ;;  %v339_v28 = vadd.f32 %v338_v25, %v337_v21 }
  0xe6   :  { %v334_v29 = vpop.f32.mrf.mxu0  ;;  %v340_v30 = vpop.f32.mrf.mxu1 }
  0xe7   :  { %v212_v31 = vadd.f32 %v333_v27, %v266_v22  ;;  %v220_v33 = vadd.f32 %v339_v28, %v266_v22 }
  0xe8   :  { %v335_v35 = vpop.f32.mrf.mxu0  ;;  %v341_v36 = vpop.f32.mrf.mxu1 }
  0xe9   :  { %v336_v37 = vadd.f32 %v335_v35, %v334_v29  ;;  %v342_v39 = vadd.f32 %v341_v36, %v340_v30  ;;  %v234_v41 = vadd.f32 %v297_v32, %v212_v31  ;;  %v236_v42 = vadd.f32 %v301_v34, %v220_v33 }
  0xeb   :  { %v215_v43 = vadd.f32 %v336_v37, %v266_v22  ;;  %v223_v44 = vadd.f32 %v342_v39, %v266_v22  ;;  %v238_v47 = vmax.f32 %v234_v41, 0.0  ;;  %v240_v48 = vmax.f32 %v236_v42, 0.0 }
  0xed   :  { %v235_v45 = vadd.f32 %v298_v38, %v215_v43  ;;  %v237_v46 = vadd.f32 %v302_v40, %v223_v44 }
  0xef   :  { %v239_v49 = vmax.f32 %v235_v45, 0.0  ;;  %v241_v50 = vmax.f32 %v237_v46, 0.0 }
  0xf1   :  { %v306_v51 = vpack.c.bf16 %v239_v49, %v238_v47  ;;  %v311_v52 = vpack.c.bf16 %v241_v50, %v240_v48 }
  0xf3   :  { %307 = vst [vmem:[%s485_s4] sm:$0xff] %v306_v51   ;;  %314 = vst [vmem:[%s485_s4 + $0x8] sm:$0xff] %v311_v52  }

// kernel: resnet_forward.32
= control target key start
LH: loop header
LB: loop body
LE: loop exit
PB: predicated region body
PF: predicated region fallthrough
CT: control target
= control target key end

     0   :  { %v208_v0 = vmov 0.0   ;;  %vm209_vm0 = vmmov 0   ;;  %s263_s1 = inlined_call_operand.vmem [shape: bf16[128,128], index: 1, kind: input, shape index: {}]   ;;  %s264_s0 = inlined_call_operand.vmem [shape: bf16[16,128], index: 0, kind: input, shape index: {}]   ;;  %s265_s2 = inlined_call_operand.vmem [shape: f32[1,128], index: 2, kind: input, shape index: {}]   ;;  %s266_s3 = inlined_call_operand.vmem [shape: bf16[16,128], index: 3, kind: output, shape index: {}]  }
   0x1   :  { %177 = vmatprep.subr.bf16.mxu0 %v208_v0  ;;  %v199_v1 = vld [vmem:[%s263_s1 + $0x38] sm:$0xff]   ;;  %193 = vmatprep.mubr.msk.bf16.mxu0 %vm209_vm0, %v208_v0  ;;  %v200_v2 = vld [vmem:[%s263_s1 + $0x30] sm:$0xff]   ;;  %v201_v3 = vld [vmem:[%s263_s1 + $0x28] sm:$0xff]  }
   0x2   :  { %178 = vmatpush3.bf16.msra.mxu0 %v199_v1  ;;  %v202_v4 = vld [vmem:[%s263_s1 + $0x20] sm:$0xff]   ;;  %v203_v5 = vld [vmem:[%s263_s1 + $0x18] sm:$0xff]   ;;  %v204_v6 = vld [vmem:[%s263_s1 + $0x10] sm:$0xff]  }
   0x3   :  { %179 = vmatprep.subr.bf16.mxu0 %v208_v0  ;;  %v205_v7 = vld [vmem:[%s263_s1 + $0x8] sm:$0xff]   ;;  %v206_v8 = vld [vmem:[%s263_s1] sm:$0xff]  }
   0x4   :  { %v207_v9 = vld [vmem:[%s264_s0] sm:$0xff]  }
   0x5   :  { %v149_v11 = vld [vmem:[%s265_s2] ss:$0 sm:$0xff] }
   0x6   :  { %180 = vmatpush3.bf16.msra.mxu0 %v200_v2 }
   0x7   :  { %181 = vmatprep.subr.bf16.mxu0 %v208_v0 }
   0xa   :  { %182 = vmatpush3.bf16.msra.mxu0 %v201_v3 }
   0xb   :  { %183 = vmatprep.subr.bf16.mxu0 %v208_v0 }
   0xe   :  { %184 = vmatpush3.bf16.msra.mxu0 %v202_v4 }
   0xf   :  { %185 = vmatprep.subr.bf16.mxu0 %v208_v0 }
  0x12   :  { %186 = vmatpush3.bf16.msra.mxu0 %v203_v5 }
  0x13   :  { %187 = vmatprep.subr.bf16.mxu0 %v208_v0 }
  0x16   :  { %188 = vmatpush3.bf16.msra.mxu0 %v204_v6 }
  0x17   :  { %189 = vmatprep.subr.bf16.mxu0 %v208_v0 }
  0x1a   :  { %190 = vmatpush3.bf16.msra.mxu0 %v205_v7 }
  0x1b   :  { %191 = vmatprep.subr.bf16.mxu0 %v208_v0 }
  0x1e   :  { %192 = vmatpush3.bf16.msra.mxu0 %v206_v8 }
  0x21   :  { %194 = vmatmul.mubr.bf16.vlgmr.msra.gmra.mxu0 %v207_v9 }
  0xe1   :  { %v128_v10 = vpop.f32.mrf.mxu0 }
  0xe2   :  { %v129_v14 = vadd.f32 %v149_v11, %v128_v10 }
  0xe3   :  { %v195_v12 = vpop.f32.mrf.mxu0 }
  0xe5   :  { %v131_v13 = vpop.f32.mrf.mxu0 }
  0xe6   :  { %v132_v15 = vadd.f32 %v149_v11, %v131_v13 }
  0xe7   :  { %v196_v16 = vpop.f32.mrf.mxu0 }
  0xe8   :  { %v166_v17 = vpack.c.bf16 %v132_v15, %v129_v14 }
  0xea   :  { %167 = vst [vmem:[%s266_s3] sm:$0xff] %v166_v17  }

// kernel: resnet_forward.31
= control target key start
LH: loop header
LB: loop body
LE: loop exit
PB: predicated region body
PF: predicated region fallthrough
CT: control target
= control target key end

     0   :  { %s368_s1 = inlined_call_operand.vmem [shape: bf16[256,128], index: 1, kind: input, shape index: {}]   ;;  %s369_s0 = inlined_call_operand.vmem [shape: bf16[16,256], index: 0, kind: input, shape index: {}]   ;;  %s370_s2 = inlined_call_operand.vmem [shape: f32[1,128], index: 2, kind: input, shape index: {}]   ;;  %s371_s3 = inlined_call_operand.vmem [shape: bf16[16,128], index: 3, kind: output, shape index: {}]  }
   0x1   :  { %v269_v0 = vld [vmem:[%s368_s1 + $0x78] sm:$0xff]   ;;  %v271_v2 = vld [vmem:[%s368_s1 + $0x70] sm:$0xff]   ;;  %v273_v4 = vld [vmem:[%s368_s1 + $0x68] sm:$0xff]  }
   0x2   :  { %v270_v1 = vld [vmem:[%s368_s1 + $0x38] sm:$0xff]   ;;  %247 = vmatprep.subr.bf16.mxu0 %v269_v0  ;;  %v272_v3 = vld [vmem:[%s368_s1 + $0x30] sm:$0xff]   ;;  %v274_v5 = vld [vmem:[%s368_s1 + $0x28] sm:$0xff]  }
   0x3   :  { %248 = vmatpush3.bf16.msra.mxu0 %v270_v1  ;;  %v275_v6 = vld [vmem:[%s368_s1 + $0x60] sm:$0xff]   ;;  %v277_v8 = vld [vmem:[%s368_s1 + $0x58] sm:$0xff]   ;;  %v279_v10 = vld [vmem:[%s368_s1 + $0x50] sm:$0xff]  }
   0x4   :  { %249 = vmatprep.subr.bf16.mxu0 %v271_v2  ;;  %v276_v7 = vld [vmem:[%s368_s1 + $0x20] sm:$0xff]   ;;  %v278_v9 = vld [vmem:[%s368_s1 + $0x18] sm:$0xff]   ;;  %v280_v12 = vld [vmem:[%s368_s1 + $0x10] sm:$0xff]  }
   0x5   :  { %v287_v11 = vld [vmem:[%s369_s0 + $0x4] ss:$8 sps:$4 sm:$0xff]   ;;  %v285_v17 = vld [vmem:[%s369_s0] ss:$8 sps:$4 sm:$0xff]  }
   0x6   :  { %194 = vmatprep.mubr.bf16.mxu0 %v287_v11  ;;  %v281_v13 = vld [vmem:[%s368_s1 + $0x48] sm:$0xff]   ;;  %v283_v15 = vld [vmem:[%s368_s1 + $0x40] sm:$0xff]  }
   0x7   :  { %250 = vmatpush3.bf16.msra.mxu0 %v272_v3  ;;  %v282_v14 = vld [vmem:[%s368_s1 + $0x8] sm:$0xff]   ;;  %v284_v16 = vld [vmem:[%s368_s1] sm:$0xff]  }
   0x8   :  { %251 = vmatprep.subr.bf16.mxu0 %v273_v4  ;;  %v219_v21 = vld [vmem:[%s370_s2] ss:$0 sm:$0xff] }
   0xb   :  { %252 = vmatpush3.bf16.msra.mxu0 %v274_v5 }
   0xc   :  { %253 = vmatprep.subr.bf16.mxu0 %v275_v6 }
   0xf   :  { %254 = vmatpush3.bf16.msra.mxu0 %v276_v7 }
  0x10   :  { %255 = vmatprep.subr.bf16.mxu0 %v277_v8 }
  0x13   :  { %256 = vmatpush3.bf16.msra.mxu0 %v278_v9 }
  0x14   :  { %257 = vmatprep.subr.bf16.mxu0 %v279_v10 }
  0x17   :  { %258 = vmatpush3.bf16.msra.mxu0 %v280_v12 }
  0x18   :  { %259 = vmatprep.subr.bf16.mxu0 %v281_v13 }
  0x1b   :  { %260 = vmatpush3.bf16.msra.mxu0 %v282_v14 }
  0x1c   :  { %261 = vmatprep.subr.bf16.mxu0 %v283_v15 }
  0x1f   :  { %262 = vmatpush3.bf16.msra.mxu0 %v284_v16 }
  0x22   :  { %195 = vmatmul.mubr.bf16.vlgmr.msra.gmra.mxu0 %v285_v17 }
  0xe2   :  { %v263_v18 = vpop.f32.mrf.mxu0 }
  0xe4   :  { %v264_v19 = vpop.f32.mrf.mxu0 }
  0xe5   :  { %v265_v20 = vadd.f32 %v264_v19, %v263_v18 }
  0xe6   :  { %v266_v22 = vpop.f32.mrf.mxu0 }
  0xe7   :  { %v197_v24 = vadd.f32 %v265_v20, %v219_v21 }
  0xe8   :  { %v267_v23 = vpop.f32.mrf.mxu0 }
  0xe9   :  { %v268_v25 = vadd.f32 %v267_v23, %v266_v22  ;;  %v203_v27 = vmax.f32 %v197_v24, 0.0 }
  0xeb   :  { %v200_v26 = vadd.f32 %v268_v25, %v219_v21 }
  0xed   :  { %v204_v28 = vmax.f32 %v200_v26, 0.0 }
  0xef   :  { %v245_v29 = vpack.c.bf16 %v204_v28, %v203_v27 }
  0xf1   :  { %246 = vst [vmem:[%s371_s3] sm:$0xff] %v245_v29  }

// kernel: resnet_forward.34
= control target key start
LH: loop header
LB: loop body
LE: loop exit
PB: predicated region body
PF: predicated region fallthrough
CT: control target
= control target key end

     0   :  { %v450_v1 = vmov 0.0   ;;  %vm451_vm0 = vmmov 0   ;;  %s559_s1 = inlined_call_operand.vmem [shape: bf16[384,128], index: 1, kind: input, shape index: {}]   ;;  %s560_s0 = inlined_call_operand.vmem [shape: bf16[16,384], index: 0, kind: input, shape index: {}]   ;;  %s561_s2 = inlined_call_operand.vmem [shape: f32[1,128], index: 2, kind: input, shape index: {}]   ;;  %s562_s3 = inlined_call_operand.vmem [shape: bf16[16,128], index: 3, kind: output, shape index: {}]  }
   0x1   :  { %v422_v0 = vld [vmem:[%s559_s1 + $0x78] sm:$0xff]   ;;  %400 = vmatprep.subr.bf16.mxu1 %v450_v1  ;;  %416 = vmatprep.mubr.msk.bf16.mxu1 %vm451_vm0, %v450_v1  ;;  %v425_v4 = vld [vmem:[%s559_s1 + $0x70] sm:$0xff]   ;;  %v428_v7 = vld [vmem:[%s559_s1 + $0x68] sm:$0xff]  }
   0x2   :  { %v423_v2 = vld [vmem:[%s559_s1 + $0x38] sm:$0xff]   ;;  %369 = vmatprep.subr.bf16.mxu0 %v422_v0  ;;  %v426_v5 = vld [vmem:[%s559_s1 + $0x30] sm:$0xff]   ;;  %v429_v8 = vld [vmem:[%s559_s1 + $0x28] sm:$0xff]  }
   0x3   :  { %v424_v3 = vld [vmem:[%s559_s1 + $0xb8] sm:$0xff]   ;;  %370 = vmatpush3.bf16.msra.mxu0 %v423_v2  ;;  %v427_v6 = vld [vmem:[%s559_s1 + $0xb0] sm:$0xff]   ;;  %v430_v9 = vld [vmem:[%s559_s1 + $0xa8] sm:$0xff]  }
   0x4   :  { %401 = vmatpush3.bf16.msra.mxu1 %v424_v3  ;;  %371 = vmatprep.subr.bf16.mxu0 %v425_v4  ;;  %v431_v10 = vld [vmem:[%s559_s1 + $0x60] sm:$0xff]   ;;  %v434_v13 = vld [vmem:[%s559_s1 + $0x58] sm:$0xff]   ;;  %v437_v16 = vld [vmem:[%s559_s1 + $0x50] sm:$0xff]  }
   0x5   :  { %402 = vmatprep.subr.bf16.mxu1 %v450_v1  ;;  %v432_v11 = vld [vmem:[%s559_s1 + $0x20] sm:$0xff]   ;;  %v435_v14 = vld [vmem:[%s559_s1 + $0x18] sm:$0xff]   ;;  %v438_v17 = vld [vmem:[%s559_s1 + $0x10] sm:$0xff]  }
   0x6   :  { %v433_v12 = vld [vmem:[%s559_s1 + $0xa0] sm:$0xff]   ;;  %v436_v15 = vld [vmem:[%s559_s1 + $0x98] sm:$0xff]   ;;  %v439_v18 = vld [vmem:[%s559_s1 + $0x90] sm:$0xff]  }
   0x7   :  { %372 = vmatpush3.bf16.msra.mxu0 %v426_v5  ;;  %v440_v19 = vld [vmem:[%s559_s1 + $0x48] sm:$0xff]   ;;  %v443_v22 = vld [vmem:[%s559_s1 + $0x40] sm:$0xff]  }
   0x8   :  { %403 = vmatpush3.bf16.msra.mxu1 %v427_v6  ;;  %373 = vmatprep.subr.bf16.mxu0 %v428_v7  ;;  %v441_v20 = vld [vmem:[%s559_s1 + $0x8] sm:$0xff]   ;;  %v448_v23 = vld [vmem:[%s560_s0 + $0x4] ss:$12 sps:$4 sm:$0xff]   ;;  %v332_v30 = vld [vmem:[%s561_s2] ss:$0 sm:$0xff] }
   0x9   :  { %404 = vmatprep.subr.bf16.mxu1 %v450_v1  ;;  %v442_v21 = vld [vmem:[%s559_s1 + $0x88] sm:$0xff]   ;;  %v444_v24 = vld [vmem:[%s559_s1] sm:$0xff]   ;;  %266 = vmatprep.mubr.bf16.mxu0 %v448_v23 }
   0xa   :  { %v445_v25 = vld [vmem:[%s559_s1 + $0x80] sm:$0xff]   ;;  %v449_v27 = vld [vmem:[%s560_s0 + $0x8] ss:$12 sps:$4 sm:$0xff]  }
   0xb   :  { %374 = vmatpush3.bf16.msra.mxu0 %v429_v8  ;;  %v446_v26 = vld [vmem:[%s560_s0] ss:$12 sps:$4 sm:$0xff]  }
   0xc   :  { %405 = vmatpush3.bf16.msra.mxu1 %v430_v9  ;;  %375 = vmatprep.subr.bf16.mxu0 %v431_v10 }
   0xd   :  { %406 = vmatprep.subr.bf16.mxu1 %v450_v1 }
   0xf   :  { %376 = vmatpush3.bf16.msra.mxu0 %v432_v11 }
  0x10   :  { %407 = vmatpush3.bf16.msra.mxu1 %v433_v12  ;;  %377 = vmatprep.subr.bf16.mxu0 %v434_v13 }
  0x11   :  { %408 = vmatprep.subr.bf16.mxu1 %v450_v1 }
  0x13   :  { %378 = vmatpush3.bf16.msra.mxu0 %v435_v14 }
  0x14   :  { %409 = vmatpush3.bf16.msra.mxu1 %v436_v15  ;;  %379 = vmatprep.subr.bf16.mxu0 %v437_v16 }
  0x15   :  { %410 = vmatprep.subr.bf16.mxu1 %v450_v1 }
  0x17   :  { %380 = vmatpush3.bf16.msra.mxu0 %v438_v17 }
  0x18   :  { %411 = vmatpush3.bf16.msra.mxu1 %v439_v18  ;;  %381 = vmatprep.subr.bf16.mxu0 %v440_v19 }
  0x19   :  { %412 = vmatprep.subr.bf16.mxu1 %v450_v1 }
  0x1b   :  { %382 = vmatpush3.bf16.msra.mxu0 %v441_v20 }
  0x1c   :  { %413 = vmatpush3.bf16.msra.mxu1 %v442_v21  ;;  %383 = vmatprep.subr.bf16.mxu0 %v443_v22 }
  0x1d   :  { %414 = vmatprep.subr.bf16.mxu1 %v450_v1 }
  0x1f   :  { %384 = vmatpush3.bf16.msra.mxu0 %v444_v24 }
  0x20   :  { %415 = vmatpush3.bf16.msra.mxu1 %v445_v25 }
  0x22   :  { %267 = vmatmul.mubr.bf16.vlgmr.msra.gmra.mxu0 %v446_v26 }
  0x23   :  { %417 = vmatmul.mubr.bf16.vlgmr.msra.gmra.mxu1 %v449_v27 }
  0xe2   :  { %v385_v28 = vpop.f32.mrf.mxu0 }
  0xe3   :  { %v309_v29 = vpop.f32.mrf.mxu1 }
  0xe4   :  { %v386_v31 = vpop.f32.mrf.mxu0 }
  0xe5   :  { %v387_v32 = vadd.f32 %v386_v31, %v385_v28  ;;  %v418_v33 = vpop.f32.mrf.mxu1 }
  0xe6   :  { %v388_v34 = vpop.f32.mrf.mxu0 }
  0xe7   :  { %v269_v35 = vadd.f32 %v387_v32, %v332_v30  ;;  %v312_v36 = vpop.f32.mrf.mxu1 }
  0xe8   :  { %v389_v37 = vpop.f32.mrf.mxu0 }
  0xe9   :  { %v390_v38 = vadd.f32 %v389_v37, %v388_v34  ;;  %v419_v39 = vpop.f32.mrf.mxu1  ;;  %v310_v40 = vadd.f32 %v309_v29, %v269_v35 }
  0xeb   :  { %v272_v41 = vadd.f32 %v390_v38, %v332_v30  ;;  %v316_v43 = vmax.f32 %v310_v40, 0.0 }
  0xed   :  { %v313_v42 = vadd.f32 %v312_v36, %v272_v41 }
  0xef   :  { %v317_v44 = vmax.f32 %v313_v42, 0.0 }
  0xf1   :  { %v367_v45 = vpack.c.bf16 %v317_v44, %v316_v43 }
  0xf3   :  { %368 = vst [vmem:[%s562_s3] sm:$0xff] %v367_v45  }

// kernel: resnet_forward.33
= control target key start
LH: loop header
LB: loop body
LE: loop exit
PB: predicated region body
PF: predicated region fallthrough
CT: control target
= control target key end

     0   :  { %v463_v1 = vmov 0.0   ;;  %vm464_vm0 = vmmov 0   ;;  %s580_s1 = inlined_call_operand.vmem [shape: bf16[384,128], index: 1, kind: input, shape index: {}]   ;;  %s581_s0 = inlined_call_operand.vmem [shape: bf16[16,384], index: 0, kind: input, shape index: {}]   ;;  %s582_s2 = inlined_call_operand.vmem [shape: f32[1,128], index: 2, kind: input, shape index: {}]   ;;  %s583_s3 = inlined_call_operand.vmem [shape: bf16[16,128], index: 3, kind: input, shape index: {}]   ;;  %s584_s4 = inlined_call_operand.vmem [shape: bf16[16,128], index: 4, kind: output, shape index: {}]  }
   0x1   :  { %v435_v0 = vld [vmem:[%s580_s1 + $0x78] sm:$0xff]   ;;  %413 = vmatprep.subr.bf16.mxu1 %v463_v1  ;;  %429 = vmatprep.mubr.msk.bf16.mxu1 %vm464_vm0, %v463_v1  ;;  %v438_v4 = vld [vmem:[%s580_s1 + $0x70] sm:$0xff]   ;;  %v441_v7 = vld [vmem:[%s580_s1 + $0x68] sm:$0xff]  }
   0x2   :  { %v436_v2 = vld [vmem:[%s580_s1 + $0x38] sm:$0xff]   ;;  %382 = vmatprep.subr.bf16.mxu0 %v435_v0  ;;  %v439_v5 = vld [vmem:[%s580_s1 + $0x30] sm:$0xff]   ;;  %v442_v8 = vld [vmem:[%s580_s1 + $0x28] sm:$0xff]  }
   0x3   :  { %v437_v3 = vld [vmem:[%s580_s1 + $0xb8] sm:$0xff]   ;;  %383 = vmatpush3.bf16.msra.mxu0 %v436_v2  ;;  %v440_v6 = vld [vmem:[%s580_s1 + $0xb0] sm:$0xff]   ;;  %v443_v9 = vld [vmem:[%s580_s1 + $0xa8] sm:$0xff]  }
   0x4   :  { %414 = vmatpush3.bf16.msra.mxu1 %v437_v3  ;;  %384 = vmatprep.subr.bf16.mxu0 %v438_v4  ;;  %v444_v10 = vld [vmem:[%s580_s1 + $0x60] sm:$0xff]   ;;  %v447_v13 = vld [vmem:[%s580_s1 + $0x58] sm:$0xff]   ;;  %v450_v16 = vld [vmem:[%s580_s1 + $0x50] sm:$0xff]  }
   0x5   :  { %415 = vmatprep.subr.bf16.mxu1 %v463_v1  ;;  %v445_v11 = vld [vmem:[%s580_s1 + $0x20] sm:$0xff]   ;;  %v448_v14 = vld [vmem:[%s580_s1 + $0x18] sm:$0xff]   ;;  %v451_v17 = vld [vmem:[%s580_s1 + $0x10] sm:$0xff]  }
   0x6   :  { %v446_v12 = vld [vmem:[%s580_s1 + $0xa0] sm:$0xff]   ;;  %v449_v15 = vld [vmem:[%s580_s1 + $0x98] sm:$0xff]   ;;  %v452_v18 = vld [vmem:[%s580_s1 + $0x90] sm:$0xff]  }
   0x7   :  { %385 = vmatpush3.bf16.msra.mxu0 %v439_v5  ;;  %v453_v19 = vld [vmem:[%s580_s1 + $0x48] sm:$0xff]   ;;  %v456_v22 = vld [vmem:[%s580_s1 + $0x40] sm:$0xff]  }
   0x8   :  { %416 = vmatpush3.bf16.msra.mxu1 %v440_v6  ;;  %386 = vmatprep.subr.bf16.mxu0 %v441_v7  ;;  %v454_v20 = vld [vmem:[%s580_s1 + $0x8] sm:$0xff]   ;;  %v461_v23 = vld [vmem:[%s581_s0 + $0x4] ss:$12 sps:$4 sm:$0xff]   ;;  %v341_v30 = vld [vmem:[%s582_s2] ss:$0 sm:$0xff] }
   0x9   :  { %417 = vmatprep.subr.bf16.mxu1 %v463_v1  ;;  %v455_v21 = vld [vmem:[%s580_s1 + $0x88] sm:$0xff]   ;;  %v457_v24 = vld [vmem:[%s580_s1] sm:$0xff]   ;;  %269 = vmatprep.mubr.bf16.mxu0 %v461_v23 }
   0xa   :  { %v458_v25 = vld [vmem:[%s580_s1 + $0x80] sm:$0xff]   ;;  %v462_v27 = vld [vmem:[%s581_s0 + $0x8] ss:$12 sps:$4 sm:$0xff]  }
   0xb   :  { %387 = vmatpush3.bf16.msra.mxu0 %v442_v8  ;;  %v459_v26 = vld [vmem:[%s581_s0] ss:$12 sps:$4 sm:$0xff]  }
   0xc   :  { %418 = vmatpush3.bf16.msra.mxu1 %v443_v9  ;;  %388 = vmatprep.subr.bf16.mxu0 %v444_v10  ;;  %v374_v34 = vld [vmem:[%s583_s3] sm:$0xff]  }
   0xd   :  { %419 = vmatprep.subr.bf16.mxu1 %v463_v1  ;;  %v375_v40 = vunpack.c.l.bf16 %v374_v34  ;;  %v376_v44 = vunpack.c.h.bf16 %v374_v34 }
   0xf   :  { %389 = vmatpush3.bf16.msra.mxu0 %v445_v11 }
  0x10   :  { %420 = vmatpush3.bf16.msra.mxu1 %v446_v12  ;;  %390 = vmatprep.subr.bf16.mxu0 %v447_v13 }
  0x11   :  { %421 = vmatprep.subr.bf16.mxu1 %v463_v1 }
  0x13   :  { %391 = vmatpush3.bf16.msra.mxu0 %v448_v14 }
  0x14   :  { %422 = vmatpush3.bf16.msra.mxu1 %v449_v15  ;;  %392 = vmatprep.subr.bf16.mxu0 %v450_v16 }
  0x15   :  { %423 = vmatprep.subr.bf16.mxu1 %v463_v1 }
  0x17   :  { %393 = vmatpush3.bf16.msra.mxu0 %v451_v17 }
  0x18   :  { %424 = vmatpush3.bf16.msra.mxu1 %v452_v18  ;;  %394 = vmatprep.subr.bf16.mxu0 %v453_v19 }
  0x19   :  { %425 = vmatprep.subr.bf16.mxu1 %v463_v1 }
  0x1b   :  { %395 = vmatpush3.bf16.msra.mxu0 %v454_v20 }
  0x1c   :  { %426 = vmatpush3.bf16.msra.mxu1 %v455_v21  ;;  %396 = vmatprep.subr.bf16.mxu0 %v456_v22 }
  0x1d   :  { %427 = vmatprep.subr.bf16.mxu1 %v463_v1 }
  0x1f   :  { %397 = vmatpush3.bf16.msra.mxu0 %v457_v24 }
  0x20   :  { %428 = vmatpush3.bf16.msra.mxu1 %v458_v25 }
  0x22   :  { %270 = vmatmul.mubr.bf16.vlgmr.msra.gmra.mxu0 %v459_v26 }
  0x23   :  { %430 = vmatmul.mubr.bf16.vlgmr.msra.gmra.mxu1 %v462_v27 }
  0xe2   :  { %v398_v28 = vpop.f32.mrf.mxu0 }
  0xe3   :  { %v312_v29 = vpop.f32.mrf.mxu1 }
  0xe4   :  { %v399_v31 = vpop.f32.mrf.mxu0 }
  0xe5   :  { %v400_v32 = vadd.f32 %v399_v31, %v398_v28  ;;  %v431_v33 = vpop.f32.mrf.mxu1 }
  0xe6   :  { %v401_v35 = vpop.f32.mrf.mxu0 }
  0xe7   :  { %v272_v36 = vadd.f32 %v400_v32, %v341_v30  ;;  %v315_v37 = vpop.f32.mrf.mxu1 }
  0xe8   :  { %v402_v38 = vpop.f32.mrf.mxu0 }
  0xe9   :  { %v313_v39 = vadd.f32 %v312_v29, %v272_v36  ;;  %v403_v41 = vadd.f32 %v402_v38, %v401_v35  ;;  %v432_v42 = vpop.f32.mrf.mxu1 }
  0xeb   :  { %v275_v43 = vadd.f32 %v403_v41, %v341_v30  ;;  %v323_v45 = vadd.f32 %v375_v40, %v313_v39 }
  0xed   :  { %v316_v46 = vadd.f32 %v315_v37, %v275_v43  ;;  %v325_v48 = vmax.f32 %v323_v45, 0.0 }
  0xef   :  { %v324_v47 = vadd.f32 %v376_v44, %v316_v46 }
  0xf1   :  { %v326_v49 = vmax.f32 %v324_v47, 0.0 }
  0xf3   :  { %v380_v50 = vpack.c.bf16 %v326_v49, %v325_v48 }
  0xf5   :  { %381 = vst [vmem:[%s584_s4] sm:$0xff] %v380_v50  }

// kernel: resnet_forward.38
= control target key start
LH: loop header
LB: loop body
LE: loop exit
PB: predicated region body
PF: predicated region fallthrough
CT: control target
= control target key end

     0   :  { %v703_v33 = vmov 0.0   ;;  %vm704_vm0 = vmmov 0   ;;  %s874_s1 = inlined_call_operand.vmem [shape: bf16[640,128], index: 1, kind: input, shape index: {}]   ;;  %s875_s0 = inlined_call_operand.vmem [shape: bf16[16,640], index: 0, kind: input, shape index: {}]   ;;  %s876_s2 = inlined_call_operand.vmem [shape: f32[1,128], index: 2, kind: input, shape index: {}]   ;;  %s877_s3 = inlined_call_operand.vmem [shape: bf16[16,128], index: 3, kind: input, shape index: {}]   ;;  %s878_s4 = inlined_call_operand.vmem [shape: bf16[16,128], index: 4, kind: output, shape index: {}]  }
   0x1   :  { %v656_v0 = vld [vmem:[%s874_s1 + $0x78] sm:$0xff]   ;;  %v660_v4 = vld [vmem:[%s874_s1 + $0x70] sm:$0xff]   ;;  %v664_v8 = vld [vmem:[%s874_s1 + $0x68] sm:$0xff]  }
   0x2   :  { %v657_v1 = vld [vmem:[%s874_s1 + $0x38] sm:$0xff]   ;;  %581 = vmatprep.subr.bf16.mxu0 %v656_v0  ;;  %v661_v5 = vld [vmem:[%s874_s1 + $0x30] sm:$0xff]   ;;  %v665_v9 = vld [vmem:[%s874_s1 + $0x28] sm:$0xff]  }
   0x3   :  { %v658_v2 = vld [vmem:[%s874_s1 + $0xf8] sm:$0xff]   ;;  %582 = vmatpush3.bf16.msra.mxu0 %v657_v1  ;;  %v662_v6 = vld [vmem:[%s874_s1 + $0xf0] sm:$0xff]   ;;  %v666_v10 = vld [vmem:[%s874_s1 + $0xe8] sm:$0xff]  }
   0x4   :  { %v659_v3 = vld [vmem:[%s874_s1 + $0xb8] sm:$0xff]   ;;  %603 = vmatprep.subr.bf16.mxu1 %v658_v2  ;;  %583 = vmatprep.subr.bf16.mxu0 %v660_v4  ;;  %v663_v7 = vld [vmem:[%s874_s1 + $0xb0] sm:$0xff]   ;;  %v667_v11 = vld [vmem:[%s874_s1 + $0xa8] sm:$0xff]  }
   0x5   :  { %604 = vmatpush3.bf16.msra.mxu1 %v659_v3  ;;  %v668_v12 = vld [vmem:[%s874_s1 + $0x60] sm:$0xff]   ;;  %v672_v16 = vld [vmem:[%s874_s1 + $0x58] sm:$0xff]   ;;  %v676_v20 = vld [vmem:[%s874_s1 + $0x50] sm:$0xff]  }
   0x6   :  { %605 = vmatprep.subr.bf16.mxu1 %v662_v6  ;;  %v669_v13 = vld [vmem:[%s874_s1 + $0x20] sm:$0xff]   ;;  %v673_v17 = vld [vmem:[%s874_s1 + $0x18] sm:$0xff]   ;;  %v677_v21 = vld [vmem:[%s874_s1 + $0x10] sm:$0xff]  }
   0x7   :  { %584 = vmatpush3.bf16.msra.mxu0 %v661_v5  ;;  %v670_v14 = vld [vmem:[%s874_s1 + $0xe0] sm:$0xff]   ;;  %v674_v18 = vld [vmem:[%s874_s1 + $0xd8] sm:$0xff]   ;;  %v678_v22 = vld [vmem:[%s874_s1 + $0xd0] sm:$0xff]  }
   0x8   :  { %585 = vmatprep.subr.bf16.mxu0 %v664_v8  ;;  %v671_v15 = vld [vmem:[%s874_s1 + $0xa0] sm:$0xff]   ;;  %v675_v19 = vld [vmem:[%s874_s1 + $0x98] sm:$0xff]   ;;  %v679_v23 = vld [vmem:[%s874_s1 + $0x90] sm:$0xff]  }
   0x9   :  { %606 = vmatpush3.bf16.msra.mxu1 %v663_v7  ;;  %v680_v24 = vld [vmem:[%s874_s1 + $0x48] sm:$0xff]   ;;  %v684_v28 = vld [vmem:[%s874_s1 + $0x40] sm:$0xff]   ;;  %v694_v37 = vld [vmem:[%s874_s1 + $0x138] sm:$0xff]  }
   0xa   :  { %607 = vmatprep.subr.bf16.mxu1 %v666_v10  ;;  %v681_v25 = vld [vmem:[%s874_s1 + $0x8] sm:$0xff]   ;;  %v685_v29 = vld [vmem:[%s874_s1] sm:$0xff]   ;;  %v695_v38 = vld [vmem:[%s874_s1 + $0x130] sm:$0xff]  }
   0xb   :  { %586 = vmatpush3.bf16.msra.mxu0 %v665_v9  ;;  %v682_v26 = vld [vmem:[%s874_s1 + $0xc8] sm:$0xff]   ;;  %v686_v30 = vld [vmem:[%s874_s1 + $0xc0] sm:$0xff]   ;;  %v698_v41 = vld [vmem:[%s874_s1 + $0x118] sm:$0xff]  }
   0xc   :  { %587 = vmatprep.subr.bf16.mxu0 %v668_v12  ;;  %v683_v27 = vld [vmem:[%s874_s1 + $0x88] sm:$0xff]   ;;  %v687_v31 = vld [vmem:[%s875_s0] ss:$20 sps:$4 sm:$0xff]   ;;  %v689_v32 = vld [vmem:[%s875_s0 + $0x4] ss:$20 sps:$4 sm:$0xff]  }
   0xd   :  { %608 = vmatpush3.bf16.msra.mxu1 %v667_v11  ;;  %v690_v34 = vld [vmem:[%s874_s1 + $0x80] sm:$0xff]   ;;  %409 = vmatprep.mubr.bf16.mxu0 %v689_v32  ;;  %v691_v35 = vld [vmem:[%s875_s0 + $0x8] ss:$20 sps:$4 sm:$0xff]   ;;  %v699_v42 = vld [vmem:[%s874_s1 + $0x110] sm:$0xff]  }
   0xe   :  { %609 = vmatprep.subr.bf16.mxu1 %v670_v14  ;;  %v693_v36 = vld [vmem:[%s875_s0 + $0xc] ss:$20 sps:$4 sm:$0xff]   ;;  %v702_v45 = vld [vmem:[%s875_s0 + $0x10] ss:$20 sps:$4 sm:$0xff]  }
   0xf   :  { %588 = vmatpush3.bf16.msra.mxu0 %v669_v13  ;;  %450 = vmatprep.mubr.bf16.mxu1 %v693_v36  ;;  %v696_v39 = vld [vmem:[%s874_s1 + $0x128] sm:$0xff]   ;;  %v697_v40 = vld [vmem:[%s874_s1 + $0x120] sm:$0xff]  }
  0x10   :  { %589 = vmatprep.subr.bf16.mxu0 %v672_v16  ;;  %v700_v43 = vld [vmem:[%s874_s1 + $0x108] sm:$0xff]   ;;  %v701_v44 = vld [vmem:[%s874_s1 + $0x100] sm:$0xff]  }
  0x11   :  { %610 = vmatpush3.bf16.msra.mxu1 %v671_v15  ;;  %v522_v52 = vld [vmem:[%s876_s2] ss:$0 sm:$0xff] }
  0x12   :  { %611 = vmatprep.subr.bf16.mxu1 %v674_v18  ;;  %v573_v59 = vld [vmem:[%s877_s3] sm:$0xff]  }
  0x13   :  { %590 = vmatpush3.bf16.msra.mxu0 %v673_v17  ;;  %v574_v1 = vunpack.c.l.bf16 %v573_v59  ;;  %v575_v4 = vunpack.c.h.bf16 %v573_v59 }
  0x14   :  { %591 = vmatprep.subr.bf16.mxu0 %v676_v20 }
  0x15   :  { %612 = vmatpush3.bf16.msra.mxu1 %v675_v19 }
  0x16   :  { %613 = vmatprep.subr.bf16.mxu1 %v678_v22 }
  0x17   :  { %592 = vmatpush3.bf16.msra.mxu0 %v677_v21 }
  0x18   :  { %593 = vmatprep.subr.bf16.mxu0 %v680_v24 }
  0x19   :  { %614 = vmatpush3.bf16.msra.mxu1 %v679_v23 }
  0x1a   :  { %615 = vmatprep.subr.bf16.mxu1 %v682_v26 }
  0x1b   :  { %594 = vmatpush3.bf16.msra.mxu0 %v681_v25 }
  0x1c   :  { %595 = vmatprep.subr.bf16.mxu0 %v684_v28 }
  0x1d   :  { %616 = vmatpush3.bf16.msra.mxu1 %v683_v27 }
  0x1e   :  { %617 = vmatprep.subr.bf16.mxu1 %v686_v30 }
  0x1f   :  { %596 = vmatpush3.bf16.msra.mxu0 %v685_v29 }
  0x20   :  { %634 = vmatprep.subr.bf16.mxu0 %v703_v33 }
  0x21   :  { %618 = vmatpush3.bf16.msra.mxu1 %v690_v34 }
  0x22   :  { %410 = vmatmul.mubr.bf16.vlgmr.msra.gmra.mxu0 %v687_v31 }
  0x23   :  { %650 = vmatprep.mubr.msk.bf16.mxu0 %vm704_vm0, %v703_v33  ;;  %635 = vmatpush3.bf16.msra.mxu0 %v694_v37 }
  0x24   :  { %451 = vmatmul.mubr.bf16.vlgmr.msra.gmra.mxu1 %v691_v35  ;;  %636 = vmatprep.subr.bf16.mxu0 %v703_v33 }
  0x27   :  { %637 = vmatpush3.bf16.msra.mxu0 %v695_v38 }
  0x28   :  { %638 = vmatprep.subr.bf16.mxu0 %v703_v33 }
  0x2b   :  { %639 = vmatpush3.bf16.msra.mxu0 %v696_v39 }
  0x2c   :  { %640 = vmatprep.subr.bf16.mxu0 %v703_v33 }
  0x2f   :  { %641 = vmatpush3.bf16.msra.mxu0 %v697_v40 }
  0x30   :  { %642 = vmatprep.subr.bf16.mxu0 %v703_v33 }
  0x33   :  { %643 = vmatpush3.bf16.msra.mxu0 %v698_v41 }
  0x34   :  { %644 = vmatprep.subr.bf16.mxu0 %v703_v33 }
  0x37   :  { %645 = vmatpush3.bf16.msra.mxu0 %v699_v42 }
  0x38   :  { %646 = vmatprep.subr.bf16.mxu0 %v703_v33 }
  0x3b   :  { %647 = vmatpush3.bf16.msra.mxu0 %v700_v43 }
  0x3c   :  { %648 = vmatprep.subr.bf16.mxu0 %v703_v33 }
  0x3f   :  { %649 = vmatpush3.bf16.msra.mxu0 %v701_v44 }
  0x42   :  { %651 = vmatmul.mubr.bf16.vlgmr.msra.gmra.mxu0 %v702_v45 }
  0xe2   :  { %v597_v46 = vpop.f32.mrf.mxu0 }
  0xe4   :  { %v598_v47 = vpop.f32.mrf.mxu0  ;;  %v619_v48 = vpop.f32.mrf.mxu1 }
  0xe5   :  { %v599_v51 = vadd.f32 %v598_v47, %v597_v46 }
  0xe6   :  { %v600_v49 = vpop.f32.mrf.mxu0  ;;  %v620_v50 = vpop.f32.mrf.mxu1 }
  0xe7   :  { %v412_v55 = vadd.f32 %v599_v51, %v522_v52  ;;  %v621_v56 = vadd.f32 %v620_v50, %v619_v48 }
  0xe8   :  { %v601_v53 = vpop.f32.mrf.mxu0  ;;  %v622_v54 = vpop.f32.mrf.mxu1 }
  0xe9   :  { %v602_v57 = vadd.f32 %v601_v53, %v600_v49  ;;  %v453_v62 = vadd.f32 %v621_v56, %v412_v55 }
  0xea   :  { %v623_v58 = vpop.f32.mrf.mxu1 }
  0xeb   :  { %v415_v60 = vadd.f32 %v602_v57, %v522_v52  ;;  %v624_v61 = vadd.f32 %v623_v58, %v622_v54 }
  0xed   :  { %v456_v3 = vadd.f32 %v624_v61, %v415_v60 }
 0x102   :  { %v493_v63 = vpop.f32.mrf.mxu0 }
 0x103   :  { %v494_v0 = vadd.f32 %v493_v63, %v453_v62 }
 0x104   :  { %v652_v2 = vpop.f32.mrf.mxu0 }
 0x105   :  { %v504_v6 = vadd.f32 %v574_v1, %v494_v0 }
 0x106   :  { %v496_v5 = vpop.f32.mrf.mxu0 }
 0x107   :  { %v497_v7 = vadd.f32 %v496_v5, %v456_v3  ;;  %v506_v10 = vmax.f32 %v504_v6, 0.0 }
 0x108   :  { %v653_v8 = vpop.f32.mrf.mxu0 }
 0x109   :  { %v505_v9 = vadd.f32 %v575_v4, %v497_v7 }
 0x10b   :  { %v507_v11 = vmax.f32 %v505_v9, 0.0 }
 0x10d   :  { %v579_v12 = vpack.c.bf16 %v507_v11, %v506_v10 }
 0x10f   :  { %580 = vst [vmem:[%s878_s4] sm:$0xff] %v579_v12  }

// kernel: resnet_forward.39
= control target key start
LH: loop header
LB: loop body
LE: loop exit
PB: predicated region body
PF: predicated region fallthrough
CT: control target
= control target key end

     0   :  { %v690_v33 = vmov 0.0   ;;  %vm691_vm0 = vmmov 0   ;;  %s853_s1 = inlined_call_operand.vmem [shape: bf16[640,128], index: 1, kind: input, shape index: {}]   ;;  %s854_s0 = inlined_call_operand.vmem [shape: bf16[16,640], index: 0, kind: input, shape index: {}]   ;;  %s855_s2 = inlined_call_operand.vmem [shape: f32[1,128], index: 2, kind: input, shape index: {}]   ;;  %s856_s3 = inlined_call_operand.vmem [shape: bf16[16,128], index: 3, kind: output, shape index: {}]  }
   0x1   :  { %v643_v0 = vld [vmem:[%s853_s1 + $0x78] sm:$0xff]   ;;  %v647_v4 = vld [vmem:[%s853_s1 + $0x70] sm:$0xff]   ;;  %v651_v8 = vld [vmem:[%s853_s1 + $0x68] sm:$0xff]  }
   0x2   :  { %v644_v1 = vld [vmem:[%s853_s1 + $0x38] sm:$0xff]   ;;  %568 = vmatprep.subr.bf16.mxu0 %v643_v0  ;;  %v648_v5 = vld [vmem:[%s853_s1 + $0x30] sm:$0xff]   ;;  %v652_v9 = vld [vmem:[%s853_s1 + $0x28] sm:$0xff]  }
   0x3   :  { %v645_v2 = vld [vmem:[%s853_s1 + $0xf8] sm:$0xff]   ;;  %569 = vmatpush3.bf16.msra.mxu0 %v644_v1  ;;  %v649_v6 = vld [vmem:[%s853_s1 + $0xf0] sm:$0xff]   ;;  %v653_v10 = vld [vmem:[%s853_s1 + $0xe8] sm:$0xff]  }
   0x4   :  { %v646_v3 = vld [vmem:[%s853_s1 + $0xb8] sm:$0xff]   ;;  %590 = vmatprep.subr.bf16.mxu1 %v645_v2  ;;  %570 = vmatprep.subr.bf16.mxu0 %v647_v4  ;;  %v650_v7 = vld [vmem:[%s853_s1 + $0xb0] sm:$0xff]   ;;  %v654_v11 = vld [vmem:[%s853_s1 + $0xa8] sm:$0xff]  }
   0x5   :  { %591 = vmatpush3.bf16.msra.mxu1 %v646_v3  ;;  %v655_v12 = vld [vmem:[%s853_s1 + $0x60] sm:$0xff]   ;;  %v659_v16 = vld [vmem:[%s853_s1 + $0x58] sm:$0xff]   ;;  %v663_v20 = vld [vmem:[%s853_s1 + $0x50] sm:$0xff]  }
   0x6   :  { %592 = vmatprep.subr.bf16.mxu1 %v649_v6  ;;  %v656_v13 = vld [vmem:[%s853_s1 + $0x20] sm:$0xff]   ;;  %v660_v17 = vld [vmem:[%s853_s1 + $0x18] sm:$0xff]   ;;  %v664_v21 = vld [vmem:[%s853_s1 + $0x10] sm:$0xff]  }
   0x7   :  { %571 = vmatpush3.bf16.msra.mxu0 %v648_v5  ;;  %v657_v14 = vld [vmem:[%s853_s1 + $0xe0] sm:$0xff]   ;;  %v661_v18 = vld [vmem:[%s853_s1 + $0xd8] sm:$0xff]   ;;  %v665_v22 = vld [vmem:[%s853_s1 + $0xd0] sm:$0xff]  }
   0x8   :  { %572 = vmatprep.subr.bf16.mxu0 %v651_v8  ;;  %v658_v15 = vld [vmem:[%s853_s1 + $0xa0] sm:$0xff]   ;;  %v662_v19 = vld [vmem:[%s853_s1 + $0x98] sm:$0xff]   ;;  %v666_v23 = vld [vmem:[%s853_s1 + $0x90] sm:$0xff]  }
   0x9   :  { %593 = vmatpush3.bf16.msra.mxu1 %v650_v7  ;;  %v667_v24 = vld [vmem:[%s853_s1 + $0x48] sm:$0xff]   ;;  %v671_v28 = vld [vmem:[%s853_s1 + $0x40] sm:$0xff]   ;;  %v681_v37 = vld [vmem:[%s853_s1 + $0x138] sm:$0xff]  }
   0xa   :  { %594 = vmatprep.subr.bf16.mxu1 %v653_v10  ;;  %v668_v25 = vld [vmem:[%s853_s1 + $0x8] sm:$0xff]   ;;  %v672_v29 = vld [vmem:[%s853_s1] sm:$0xff]   ;;  %v682_v38 = vld [vmem:[%s853_s1 + $0x130] sm:$0xff]  }
   0xb   :  { %573 = vmatpush3.bf16.msra.mxu0 %v652_v9  ;;  %v669_v26 = vld [vmem:[%s853_s1 + $0xc8] sm:$0xff]   ;;  %v673_v30 = vld [vmem:[%s853_s1 + $0xc0] sm:$0xff]   ;;  %v685_v41 = vld [vmem:[%s853_s1 + $0x118] sm:$0xff]  }
   0xc   :  { %574 = vmatprep.subr.bf16.mxu0 %v655_v12  ;;  %v670_v27 = vld [vmem:[%s853_s1 + $0x88] sm:$0xff]   ;;  %v674_v31 = vld [vmem:[%s854_s0] ss:$20 sps:$4 sm:$0xff]   ;;  %v676_v32 = vld [vmem:[%s854_s0 + $0x4] ss:$20 sps:$4 sm:$0xff]  }
   0xd   :  { %595 = vmatpush3.bf16.msra.mxu1 %v654_v11  ;;  %v677_v34 = vld [vmem:[%s853_s1 + $0x80] sm:$0xff]   ;;  %406 = vmatprep.mubr.bf16.mxu0 %v676_v32  ;;  %v678_v35 = vld [vmem:[%s854_s0 + $0x8] ss:$20 sps:$4 sm:$0xff]   ;;  %v686_v42 = vld [vmem:[%s853_s1 + $0x110] sm:$0xff]  }
   0xe   :  { %596 = vmatprep.subr.bf16.mxu1 %v657_v14  ;;  %v680_v36 = vld [vmem:[%s854_s0 + $0xc] ss:$20 sps:$4 sm:$0xff]   ;;  %v689_v45 = vld [vmem:[%s854_s0 + $0x10] ss:$20 sps:$4 sm:$0xff]  }
   0xf   :  { %575 = vmatpush3.bf16.msra.mxu0 %v656_v13  ;;  %447 = vmatprep.mubr.bf16.mxu1 %v680_v36  ;;  %v683_v39 = vld [vmem:[%s853_s1 + $0x128] sm:$0xff]   ;;  %v684_v40 = vld [vmem:[%s853_s1 + $0x120] sm:$0xff]  }
  0x10   :  { %576 = vmatprep.subr.bf16.mxu0 %v659_v16  ;;  %v687_v43 = vld [vmem:[%s853_s1 + $0x108] sm:$0xff]   ;;  %v688_v44 = vld [vmem:[%s853_s1 + $0x100] sm:$0xff]  }
  0x11   :  { %597 = vmatpush3.bf16.msra.mxu1 %v658_v15  ;;  %v513_v54 = vld [vmem:[%s855_s2] ss:$0 sm:$0xff] }
  0x12   :  { %598 = vmatprep.subr.bf16.mxu1 %v661_v18 }
  0x13   :  { %577 = vmatpush3.bf16.msra.mxu0 %v660_v17 }
  0x14   :  { %578 = vmatprep.subr.bf16.mxu0 %v663_v20 }
  0x15   :  { %599 = vmatpush3.bf16.msra.mxu1 %v662_v19 }
  0x16   :  { %600 = vmatprep.subr.bf16.mxu1 %v665_v22 }
  0x17   :  { %579 = vmatpush3.bf16.msra.mxu0 %v664_v21 }
  0x18   :  { %580 = vmatprep.subr.bf16.mxu0 %v667_v24 }
  0x19   :  { %601 = vmatpush3.bf16.msra.mxu1 %v666_v23 }
  0x1a   :  { %602 = vmatprep.subr.bf16.mxu1 %v669_v26 }
  0x1b   :  { %581 = vmatpush3.bf16.msra.mxu0 %v668_v25 }
  0x1c   :  { %582 = vmatprep.subr.bf16.mxu0 %v671_v28 }
  0x1d   :  { %603 = vmatpush3.bf16.msra.mxu1 %v670_v27 }
  0x1e   :  { %604 = vmatprep.subr.bf16.mxu1 %v673_v30 }
  0x1f   :  { %583 = vmatpush3.bf16.msra.mxu0 %v672_v29 }
  0x20   :  { %621 = vmatprep.subr.bf16.mxu0 %v690_v33 }
  0x21   :  { %605 = vmatpush3.bf16.msra.mxu1 %v677_v34 }
  0x22   :  { %407 = vmatmul.mubr.bf16.vlgmr.msra.gmra.mxu0 %v674_v31 }
  0x23   :  { %637 = vmatprep.mubr.msk.bf16.mxu0 %vm691_vm0, %v690_v33  ;;  %622 = vmatpush3.bf16.msra.mxu0 %v681_v37 }
  0x24   :  { %448 = vmatmul.mubr.bf16.vlgmr.msra.gmra.mxu1 %v678_v35  ;;  %623 = vmatprep.subr.bf16.mxu0 %v690_v33 }
  0x27   :  { %624 = vmatpush3.bf16.msra.mxu0 %v682_v38 }
  0x28   :  { %625 = vmatprep.subr.bf16.mxu0 %v690_v33 }
  0x2b   :  { %626 = vmatpush3.bf16.msra.mxu0 %v683_v39 }
  0x2c   :  { %627 = vmatprep.subr.bf16.mxu0 %v690_v33 }
  0x2f   :  { %628 = vmatpush3.bf16.msra.mxu0 %v684_v40 }
  0x30   :  { %629 = vmatprep.subr.bf16.mxu0 %v690_v33 }
  0x33   :  { %630 = vmatpush3.bf16.msra.mxu0 %v685_v41 }
  0x34   :  { %631 = vmatprep.subr.bf16.mxu0 %v690_v33 }
  0x37   :  { %632 = vmatpush3.bf16.msra.mxu0 %v686_v42 }
  0x38   :  { %633 = vmatprep.subr.bf16.mxu0 %v690_v33 }
  0x3b   :  { %634 = vmatpush3.bf16.msra.mxu0 %v687_v43 }
  0x3c   :  { %635 = vmatprep.subr.bf16.mxu0 %v690_v33 }
  0x3f   :  { %636 = vmatpush3.bf16.msra.mxu0 %v688_v44 }
  0x42   :  { %638 = vmatmul.mubr.bf16.vlgmr.msra.gmra.mxu0 %v689_v45 }
  0xe2   :  { %v584_v46 = vpop.f32.mrf.mxu0 }
  0xe4   :  { %v585_v47 = vpop.f32.mrf.mxu0  ;;  %v606_v48 = vpop.f32.mrf.mxu1 }
  0xe5   :  { %v586_v53 = vadd.f32 %v585_v47, %v584_v46 }
  0xe6   :  { %v587_v49 = vpop.f32.mrf.mxu0  ;;  %v607_v50 = vpop.f32.mrf.mxu1 }
  0xe7   :  { %v409_v57 = vadd.f32 %v586_v53, %v513_v54  ;;  %v608_v58 = vadd.f32 %v607_v50, %v606_v48 }
  0xe8   :  { %v588_v51 = vpop.f32.mrf.mxu0  ;;  %v609_v52 = vpop.f32.mrf.mxu1 }
  0xe9   :  { %v589_v55 = vadd.f32 %v588_v51, %v587_v49  ;;  %v450_v62 = vadd.f32 %v608_v58, %v409_v57 }
  0xea   :  { %v610_v56 = vpop.f32.mrf.mxu1 }
  0xeb   :  { %v412_v59 = vadd.f32 %v589_v55, %v513_v54  ;;  %v611_v60 = vadd.f32 %v610_v56, %v609_v52 }
  0xed   :  { %v453_v1 = vadd.f32 %v611_v60, %v412_v59 }
 0x102   :  { %v490_v61 = vpop.f32.mrf.mxu0 }
 0x103   :  { %v491_v0 = vadd.f32 %v490_v61, %v450_v62 }
 0x104   :  { %v639_v63 = vpop.f32.mrf.mxu0 }
 0x105   :  { %v497_v5 = vmax.f32 %v491_v0, 0.0 }
 0x106   :  { %v493_v2 = vpop.f32.mrf.mxu0 }
 0x107   :  { %v494_v3 = vadd.f32 %v493_v2, %v453_v1 }
 0x108   :  { %v640_v4 = vpop.f32.mrf.mxu0 }
 0x109   :  { %v498_v6 = vmax.f32 %v494_v3, 0.0 }
 0x10b   :  { %v566_v7 = vpack.c.bf16 %v498_v6, %v497_v5 }
 0x10d   :  { %567 = vst [vmem:[%s856_s3] sm:$0xff] %v566_v7  }

// kernel: resnet_forward.41
= control target key start
LH: loop header
LB: loop body
LE: loop exit
PB: predicated region body
PF: predicated region fallthrough
CT: control target
= control target key end

     0   :  { %vm19_vm0 = vcmask 517120   ;;  %v30_v1 = vlaneseq  ;;  %v207_v2 = vmov 0.0   ;;  %vm208_vm1 = vmmov 0   ;;  %s268_s0 = inlined_call_operand.vmem [shape: bf16[2,1,64], index: 0, kind: input, shape index: {}]   ;;  %s269_s1 = inlined_call_operand.vmem [shape: f32[64,128], index: 1, kind: input, shape index: {}]   ;;  %s270_s2 = inlined_call_operand.vmem [shape: f32[1,128], index: 2, kind: input, shape index: {}]   ;;  %s271_s3 = inlined_call_operand.hbm [shape: f32[2,128], index: 3, kind: output, shape index: {}]  }
   0x1   :  { %v55_v0 = vld [vmem:[%s269_s1 + $0x38] sm:$0xff]  ;;  %163 = vmatprep.subr.mxu0 %v207_v2  ;;  %v54_v3 = vld [vmem:[%s269_s1 + $0x30] sm:$0xff]  ;;  %179 = vmatprep.mubr.msk.f32.mxu0 %vm208_vm1, %v207_v2  ;;  %20 = vst.msk [vmem:[#allocation2] sm:$0x3] %vm19_vm0, %v207_v2  ;;  %v22_v4 = vld [vmem:[%s268_s0] sm:$0x1] }
   0x2   :  { %164 = vmatpush3.msra.mxu0 %v55_v0  ;;  %v31_v5 = vshrl.u32 %v30_v1, 7  ;;  %v53_v6 = vld [vmem:[%s269_s1 + $0x28] sm:$0xff]  ;;  %v23_v7 = vld [vmem:[%s268_s0 + $0x1] sm:$0x1]  ;;  %v24_v8 = vunpack.c.l.bf16 %v22_v4 }
   0x3   :  { %165 = vmatprep.subr.mxu0 %v207_v2 }
   0x4   :  { %8 = vsyncpa [#allocation4], 0  ;;  %166 = vmatpush3.msra.mxu0 %v54_v3  ;;  %v25_v9 = vunpack.c.l.bf16 %v23_v7  ;;  %v32_v10 = vsub.s32 0, %v31_v5  ;;  %v52_v11 = vld [vmem:[%s269_s1 + $0x20] sm:$0xff]  ;;  %vm38_vm2 = vcmask 1041409   ;;  %v51_v14 = vld [vmem:[%s269_s1 + $0x18] sm:$0xff] }
   0x5   :  { %167 = vmatprep.subr.mxu0 %v207_v2  ;;  %v50_v17 = vld [vmem:[%s269_s1 + $0x10] sm:$0xff]  ;;  %v49_v19 = vld [vmem:[%s269_s1 + $0x8] sm:$0xff]  ;;  %v48_v20 = vld [vmem:[%s269_s1] sm:$0xff]  ;;  %vm63_vm3 = vcmask 523264   ;;  %s209_s6 = smov [#allocation3]  }
   0x6   :  { %168 = vmatpush3.msra.mxu0 %v53_v6  ;;  %v33_v12 = vrot.slane %v24_v8, %v32_v10  ;;  %v37_v13 = vrot.slane %v25_v9, %v32_v10  ;;  %v152_v22 = vld [vmem:[%s270_s2] ss:$0 sm:$0xff]  ;;  %s144_s7 = sshll.u32 %s209_s6, 4  ;;  %s145_s7 = int_to_ptr.vmem [resolvable:$true] %s144_s7 }
   0x7   :  { %169 = vmatprep.subr.mxu0 %v207_v2  ;;  %s185_s8 = scalar_lea.vmem %s145_s7, 32  ;;  %p190_p1 = scmp.lt.s32.totalorder %s145_s7, %s145_s7 }
   0x8   :  { %170 = vmatpush3.msra.mxu0 %v52_v11  ;;  %v21_v15 = vld [vmem:[#allocation2] sm:$0x3]  ;;  %v39_v16 = vsel %vm38_vm2, %v37_v13, %v33_v12  ;;  %p186_p0 = scmp.ne.s32.totalorder %s145_s7, %s185_s8  ;;  %p191_p2 = scmp.lt.s32.totalorder %s185_s8, %s185_s8 }
   0x9   :  { %171 = vmatprep.subr.mxu0 %v207_v2  ;;  %v41_v18 = vadd.f32 %v39_v16, %v21_v15 }
   0xa   :  { %172 = vmatpush3.msra.mxu0 %v51_v14  ;;  %p192_p3 = por %p191_p2, %p190_p1 }
   0xb   :  { %173 = vmatprep.subr.mxu0 %v207_v2  ;;  %43 = vst.msk [vmem:[#allocation2] sm:$0x3] %vm19_vm0, %v41_v18 }
   0xc   :  { %174 = vmatpush3.msra.mxu0 %v50_v17  ;;  %p193_p4 = pnand %p192_p3, %p186_p0 }
   0xd   :  { %175 = vmatprep.subr.mxu0 %v207_v2 }
   0xe   :  { %176 = vmatpush3.msra.mxu0 %v49_v19 }
   0xf   :  { %177 = vmatprep.subr.mxu0 %v207_v2 }
  0x10   :  { %178 = vmatpush3.msra.mxu0 %v48_v20 }
  0x12   :  { %v47_v21 = vld [vmem:[#allocation2] sm:$0x3] }
  0x13   :  { %180 = vmatmul.mubr.msk.f32.vlgmr.msra.gmra.mxu0 %vm63_vm3, %v47_v21 }
  0xd3   :  { %v133_v23 = vpop.f32.mrf.mxu0 }
  0xd4   :  { %v134_v24 = vadd.f32 %v152_v22, %v133_v23 }
  0xd5   :  { %v181_v25 = vpop.f32.mrf.mxu0 }
  0xd6   :  { %137 = vst [vmem:[#allocation3] sm:$0x3] %v134_v24 }
  0xd7   :  { %196 = shalt.err (!%p193_p4)
}
  0xd8   :  { %147 = dma.vmem_to_hbm [thread:$0]  %s145_s7, 32, %s271_s3, [#allocation4]  }
  0xd9   :  { %205 = dma.done.wait [#allocation4], 32  }
  0xda   :  { %206 = vsyncadd [#allocation4], 4294967264 }
  0xdb   :  { %151 = vsyncpa [#allocation4], 1 }

</bundles_post_ra>
